<compile_context>
chip_gen: v7x
topology: tpu7x:2x2x1
jax: 0.10.0
libtpu: 0.0.40
codegen_flags: <defaults>
</compile_context>

<pallas_src>
import math
import functools

import jax
import jax.numpy as jnp
from jax import lax
from jax.experimental import pallas as pl
from jax.experimental.pallas import tpu as pltpu


_LANES = 128
_ON_TPU = jax.default_backend() == "tpu"


def _vmem_limit_bytes():
    # Generation-aware scoped-VMEM cap; safe fallback if the query is unavailable.
    try:
        cap = pltpu.get_tpu_info().vmem_capacity_bytes
        return int(min(max(cap // 2, 32 * 1024 * 1024), 96 * 1024 * 1024))
    except Exception:
        return 32 * 1024 * 1024


def _rot_to(x, t, axis):
    """y[i] = x[(i + t) mod n] along `axis` (static integer t)."""
    n = x.shape[axis]
    shift = (-t) % n
    if shift == 0:
        return x
    if _ON_TPU:
        return pltpu.roll(x, shift, axis)          # XLU rotate slot on TPU
    return jnp.roll(x, shift, axis)                # fallback for non-TPU backends


# ------------------- Kernel 1: dark channel + separable min-pool erosion -------------------

def _dark_erode_kernel(prev_ref, main_ref, next_ref, dark_ref, *, pad, H, W, TR, HALO):
    # prev/next: (1, 3, HALO, W) halo blocks above/below the strip.
    # main:      (1, 3, TR, W) strip.   dark: (1, TR, W) output strip.
    s = pl.program_id(1)
    row0 = s * TR                                   # global row of main row 0

    def chmin(ref):
        return jnp.minimum(jnp.minimum(ref[0, 0], ref[0, 1]), ref[0, 2])

    dc_prev = chmin(prev_ref)                       # (HALO, W)
    dc_main = chmin(main_ref)                       # (TR,   W)
    dc_next = chmin(next_ref)                       # (HALO, W)

    # Rows outside the image take the torch F.pad(value=1) constant.  This also
    # neutralizes the clamped halo blocks at the first/last strip and any
    # ragged last strip.
    r_prev = lax.broadcasted_iota(jnp.int32, (HALO, W), 0) + (row0 - HALO)
    r_main = lax.broadcasted_iota(jnp.int32, (TR, W), 0) + row0
    r_next = lax.broadcasted_iota(jnp.int32, (HALO, W), 0) + (row0 + TR)
    dc_prev = jnp.where(r_prev >= 0, dc_prev, 1.0)
    dc_main = jnp.where(r_main < H, dc_main, 1.0)
    dc_next = jnp.where(r_next < H, dc_next, 1.0)

    # Row (sublane) pass over strip + halos.  Rotate wrap-around never reaches
    # the central TR rows because pad <= HALO.
    comb = jnp.concatenate([dc_prev, dc_main, dc_next], axis=0)   # (TR + 2*HALO, W)
    pooled = comb
    for t in range(1, pad + 1):
        pooled = jnp.minimum(pooled,
                             jnp.minimum(_rot_to(comb, t, 0), _rot_to(comb, -t, 0)))
    rowmin = pooled[HALO:HALO + TR, :]                             # 8-aligned slice

    # Column (lane) pass: rotate + iota edge mask (constant-1.0 fill at W edges).
    cidx = lax.broadcasted_iota(jnp.int32, (TR, W), 1)
    out = rowmin
    for t in range(1, pad + 1):
        fwd = jnp.where(cidx < W - t, _rot_to(rowmin, t, 1), 1.0)   # rowmin[:, j + t]
        bwd = jnp.where(cidx >= t, _rot_to(rowmin, -t, 1), 1.0)     # rowmin[:, j - t]
        out = jnp.minimum(out, jnp.minimum(fwd, bwd))

    dark_ref[0] = out


def dark_channel_erode(foggy, ksize, *, strip_rows=256):
    B, C, H, W = foggy.shape
    assert C == 3
    pad = (ksize - 1) // 2
    halo = max(8, -(-pad // 8) * 8)

    # Strip height: multiple of the halo block, capped so one foggy strip block
    # stays at a few MiB of VMEM regardless of image width.
    budget = max(halo, ((4 << 20) // max(1, 3 * W * 4)) // halo * halo)
    tr = max(halo, min(strip_rows, budget) // halo * halo)
    tr = min(tr, -(-H // halo) * halo)
    n_strips = -(-H // tr)
    r = tr // halo
    last_blk = -(-H // halo) - 1

    # TODO(synk): if production W is not a multiple of 128, retile the dark
    # output to lane-dense (rows,128) like kernel 2 to avoid masked stores.
    kern = functools.partial(_dark_erode_kernel, pad=pad, H=H, W=W, TR=tr, HALO=halo)
    return pl.pallas_call(
        kern,
        out_shape=jax.ShapeDtypeStruct((B, H, W), foggy.dtype),
        grid_spec=pltpu.PrefetchScalarGridSpec(
            num_scalar_prefetch=0,
            grid=(B, n_strips),
            in_specs=[
                pl.BlockSpec((1, C, halo, W),
                             lambda b, s: (b, 0, jnp.maximum(s * r - 1, 0), 0)),
                pl.BlockSpec((1, C, tr, W), lambda b, s: (b, 0, s, 0)),
                pl.BlockSpec((1, C, halo, W),
                             lambda b, s: (b, 0, jnp.minimum((s + 1) * r, last_blk), 0)),
            ],
            out_specs=pl.BlockSpec((1, tr, W), lambda b, s: (b, s, 0)),
        ),
        compiler_params=pltpu.CompilerParams(
            dimension_semantics=("parallel", "parallel"),
            vmem_limit_bytes=_vmem_limit_bytes(),
        ),
    )(foggy, foggy, foggy)


# ------------------- Kernel 2: hazeline squared-error partial sums -------------------

def _hazeline_kernel(a_ref, clear_ref, foggy_ref, out_ref, acc_ref, *, n_pix, tr, needs_mask):
    # a_ref: (B, 3) f32 in SMEM.  clear/foggy: (1, 3, tr, 128) lane-dense tiles.
    # out_ref: (1, 8, 128) per-batch partial-sum block.  acc_ref: (8, 128) VMEM scratch.
    b = pl.program_id(0)
    t = pl.program_id(1)

    @pl.when(t == 0)
    def _():
        acc_ref[...] = jnp.zeros_like(acc_ref)

    c0 = clear_ref[0, 0].astype(jnp.float32)
    c1 = clear_ref[0, 1].astype(jnp.float32)
    c2 = clear_ref[0, 2].astype(jnp.float32)
    f0 = foggy_ref[0, 0].astype(jnp.float32)
    f1 = foggy_ref[0, 1].astype(jnp.float32)
    f2 = foggy_ref[0, 2].astype(jnp.float32)

    # clamp_(1e-6) on the channel sums, one reciprocal each instead of 3 divides.
    # TODO(synk): gate approx=True (EUP) per generation on v7x once tolerance re-validated.
    inv_c = pl.reciprocal(jnp.maximum(c0 + c1 + c2, 1e-6))
    inv_f = pl.reciprocal(jnp.maximum(f0 + f1 + f2, 1e-6))

    a0, a1, a2 = a_ref[b, 0], a_ref[b, 1], a_ref[b, 2]

    cd0, cd1, cd2 = c0 * inv_c - a0, c1 * inv_c - a1, c2 * inv_c - a2   # gamma - A
    fd0, fd1, fd2 = f0 * inv_f - a0, f1 * inv_f - a1, f2 * inv_f - a2   # sigma - A

    # F.normalize(x, p=2, dim=1, eps=1e-12) == x * min(rsqrt(||x||^2), 1/1e-12)
    inv_cn = jnp.minimum(lax.rsqrt(cd0 * cd0 + cd1 * cd1 + cd2 * cd2), 1e12)
    inv_fn = jnp.minimum(lax.rsqrt(fd0 * fd0 + fd1 * fd1 + fd2 * fd2), 1e12)

    d0 = fd0 * inv_fn - cd0 * inv_cn
    d1 = fd1 * inv_fn - cd1 * inv_cn
    d2 = fd2 * inv_fn - cd2 * inv_cn

    term = d0 * d0 + d1 * d1 + d2 * d2                 # (tr, 128)
    if needs_mask:
        row = t * tr + lax.broadcasted_iota(jnp.int32, term.shape, 0)
        lane = lax.broadcasted_iota(jnp.int32, term.shape, 1)
        term = jnp.where(row * _LANES + lane < n_pix, term, 0.0)

    acc_ref[...] += jnp.sum(term.reshape(tr // 8, 8, _LANES), axis=0)

    @pl.when(t == pl.num_programs(1) - 1)
    def _():
        out_ref[0] = acc_ref[...]


def hazeline_sq_sums(clear, foggy, A_norm, *, tile_rows=1024):
    """Per-batch sum over pixels of ||normalize(sigma - A) - normalize(gamma - A)||^2."""
    B, C, H, W = foggy.shape
    assert C == 3
    N = H * W
    rows = -(-N // _LANES)                # ceil(N / 128)
    Np = rows * _LANES

    cf = clear.reshape(B, C, N)
    ff = foggy.reshape(B, C, N)
    if Np != N:
        # Only when H*W is not a multiple of 128; padded pixels are masked in-kernel.
        cf = jnp.pad(cf, ((0, 0), (0, 0), (0, Np - N)))
        ff = jnp.pad(ff, ((0, 0), (0, 0), (0, Np - N)))
    cf = cf.reshape(B, C, rows, _LANES)
    ff = ff.reshape(B, C, rows, _LANES)

    tr = max(8, min(tile_rows, -(-rows // 8) * 8) // 8 * 8)
    nt = -(-rows // tr)                   # cdiv grid; ragged last tile masked in-kernel
    needs_mask = (Np != N) or (rows % tr != 0)

    partials = pl.pallas_call(
        functools.partial(_hazeline_kernel, n_pix=N, tr=tr, needs_mask=needs_mask),
        out_shape=jax.ShapeDtypeStruct((B, 8, _LANES), jnp.float32),
        grid_spec=pltpu.PrefetchScalarGridSpec(
            num_scalar_prefetch=0,
            grid=(B, nt),
            in_specs=[
                pl.BlockSpec(memory_space=pltpu.MemorySpace.SMEM),             # A (B, 3)
                pl.BlockSpec((1, C, tr, _LANES), lambda b, t: (b, 0, t, 0)),   # clear tiles
                pl.BlockSpec((1, C, tr, _LANES), lambda b, t: (b, 0, t, 0)),   # foggy tiles
            ],
            out_specs=pl.BlockSpec((1, 8, _LANES), lambda b, t: (b, 0, 0)),
            scratch_shapes=[pltpu.VMEM((8, _LANES), jnp.float32)],
        ),
        compiler_params=pltpu.CompilerParams(
            dimension_semantics=("parallel", "arbitrary"),
            vmem_limit_bytes=_vmem_limit_bytes(),
        ),
    )(A_norm, cf, ff)
    return jnp.sum(partials, axis=(1, 2))   # (B,)


# ------------------------------- Glue (shared by kernel path & reference) -------------------------------

def _atmospheric_light(dark, foggy):
    """Torch: argsort dark, take top numpx, sum entries 1..numpx-1, divide by numpx.

    TODO(synk): there is no Pallas TPU sort/top-k primitive; lax.top_k + gather
    stays as XLA glue.  Tie-breaking differs from torch.argsort (itself
    implementation-defined), so the SAME helper is used by the reference.
    """
    B, C, H, W = foggy.shape
    imsz = H * W
    numpx = int(max(math.floor(imsz / 1000), 1))
    darkvec = dark.reshape(B, imsz)
    imvec = foggy.reshape(B, 3, imsz)
    if numpx > 1:
        _, top_idx = lax.top_k(darkvec, numpx)            # descending by value
        sel = top_idx[:, : numpx - 1]                      # == torch indices[:, 1:numpx]
        gathered = jnp.take_along_axis(imvec, sel[:, None, :], axis=2)
        atmsum = jnp.sum(gathered, axis=2)
    else:
        atmsum = jnp.zeros((B, 3), foggy.dtype)
    # NOTE: sums numpx-1 pixels but divides by numpx — faithful quirk of the torch original.
    return atmsum / numpx                                  # (B, 3)


# ------------------------------- Full CRLoss forward -------------------------------

def cr_loss(clear, foggy, sz, *, strip_rows=256, tile_rows=1024):
    B, C, H, W = foggy.shape
    assert C == 3
    dark = dark_channel_erode(foggy, sz, strip_rows=strip_rows)     # Pallas kernel 1
    A = _atmospheric_light(dark, foggy)                             # XLA glue
    A = A / jnp.maximum(jnp.sum(A, axis=1, keepdims=True), 1e-6)
    A = A.astype(jnp.float32)
    sq = hazeline_sq_sums(clear, foggy, A, tile_rows=tile_rows)     # Pallas kernel 2
    return jnp.sum(sq) / (B * C * H * W)                            # MSE reduction='mean'


# ------------------------- Pure-JAX reference for self-check -------------------------

def ref_cr_loss(clear, foggy, sz):
    B, C, H, W = foggy.shape
    pad = (sz - 1) // 2
    dc = jnp.min(foggy, axis=1)                                           # (B, H, W)
    dcp = jnp.pad(dc, ((0, 0), (pad, pad), (pad, pad)), constant_values=1.0)
    er = None
    for dy in range(sz):
        for dx in range(sz):
            win = dcp[:, dy:dy + H, dx:dx + W]
            er = win if er is None else jnp.minimum(er, win)
    A = _atmospheric_light(er, foggy).reshape(B, 3, 1, 1)
    gamma = clear / jnp.maximum(jnp.sum(clear, axis=1, keepdims=True), 1e-6)
    sigma = foggy / jnp.maximum(jnp.sum(foggy, axis=1, keepdims=True), 1e-6)
    A = A / jnp.maximum(jnp.sum(A, axis=1, keepdims=True), 1e-6)
    fd = sigma - A
    cd = gamma - A
    fdn = fd / jnp.maximum(jnp.sqrt(jnp.sum(fd * fd, axis=1, keepdims=True)), 1e-12)
    cdn = cd / jnp.maximum(jnp.sqrt(jnp.sum(cd * cd, axis=1, keepdims=True)), 1e-12)
    return jnp.mean((fdn - cdn) ** 2)


if __name__ == "__main__":
    key = jax.random.PRNGKey(0)
    k1, k2 = jax.random.split(key)
    # W multiple of 128 -> lane-dense loads/stores; imsz=24576 -> numpx=24
    B, C, H, W = 2, 3, 192, 128
    sz = 5                                    # CRLoss(sz=5)
    clear = jax.random.uniform(k1, (B, C, H, W), dtype=jnp.float32)
    foggy = jax.random.uniform(k2, (B, C, H, W), dtype=jnp.float32)

    ref = jax.block_until_ready(ref_cr_loss(clear, foggy, sz))

    loss_fn = jax.jit(cr_loss, static_argnames=("sz", "strip_rows", "tile_rows"))
    # default tiling (single strip / single hazeline tile at this size)
    loss1 = jax.block_until_ready(loss_fn(clear, foggy, sz=sz))
    # forced multi-strip / multi-tile path (exercises halos, clamps, accumulator)
    loss2 = jax.block_until_ready(loss_fn(clear, foggy, sz=sz, strip_rows=64, tile_rows=64))

    for loss in (loss1, loss2):
        assert jnp.isfinite(loss), loss
        # rtol slightly relaxed vs 1e-5: kernel uses reciprocal/rsqrt + mul instead
        # of the reference's exact divisions (few-ulp level differences only).
        assert jnp.allclose(loss, ref, atol=1e-5, rtol=1e-4), (loss, ref)
    print("KERNEL_OK")
</pallas_src>

<mosaic_0001>
module attributes {stable_mosaic.version = 11 : i64} {
  func.func @_dark_erode_kernel(%arg0: i32, %arg1: i32, %arg2: memref<1x3x8x128xf32, #tpu.memory_space<vmem>>, %arg3: memref<1x3x192x128xf32, #tpu.memory_space<vmem>>, %arg4: memref<1x3x8x128xf32, #tpu.memory_space<vmem>>, %arg5: memref<1x192x128xf32, #tpu.memory_space<vmem>>) attributes {dimension_semantics = [#tpu.dimension_semantics<parallel>, #tpu.dimension_semantics<parallel>], iteration_bounds = array<i64: 2, 1>, scalar_prefetch = 0 : i64, scratch_operands = 0 : i64, tpu.core_type = #tpu.core_type<tc>, window_params = [{transform_indices = @transform_0, window_bounds = array<i64: 1, 3, 8, 128>}, {transform_indices = @transform_1, window_bounds = array<i64: 1, 3, 192, 128>}, {transform_indices = @transform_2, window_bounds = array<i64: 1, 3, 8, 128>}, {transform_indices = @transform_3, window_bounds = array<i64: 1, 192, 128>}]} {
    %c192_i32 = arith.constant 192 : i32
    %0 = arith.muli %arg1, %c192_i32 : i32
    %c0 = arith.constant 0 : index
    %c0_0 = arith.constant 0 : index
    %c0_1 = arith.constant 0 : index
    %c0_2 = arith.constant 0 : index
    %1 = vector.load %arg2[%c0, %c0_0, %c0_1, %c0_2] : memref<1x3x8x128xf32, #tpu.memory_space<vmem>>, vector<1x1x8x128xf32>
    %2 = vector.shape_cast %1 : vector<1x1x8x128xf32> to vector<8x128xf32>
    %c0_3 = arith.constant 0 : index
    %c1 = arith.constant 1 : index
    %c0_4 = arith.constant 0 : index
    %c0_5 = arith.constant 0 : index
    %3 = vector.load %arg2[%c0_3, %c1, %c0_4, %c0_5] : memref<1x3x8x128xf32, #tpu.memory_space<vmem>>, vector<1x1x8x128xf32>
    %4 = vector.shape_cast %3 : vector<1x1x8x128xf32> to vector<8x128xf32>
    %5 = arith.minimumf %2, %4 : vector<8x128xf32>
    %c0_6 = arith.constant 0 : index
    %c2 = arith.constant 2 : index
    %c0_7 = arith.constant 0 : index
    %c0_8 = arith.constant 0 : index
    %6 = vector.load %arg2[%c0_6, %c2, %c0_7, %c0_8] : memref<1x3x8x128xf32, #tpu.memory_space<vmem>>, vector<1x1x8x128xf32>
    %7 = vector.shape_cast %6 : vector<1x1x8x128xf32> to vector<8x128xf32>
    %8 = arith.minimumf %5, %7 : vector<8x128xf32>
    %c0_9 = arith.constant 0 : index
    %c0_10 = arith.constant 0 : index
    %c0_11 = arith.constant 0 : index
    %c0_12 = arith.constant 0 : index
    %9 = vector.load %arg3[%c0_9, %c0_10, %c0_11, %c0_12] : memref<1x3x192x128xf32, #tpu.memory_space<vmem>>, vector<1x1x192x128xf32>
    %10 = vector.shape_cast %9 : vector<1x1x192x128xf32> to vector<192x128xf32>
    %c0_13 = arith.constant 0 : index
    %c1_14 = arith.constant 1 : index
    %c0_15 = arith.constant 0 : index
    %c0_16 = arith.constant 0 : index
    %11 = vector.load %arg3[%c0_13, %c1_14, %c0_15, %c0_16] : memref<1x3x192x128xf32, #tpu.memory_space<vmem>>, vector<1x1x192x128xf32>
    %12 = vector.shape_cast %11 : vector<1x1x192x128xf32> to vector<192x128xf32>
    %13 = arith.minimumf %10, %12 : vector<192x128xf32>
    %c0_17 = arith.constant 0 : index
    %c2_18 = arith.constant 2 : index
    %c0_19 = arith.constant 0 : index
    %c0_20 = arith.constant 0 : index
    %14 = vector.load %arg3[%c0_17, %c2_18, %c0_19, %c0_20] : memref<1x3x192x128xf32, #tpu.memory_space<vmem>>, vector<1x1x192x128xf32>
    %15 = vector.shape_cast %14 : vector<1x1x192x128xf32> to vector<192x128xf32>
    %16 = arith.minimumf %13, %15 : vector<192x128xf32>
    %c0_21 = arith.constant 0 : index
    %c0_22 = arith.constant 0 : index
    %c0_23 = arith.constant 0 : index
    %c0_24 = arith.constant 0 : index
    %17 = vector.load %arg4[%c0_21, %c0_22, %c0_23, %c0_24] : memref<1x3x8x128xf32, #tpu.memory_space<vmem>>, vector<1x1x8x128xf32>
    %18 = vector.shape_cast %17 : vector<1x1x8x128xf32> to vector<8x128xf32>
    %c0_25 = arith.constant 0 : index
    %c1_26 = arith.constant 1 : index
    %c0_27 = arith.constant 0 : index
    %c0_28 = arith.constant 0 : index
    %19 = vector.load %arg4[%c0_25, %c1_26, %c0_27, %c0_28] : memref<1x3x8x128xf32, #tpu.memory_space<vmem>>, vector<1x1x8x128xf32>
    %20 = vector.shape_cast %19 : vector<1x1x8x128xf32> to vector<8x128xf32>
    %21 = arith.minimumf %18, %20 : vector<8x128xf32>
    %c0_29 = arith.constant 0 : index
    %c2_30 = arith.constant 2 : index
    %c0_31 = arith.constant 0 : index
    %c0_32 = arith.constant 0 : index
    %22 = vector.load %arg4[%c0_29, %c2_30, %c0_31, %c0_32] : memref<1x3x8x128xf32, #tpu.memory_space<vmem>>, vector<1x1x8x128xf32>
    %23 = vector.shape_cast %22 : vector<1x1x8x128xf32> to vector<8x128xf32>
    %24 = arith.minimumf %21, %23 : vector<8x128xf32>
    %25 = tpu.iota {dimensions = array<i32: 0>} : vector<8x128xi32>
    %c8_i32 = arith.constant 8 : i32
    %26 = arith.subi %0, %c8_i32 : i32
    %27 = vector.broadcast %26 : i32 to vector<8x128xi32>
    %28 = arith.addi %25, %27 : vector<8x128xi32>
    %29 = tpu.iota {dimensions = array<i32: 0>} : vector<192x128xi32>
    %30 = vector.broadcast %0 : i32 to vector<192x128xi32>
    %31 = arith.addi %29, %30 : vector<192x128xi32>
    %32 = tpu.iota {dimensions = array<i32: 0>} : vector<8x128xi32>
    %c192_i32_33 = arith.constant 192 : i32
    %33 = arith.addi %0, %c192_i32_33 : i32
    %34 = vector.broadcast %33 : i32 to vector<8x128xi32>
    %35 = arith.addi %32, %34 : vector<8x128xi32>
    %c0_i32 = arith.constant 0 : i32
    %36 = vector.broadcast %c0_i32 : i32 to vector<8x128xi32>
    %37 = arith.cmpi sge, %28, %36 : vector<8x128xi32>
    %cst = arith.constant 1.000000e+00 : f32
    %38 = vector.broadcast %cst : f32 to vector<8x128xf32>
    %39 = arith.select %37, %8, %38 : vector<8x128xi1>, vector<8x128xf32>
    %c192_i32_34 = arith.constant 192 : i32
    %40 = vector.broadcast %c192_i32_34 : i32 to vector<192x128xi32>
    %41 = arith.cmpi slt, %31, %40 : vector<192x128xi32>
    %cst_35 = arith.constant 1.000000e+00 : f32
    %42 = vector.broadcast %cst_35 : f32 to vector<192x128xf32>
    %43 = arith.select %41, %16, %42 : vector<192x128xi1>, vector<192x128xf32>
    %c192_i32_36 = arith.constant 192 : i32
    %44 = vector.broadcast %c192_i32_36 : i32 to vector<8x128xi32>
    %45 = arith.cmpi slt, %35, %44 : vector<8x128xi32>
    %cst_37 = arith.constant 1.000000e+00 : f32
    %46 = vector.broadcast %cst_37 : f32 to vector<8x128xf32>
    %47 = arith.select %45, %24, %46 : vector<8x128xi1>, vector<8x128xf32>
    %48 = tpu.concatenate %39, %43, %47 in 0 : vector<8x128xf32>, vector<192x128xf32>, vector<8x128xf32> -> vector<208x128xf32>
    %49 = vector.extract_strided_slice %48 {offsets = [1, 0], sizes = [207, 128], strides = [1, 1]} : vector<208x128xf32> to vector<207x128xf32>
    %50 = vector.extract_strided_slice %48 {offsets = [0, 0], sizes = [1, 128], strides = [1, 1]} : vector<208x128xf32> to vector<1x128xf32>
    %51 = tpu.concatenate %49, %50 in 0 : vector<207x128xf32>, vector<1x128xf32> -> vector<208x128xf32>
    %52 = vector.extract_strided_slice %48 {offsets = [207, 0], sizes = [1, 128], strides = [1, 1]} : vector<208x128xf32> to vector<1x128xf32>
    %53 = vector.extract_strided_slice %48 {offsets = [0, 0], sizes = [207, 128], strides = [1, 1]} : vector<208x128xf32> to vector<207x128xf32>
    %54 = tpu.concatenate %52, %53 in 0 : vector<1x128xf32>, vector<207x128xf32> -> vector<208x128xf32>
    %55 = arith.minimumf %51, %54 : vector<208x128xf32>
    %56 = arith.minimumf %48, %55 : vector<208x128xf32>
    %57 = vector.extract_strided_slice %48 {offsets = [2, 0], sizes = [206, 128], strides = [1, 1]} : vector<208x128xf32> to vector<206x128xf32>
    %58 = vector.extract_strided_slice %48 {offsets = [0, 0], sizes = [2, 128], strides = [1, 1]} : vector<208x128xf32> to vector<2x128xf32>
    %59 = tpu.concatenate %57, %58 in 0 : vector<206x128xf32>, vector<2x128xf32> -> vector<208x128xf32>
    %60 = vector.extract_strided_slice %48 {offsets = [206, 0], sizes = [2, 128], strides = [1, 1]} : vector<208x128xf32> to vector<2x128xf32>
    %61 = vector.extract_strided_slice %48 {offsets = [0, 0], sizes = [206, 128], strides = [1, 1]} : vector<208x128xf32> to vector<206x128xf32>
    %62 = tpu.concatenate %60, %61 in 0 : vector<2x128xf32>, vector<206x128xf32> -> vector<208x128xf32>
    %63 = arith.minimumf %59, %62 : vector<208x128xf32>
    %64 = arith.minimumf %56, %63 : vector<208x128xf32>
    %65 = vector.extract_strided_slice %64 {offsets = [8, 0], sizes = [192, 128], strides = [1, 1]} : vector<208x128xf32> to vector<192x128xf32>
    %66 = tpu.iota {dimensions = array<i32: 1>} : vector<192x128xi32>
    %c127_i32 = arith.constant 127 : i32
    %67 = vector.broadcast %c127_i32 : i32 to vector<192x128xi32>
    %68 = arith.cmpi slt, %66, %67 : vector<192x128xi32>
    %69 = vector.extract_strided_slice %65 {offsets = [0, 1], sizes = [192, 127], strides = [1, 1]} : vector<192x128xf32> to vector<192x127xf32>
    %70 = vector.extract_strided_slice %65 {offsets = [0, 0], sizes = [192, 1], strides = [1, 1]} : vector<192x128xf32> to vector<192x1xf32>
    %71 = tpu.concatenate %69, %70 in 1 : vector<192x127xf32>, vector<192x1xf32> -> vector<192x128xf32>
    %cst_38 = arith.constant 1.000000e+00 : f32
    %72 = vector.broadcast %cst_38 : f32 to vector<192x128xf32>
    %73 = arith.select %68, %71, %72 : vector<192x128xi1>, vector<192x128xf32>
    %c1_i32 = arith.constant 1 : i32
    %74 = vector.broadcast %c1_i32 : i32 to vector<192x128xi32>
    %75 = arith.cmpi sge, %66, %74 : vector<192x128xi32>
    %76 = vector.extract_strided_slice %65 {offsets = [0, 127], sizes = [192, 1], strides = [1, 1]} : vector<192x128xf32> to vector<192x1xf32>
    %77 = vector.extract_strided_slice %65 {offsets = [0, 0], sizes = [192, 127], strides = [1, 1]} : vector<192x128xf32> to vector<192x127xf32>
    %78 = tpu.concatenate %76, %77 in 1 : vector<192x1xf32>, vector<192x127xf32> -> vector<192x128xf32>
    %cst_39 = arith.constant 1.000000e+00 : f32
    %79 = vector.broadcast %cst_39 : f32 to vector<192x128xf32>
    %80 = arith.select %75, %78, %79 : vector<192x128xi1>, vector<192x128xf32>
    %81 = arith.minimumf %73, %80 : vector<192x128xf32>
    %82 = arith.minimumf %65, %81 : vector<192x128xf32>
    %c126_i32 = arith.constant 126 : i32
    %83 = vector.broadcast %c126_i32 : i32 to vector<192x128xi32>
    %84 = arith.cmpi slt, %66, %83 : vector<192x128xi32>
    %85 = vector.extract_strided_slice %65 {offsets = [0, 2], sizes = [192, 126], strides = [1, 1]} : vector<192x128xf32> to vector<192x126xf32>
    %86 = vector.extract_strided_slice %65 {offsets = [0, 0], sizes = [192, 2], strides = [1, 1]} : vector<192x128xf32> to vector<192x2xf32>
    %87 = tpu.concatenate %85, %86 in 1 : vector<192x126xf32>, vector<192x2xf32> -> vector<192x128xf32>
    %cst_40 = arith.constant 1.000000e+00 : f32
    %88 = vector.broadcast %cst_40 : f32 to vector<192x128xf32>
    %89 = arith.select %84, %87, %88 : vector<192x128xi1>, vector<192x128xf32>
    %c2_i32 = arith.constant 2 : i32
    %90 = vector.broadcast %c2_i32 : i32 to vector<192x128xi32>
    %91 = arith.cmpi sge, %66, %90 : vector<192x128xi32>
    %92 = vector.extract_strided_slice %65 {offsets = [0, 126], sizes = [192, 2], strides = [1, 1]} : vector<192x128xf32> to vector<192x2xf32>
    %93 = vector.extract_strided_slice %65 {offsets = [0, 0], sizes = [192, 126], strides = [1, 1]} : vector<192x128xf32> to vector<192x126xf32>
    %94 = tpu.concatenate %92, %93 in 1 : vector<192x2xf32>, vector<192x126xf32> -> vector<192x128xf32>
    %cst_41 = arith.constant 1.000000e+00 : f32
    %95 = vector.broadcast %cst_41 : f32 to vector<192x128xf32>
    %96 = arith.select %91, %94, %95 : vector<192x128xi1>, vector<192x128xf32>
    %97 = arith.minimumf %89, %96 : vector<192x128xf32>
    %98 = arith.minimumf %82, %97 : vector<192x128xf32>
    %c0_42 = arith.constant 0 : index
    %c0_43 = arith.constant 0 : index
    %c0_44 = arith.constant 0 : index
    %99 = vector.load %arg5[%c0_42, %c0_43, %c0_44] : memref<1x192x128xf32, #tpu.memory_space<vmem>>, vector<1x192x128xf32>
    %100 = vector.shape_cast %99 : vector<1x192x128xf32> to vector<192x128xf32>
    %101 = vector.shape_cast %98 : vector<192x128xf32> to vector<1x192x128xf32>
    tpu.vector_store %arg5[%c0_42, %c0_43, %c0_44], %101 {strides = array<i32>} : memref<1x192x128xf32, #tpu.memory_space<vmem>>, vector<1x192x128xf32>,
    return
  }
  func.func @transform_0(%arg0: i32, %arg1: i32) -> (i32, i32, i32, i32) {
    %c24_i32 = arith.constant 24 : i32
    %0 = arith.muli %arg1, %c24_i32 : i32
    %c1_i32 = arith.constant 1 : i32
    %1 = arith.subi %0, %c1_i32 : i32
    %c0_i32 = arith.constant 0 : i32
    %2 = arith.maxsi %1, %c0_i32 : i32
    %c0_i32_0 = arith.constant 0 : i32
    %c0_i32_1 = arith.constant 0 : i32
    %c0_i32_2 = arith.constant 0 : i32
    return %arg0, %c0_i32_0, %2, %c0_i32_1 : i32, i32, i32, i32
  }
  func.func @transform_1(%arg0: i32, %arg1: i32) -> (i32, i32, i32, i32) {
    %c0_i32 = arith.constant 0 : i32
    %c0_i32_0 = arith.constant 0 : i32
    %c0_i32_1 = arith.constant 0 : i32
    return %arg0, %c0_i32, %arg1, %c0_i32_0 : i32, i32, i32, i32
  }
  func.func @transform_2(%arg0: i32, %arg1: i32) -> (i32, i32, i32, i32) {
    %c1_i32 = arith.constant 1 : i32
    %0 = arith.addi %arg1, %c1_i32 : i32
    %c24_i32 = arith.constant 24 : i32
    %1 = arith.muli %0, %c24_i32 : i32
    %c23_i32 = arith.constant 23 : i32
    %2 = arith.minsi %1, %c23_i32 : i32
    %c0_i32 = arith.constant 0 : i32
    %c0_i32_0 = arith.constant 0 : i32
    %c0_i32_1 = arith.constant 0 : i32
    return %arg0, %c0_i32, %2, %c0_i32_0 : i32, i32, i32, i32
  }
  func.func @transform_3(%arg0: i32, %arg1: i32) -> (i32, i32, i32) {
    %c0_i32 = arith.constant 0 : i32
    %c0_i32_0 = arith.constant 0 : i32
    return %arg0, %arg1, %c0_i32 : i32, i32, i32
  }
}

module attributes {stable_mosaic.version = 11 : i64} {
  func.func @_hazeline_kernel(%arg0: i32, %arg1: i32, %arg2: memref<2x3xf32, #tpu.memory_space<smem>>, %arg3: memref<1x3x192x128xf32, #tpu.memory_space<vmem>>, %arg4: memref<1x3x192x128xf32, #tpu.memory_space<vmem>>, %arg5: memref<1x8x128xf32, #tpu.memory_space<vmem>>, %arg6: memref<8x128xf32, #tpu.memory_space<vmem>>) attributes {dimension_semantics = [#tpu.dimension_semantics<parallel>, #tpu.dimension_semantics<arbitrary>], iteration_bounds = array<i64: 2, 1>, scalar_prefetch = 0 : i64, scratch_operands = 1 : i64, tpu.core_type = #tpu.core_type<tc>, window_params = [{transform_indices = @transform_0, window_bounds = array<i64: 2, 3>}, {transform_indices = @transform_1, window_bounds = array<i64: 1, 3, 192, 128>}, {transform_indices = @transform_2, window_bounds = array<i64: 1, 3, 192, 128>}, {transform_indices = @transform_3, window_bounds = array<i64: 1, 8, 128>}]} {
    %c0_i32 = arith.constant 0 : i32
    %0 = arith.cmpi eq, %arg1, %c0_i32 : i32
    %1 = arith.extui %0 : i1 to i32
    %c0_i32_0 = arith.constant 0 : i32
    %2 = arith.cmpi ne, %1, %c0_i32_0 : i32
    scf.if %2 {
      %cst_35 = arith.constant 0.000000e+00 : f32
      %87 = vector.broadcast %cst_35 : f32 to vector<8x128xf32>
      %c0_36 = arith.constant 0 : index
      %c0_37 = arith.constant 0 : index
      %88 = vector.load %arg6[%c0_36, %c0_37] : memref<8x128xf32, #tpu.memory_space<vmem>>, vector<8x128xf32>
      tpu.vector_store %arg6[%c0_36, %c0_37], %87 {strides = array<i32>} : memref<8x128xf32, #tpu.memory_space<vmem>>, vector<8x128xf32>,
    } else {
    }
    %c0 = arith.constant 0 : index
    %c0_1 = arith.constant 0 : index
    %c0_2 = arith.constant 0 : index
    %c0_3 = arith.constant 0 : index
    %3 = vector.load %arg3[%c0, %c0_1, %c0_2, %c0_3] : memref<1x3x192x128xf32, #tpu.memory_space<vmem>>, vector<1x1x192x128xf32>
    %4 = vector.shape_cast %3 : vector<1x1x192x128xf32> to vector<192x128xf32>
    %c0_4 = arith.constant 0 : index
    %c1 = arith.constant 1 : index
    %c0_5 = arith.constant 0 : index
    %c0_6 = arith.constant 0 : index
    %5 = vector.load %arg3[%c0_4, %c1, %c0_5, %c0_6] : memref<1x3x192x128xf32, #tpu.memory_space<vmem>>, vector<1x1x192x128xf32>
    %6 = vector.shape_cast %5 : vector<1x1x192x128xf32> to vector<192x128xf32>
    %c0_7 = arith.constant 0 : index
    %c2 = arith.constant 2 : index
    %c0_8 = arith.constant 0 : index
    %c0_9 = arith.constant 0 : index
    %7 = vector.load %arg3[%c0_7, %c2, %c0_8, %c0_9] : memref<1x3x192x128xf32, #tpu.memory_space<vmem>>, vector<1x1x192x128xf32>
    %8 = vector.shape_cast %7 : vector<1x1x192x128xf32> to vector<192x128xf32>
    %c0_10 = arith.constant 0 : index
    %c0_11 = arith.constant 0 : index
    %c0_12 = arith.constant 0 : index
    %c0_13 = arith.constant 0 : index
    %9 = vector.load %arg4[%c0_10, %c0_11, %c0_12, %c0_13] : memref<1x3x192x128xf32, #tpu.memory_space<vmem>>, vector<1x1x192x128xf32>
    %10 = vector.shape_cast %9 : vector<1x1x192x128xf32> to vector<192x128xf32>
    %c0_14 = arith.constant 0 : index
    %c1_15 = arith.constant 1 : index
    %c0_16 = arith.constant 0 : index
    %c0_17 = arith.constant 0 : index
    %11 = vector.load %arg4[%c0_14, %c1_15, %c0_16, %c0_17] : memref<1x3x192x128xf32, #tpu.memory_space<vmem>>, vector<1x1x192x128xf32>
    %12 = vector.shape_cast %11 : vector<1x1x192x128xf32> to vector<192x128xf32>
    %c0_18 = arith.constant 0 : index
    %c2_19 = arith.constant 2 : index
    %c0_20 = arith.constant 0 : index
    %c0_21 = arith.constant 0 : index
    %13 = vector.load %arg4[%c0_18, %c2_19, %c0_20, %c0_21] : memref<1x3x192x128xf32, #tpu.memory_space<vmem>>, vector<1x1x192x128xf32>
    %14 = vector.shape_cast %13 : vector<1x1x192x128xf32> to vector<192x128xf32>
    %15 = arith.addf %4, %6 : vector<192x128xf32>
    %16 = arith.addf %15, %8 : vector<192x128xf32>
    %cst = arith.constant 9.99999997E-7 : f32
    %17 = vector.broadcast %cst : f32 to vector<192x128xf32>
    %18 = arith.maximumf %16, %17 : vector<192x128xf32>
    %19 = tpu.reciprocal %18 : vector<192x128xf32> -> vector<192x128xf32>
    %20 = arith.addf %10, %12 : vector<192x128xf32>
    %21 = arith.addf %20, %14 : vector<192x128xf32>
    %cst_22 = arith.constant 9.99999997E-7 : f32
    %22 = vector.broadcast %cst_22 : f32 to vector<192x128xf32>
    %23 = arith.maximumf %21, %22 : vector<192x128xf32>
    %24 = tpu.reciprocal %23 : vector<192x128xf32> -> vector<192x128xf32>
    %25 = arith.index_cast %arg0 : i32 to index
    %c0_23 = arith.constant 0 : index
    %26 = memref.load %arg2[%25, %c0_23] : memref<2x3xf32, #tpu.memory_space<smem>>
    %27 = arith.index_cast %arg0 : i32 to index
    %c1_24 = arith.constant 1 : index
    %28 = memref.load %arg2[%27, %c1_24] : memref<2x3xf32, #tpu.memory_space<smem>>
    %29 = arith.index_cast %arg0 : i32 to index
    %c2_25 = arith.constant 2 : index
    %30 = memref.load %arg2[%29, %c2_25] : memref<2x3xf32, #tpu.memory_space<smem>>
    %31 = arith.mulf %4, %19 : vector<192x128xf32>
    %32 = vector.broadcast %26 : f32 to vector<192x128xf32>
    %33 = arith.subf %31, %32 : vector<192x128xf32>
    %34 = arith.mulf %6, %19 : vector<192x128xf32>
    %35 = vector.broadcast %28 : f32 to vector<192x128xf32>
    %36 = arith.subf %34, %35 : vector<192x128xf32>
    %37 = arith.mulf %8, %19 : vector<192x128xf32>
    %38 = vector.broadcast %30 : f32 to vector<192x128xf32>
    %39 = arith.subf %37, %38 : vector<192x128xf32>
    %40 = arith.mulf %10, %24 : vector<192x128xf32>
    %41 = vector.broadcast %26 : f32 to vector<192x128xf32>
    %42 = arith.subf %40, %41 : vector<192x128xf32>
    %43 = arith.mulf %12, %24 : vector<192x128xf32>
    %44 = vector.broadcast %28 : f32 to vector<192x128xf32>
    %45 = arith.subf %43, %44 : vector<192x128xf32>
    %46 = arith.mulf %14, %24 : vector<192x128xf32>
    %47 = vector.broadcast %30 : f32 to vector<192x128xf32>
    %48 = arith.subf %46, %47 : vector<192x128xf32>
    %49 = arith.mulf %33, %33 : vector<192x128xf32>
    %50 = arith.mulf %36, %36 : vector<192x128xf32>
    %51 = arith.addf %49, %50 : vector<192x128xf32>
    %52 = arith.mulf %39, %39 : vector<192x128xf32>
    %53 = arith.addf %51, %52 : vector<192x128xf32>
    %54 = math.rsqrt %53 : vector<192x128xf32>
    %cst_26 = arith.constant 9.99999995E+11 : f32
    %55 = vector.broadcast %cst_26 : f32 to vector<192x128xf32>
    %56 = arith.minimumf %54, %55 : vector<192x128xf32>
    %57 = arith.mulf %42, %42 : vector<192x128xf32>
    %58 = arith.mulf %45, %45 : vector<192x128xf32>
    %59 = arith.addf %57, %58 : vector<192x128xf32>
    %60 = arith.mulf %48, %48 : vector<192x128xf32>
    %61 = arith.addf %59, %60 : vector<192x128xf32>
    %62 = math.rsqrt %61 : vector<192x128xf32>
    %cst_27 = arith.constant 9.99999995E+11 : f32
    %63 = vector.broadcast %cst_27 : f32 to vector<192x128xf32>
    %64 = arith.minimumf %62, %63 : vector<192x128xf32>
    %65 = arith.mulf %42, %64 : vector<192x128xf32>
    %66 = arith.mulf %33, %56 : vector<192x128xf32>
    %67 = arith.subf %65, %66 : vector<192x128xf32>
    %68 = arith.mulf %45, %64 : vector<192x128xf32>
    %69 = arith.mulf %36, %56 : vector<192x128xf32>
    %70 = arith.subf %68, %69 : vector<192x128xf32>
    %71 = arith.mulf %48, %64 : vector<192x128xf32>
    %72 = arith.mulf %39, %56 : vector<192x128xf32>
    %73 = arith.subf %71, %72 : vector<192x128xf32>
    %74 = arith.mulf %67, %67 : vector<192x128xf32>
    %75 = arith.mulf %70, %70 : vector<192x128xf32>
    %76 = arith.addf %74, %75 : vector<192x128xf32>
    %77 = arith.mulf %73, %73 : vector<192x128xf32>
    %78 = arith.addf %76, %77 : vector<192x128xf32>
    %c0_28 = arith.constant 0 : index
    %c0_29 = arith.constant 0 : index
    %79 = vector.load %arg6[%c0_28, %c0_29] : memref<8x128xf32, #tpu.memory_space<vmem>>, vector<8x128xf32>
    %80 = vector.shape_cast %78 : vector<192x128xf32> to vector<24x8x128xf32>
    %cst_30 = arith.constant dense<0.000000e+00> : vector<8x128xf32>
    %81 = vector.multi_reduction <add>, %80, %cst_30 [0] : vector<24x8x128xf32> to vector<8x128xf32>
    %82 = arith.addf %79, %81 : vector<8x128xf32>
    %c0_31 = arith.constant 0 : index
    %c0_32 = arith.constant 0 : index
    %83 = vector.load %arg6[%c0_31, %c0_32] : memref<8x128xf32, #tpu.memory_space<vmem>>, vector<8x128xf32>
    tpu.vector_store %arg6[%c0_31, %c0_32], %82 {strides = array<i32>} : memref<8x128xf32, #tpu.memory_space<vmem>>, vector<8x128xf32>,
    %c0_i32_33 = arith.constant 0 : i32
    %84 = arith.cmpi eq, %arg1, %c0_i32_33 : i32
    %85 = arith.extui %84 : i1 to i32
    %c0_i32_34 = arith.constant 0 : i32
    %86 = arith.cmpi ne, %85, %c0_i32_34 : i32
    scf.if %86 {
      %c0_35 = arith.constant 0 : index
      %c0_36 = arith.constant 0 : index
      %87 = vector.load %arg6[%c0_35, %c0_36] : memref<8x128xf32, #tpu.memory_space<vmem>>, vector<8x128xf32>
      %c0_37 = arith.constant 0 : index
      %c0_38 = arith.constant 0 : index
      %c0_39 = arith.constant 0 : index
      %88 = vector.load %arg5[%c0_37, %c0_38, %c0_39] : memref<1x8x128xf32, #tpu.memory_space<vmem>>, vector<1x8x128xf32>
      %89 = vector.shape_cast %88 : vector<1x8x128xf32> to vector<8x128xf32>
      %90 = vector.shape_cast %87 : vector<8x128xf32> to vector<1x8x128xf32>
      tpu.vector_store %arg5[%c0_37, %c0_38, %c0_39], %90 {strides = array<i32>} : memref<1x8x128xf32, #tpu.memory_space<vmem>>, vector<1x8x128xf32>,
    } else {
    }
    return
  }
  func.func @transform_0(%arg0: i32, %arg1: i32) -> (i32, i32) {
    %c0_i32 = arith.constant 0 : i32
    %c0_i32_0 = arith.constant 0 : i32
    %c0_i32_1 = arith.constant 0 : i32
    return %c0_i32, %c0_i32_0 : i32, i32
  }
  func.func @transform_1(%arg0: i32, %arg1: i32) -> (i32, i32, i32, i32) {
    %c0_i32 = arith.constant 0 : i32
    %c0_i32_0 = arith.constant 0 : i32
    %c0_i32_1 = arith.constant 0 : i32
    return %arg0, %c0_i32, %arg1, %c0_i32_0 : i32, i32, i32, i32
  }
  func.func @transform_2(%arg0: i32, %arg1: i32) -> (i32, i32, i32, i32) {
    %c0_i32 = arith.constant 0 : i32
    %c0_i32_0 = arith.constant 0 : i32
    %c0_i32_1 = arith.constant 0 : i32
    return %arg0, %c0_i32, %arg1, %c0_i32_0 : i32, i32, i32, i32
  }
  func.func @transform_3(%arg0: i32, %arg1: i32) -> (i32, i32, i32) {
    %c0_i32 = arith.constant 0 : i32
    %c0_i32_0 = arith.constant 0 : i32
    %c0_i32_1 = arith.constant 0 : i32
    return %arg0, %c0_i32, %c0_i32_0 : i32, i32, i32
  }
}

</mosaic_0001>

<bundles_post_ra>
// kernel: cr_loss.2
= control target key start
LH: loop header
LB: loop body
LE: loop exit
PB: predicated region body
PF: predicated region fallthrough
CT: control target
= control target key end

     0   :  { %s3323_s0 = inlined_call_operand.hbm [shape: f32[2,3,192,128], index: 0, kind: input, shape index: {}, may-alias: {0,1,2}]   ;;  %s3324_s1 = inlined_call_operand.hbm [shape: f32[2,3,192,128], index: 1, kind: input, shape index: {}, may-alias: {0,1,2}]   ;;  %s3325_s2 = inlined_call_operand.hbm [shape: f32[2,3,192,128], index: 2, kind: input, shape index: {}, may-alias: {0,1,2}]   ;;  %s3326_s3 = inlined_call_operand.vmem [shape: f32[2,192,128], index: 3, kind: output, shape index: {}]  }
   0x1   :  { %3363 = sst [smem:[#allocation53_spill]] %s3323_s0 }
   0x2   :  { %8 = vsyncpa [#allocation3], 0 }
   0x3   :  { %10 = vsyncpa [#allocation3 + $0x1], 0 }
   0x4   :  { %11 = vsyncpa [#allocation5], 0 }
   0x5   :  { %13 = vsyncpa [#allocation5 + $0x1], 0  ;;  %s1997_s12 = smov 0   ;;  %s1999_s13 = smov 0  }
   0x6   :  { %s2001_s14 = smov 0   ;;  %s2003_s15 = smov 0  }
   0x7   :  { %s2005_s16 = smov 0   ;;  %s2007_s17 = smov 0  }
   0x8 LB: > { %s3328_s18 = sadd.s32 4294967295, %s1964_s17   ;;  %s31_s19 = sadd.s32 1, %s1960_s16  ;;  %s1964_s17 = sphi %s2007_s17, %s19_s17   ;;  %s1960_s16 = sphi %s2005_s16, %s3490_s16   ;;  %s1956_s15 = sphi %s2003_s15, %s3489_s15   ;;  %s1952_s14 = sphi %s2001_s14, %s3488_s14   ;;  %s1948_s13 = sphi %s1999_s13, %s3487_s13   ;;  %s1944_s12 = sphi %s1997_s12, %s3486_s12  }
   0x9   : > { %p33_p0 = scmp.ge.s32.totalorder %s31_s19, 2  ;;  %s48_s20 = sadd.s32 1, %s1952_s14 }
   0xa   : > { %p55_p1 = scmp.ne.s32.totalorder %s1952_s14, %s1948_s13  ;;  %p56_p2 = scmp.eq.s32.totalorder %s1964_s17, 0 }
   0xb   : > { %s3492_s19 = smov (%p33_p0, %s31_s19), 0  ;;  %p61_p4 = scmp.ne.s32.totalorder %s1948_s13, %s1944_s12 }
   0xc   : > { %p57_p3 = por %p56_p2, %p55_p1  ;;  %s43_s21 = ssub.s32 %s1960_s16, %s3492_s19 }
   0xd   : > { %p62_p5 = scmp.eq.s32.totalorder %s3328_s18, 0  ;;  %p46_p6 = scmp.eq.s32.totalorder %s43_s21, 0 }
   0xe   : > { %p1762_p8 = scmp.lt.s32.totalorder %s1964_s17, 2  ;;  %s2047_s24 = sand.u32 1, %s1952_s14  }
   0xf   : > { %p2038_p7 = por %p62_p5, %p61_p4  ;;  %s2050_s25 = smul.u32 9216, %s1960_s16 }
  0x10   : > { %s2044_s23 = scalar_select %p46_p6, %s1952_s14, %s48_s20  }
  0x11   : > { %s3364_s22 = scalar_select %p2038_p7, 1, 0 }
  0x12   : > { %s1738_s26 = smul.u32 24, %s2047_s24  ;;  %p2053_p9 = pnand %p1762_p8, %p57_p3 }
  0x13   : > { %s203_s28 = sand.u32 1, %s1964_s17   ;;  %s1740_s29 = smul.u32 576, %s2047_s24 }
  0x14   : > { %s2063_s5 = scalar_lea.hbm %s3324_s1, %s2050_s25  ;;  %s2069_s8 = scalar_lea.sflag [#allocation5], %s203_s28 }
  0x15   : > { %s207_s6 = scalar_lea.vmem [#allocation4], %s1740_s29  ;;  %s1820_s9 = scalar_lea.hbm %s2063_s5, 9216 }
  0x16   : > { %s216_s7 = sshll.u32 %s207_s6, 4  ;;  %p1821_p12 = scmp.ne.s32.totalorder %s2063_s5, %s1820_s9  ;;  %s2067_s7 = int_to_ptr.vmem [resolvable:$true] %s216_s7 }
  0x17   : > { %p2075_p13 = pneg %p2053_p9  ;;  %s1825_s20 = scalar_lea.hbm %s3324_s1, 18432 }
  0x18   : > { %p1826_p2 = scmp.lt.u32.totalorder %s2063_s5, %s3324_s1  ;;  %p1827_p3 = scmp.lt.u32.totalorder %s1825_s20, %s1820_s9 }
  0x19   : > { %p1823_p0 = pnand %p2075_p13, %p1821_p12  ;;  %p1829_p5 = scmp.lt.u32.totalorder %s1820_s9, %s2063_s5 }
  0x1a   : > { %p1828_p4 = por %p1827_p3, %p1826_p2 }
  0x1b   : > { %p1824_p1 = pneg %p1823_p0 }
  0x1c   : > { %p1830_p6 = por %p1829_p5, %p1828_p4 }
  0x1e   : > { %p1831_p8 = pnand %p1830_p6, %p1824_p1 }
  0x20   : > { %1834 = shalt.err (!%p1831_p8)
}
  0x21   : > { %s1835_s28 = scalar_lea.vmem %s2067_s7, 9216  ;;  %s1966_s30 = smov [#allocation4]  }
  0x22   : > { %p1836_p12 = scmp.ne.s32.totalorder %s2067_s7, %s1835_s28  ;;  %s1840_s4 = sshll.u32 %s1966_s30, 4  ;;  %s1841_s4 = int_to_ptr.vmem [resolvable:$false] %s1840_s4 }
  0x23   : > { %s1842_s6 = scalar_lea.vmem %s1841_s4, 18432  ;;  %p1843_p11 = scmp.lt.s32.totalorder %s2067_s7, %s1841_s4 }
  0x24   : > { %p1838_p0 = pnand %p1836_p12, %p2075_p13  ;;  %p1844_p7 = scmp.lt.s32.totalorder %s1842_s6, %s1835_s28 }
  0x26   : > { %p1839_p10 = pneg %p1838_p0  ;;  %p1845_p2 = por %p1844_p7, %p1843_p11 }
  0x28   : > { %p1846_p3 = pnand %p1845_p2, %p1839_p10 }
  0x2a   : > { %1849 = shalt.err (!%p1846_p3)
}
  0x2b   : > { %s1967_s9 = smov 128   ;;  %s1968_s11 = smov 8  }
  0x2c   : > { %1758 = dma.hbm_to_vmem [thread:$0]  (!%p2053_p9), %s2063_s5, 9216, %s2067_s7, %s2069_s8, %s1967_s9, %s1967_s9, %s1968_s11  }
  0x2d   : > { %p3367_p7 = scmp.lt.s32.totalorder %s1964_s17, 3  ;;  %p3368_p10 = scmp.ge.s32.totalorder %s1964_s17, 1 }
  0x2e   : > { %s3370_s0 = sld [smem:[#allocation53_spill]]  ;;  %s181_s28 = scalar_lea.vmem [#allocation2], %s1738_s26 }
  0x2f   : > { %p2106_p11 = pnand %p3368_p10, %p3367_p7  ;;  %s193_s30 = sshll.u32 %s181_s28, 4  ;;  %s2118_s30 = int_to_ptr.vmem [resolvable:$true] %s193_s30 }
  0x30   : > { %s178_s5 = scalar_lea.sflag [#allocation3], %s2047_s24 }
  0x31   : > { %s3369_s12 = scalar_select %p2106_p11, 1, 0 }
  0x34   : > { %s2114_s29 = scalar_lea.hbm %s3370_s0, %s2050_s25  ;;  %s1855_s20 = scalar_lea.hbm %s3370_s0, 18432 }
  0x35   : > { %s1850_s7 = scalar_lea.hbm %s2114_s29, 384  ;;  %p1856_p6 = scmp.lt.u32.totalorder %s2114_s29, %s3370_s0 }
  0x36   : > { %p1851_p1 = scmp.ne.s32.totalorder %s2114_s29, %s1850_s7  ;;  %p1857_p8 = scmp.lt.u32.totalorder %s1855_s20, %s1850_s7 }
  0x37   : > { %p1859_p0 = scmp.lt.u32.totalorder %s1850_s7, %s2114_s29 }
  0x38   : > { %p1853_p4 = pnand %p1851_p1, %p2075_p13  ;;  %p1858_p12 = por %p1857_p8, %p1856_p6 }
  0x3a   : > { %p1854_p5 = pneg %p1853_p4  ;;  %p1860_p2 = por %p1859_p0, %p1858_p12 }
  0x3c   : > { %p1861_p3 = pnand %p1860_p2, %p1854_p5 }
  0x3e   : > { %1864 = shalt.err (!%p1861_p3)
}
  0x3f   : > { %s1865_s28 = scalar_lea.vmem %s2118_s30, 384  ;;  %s1969_s4 = smov [#allocation2]  }
  0x40   : > { %p1866_p7 = scmp.ne.s32.totalorder %s2118_s30, %s1865_s28  ;;  %s1870_s6 = sshll.u32 %s1969_s4, 4  ;;  %s1871_s6 = int_to_ptr.vmem [resolvable:$false] %s1870_s6 }
  0x41   : > { %s1872_s18 = scalar_lea.vmem %s1871_s6, 768  ;;  %p1873_p4 = scmp.lt.s32.totalorder %s2118_s30, %s1871_s6 }
  0x42   : > { %p1868_p10 = pnand %p1866_p7, %p2075_p13  ;;  %p1874_p11 = scmp.lt.s32.totalorder %s1872_s18, %s1865_s28 }
  0x44   : > { %p1869_p1 = pneg %p1868_p10  ;;  %p1875_p6 = por %p1874_p11, %p1873_p4 }
  0x46   : > { %p1876_p8 = pnand %p1875_p6, %p1869_p1 }
  0x48   : > { %1879 = shalt.err (!%p1876_p8)
}
  0x49   : > { %s1970_s7 = smov 3072   ;;  %s1737_s20 = sadd.s32 2944, %s2050_s25 }
  0x4a   : > { %1755 = dma.hbm_to_vmem [thread:$0]  (!%p2053_p9), %s2114_s29, 384, %s2118_s30, %s178_s5, %s1970_s7, %s1967_s9, %s1968_s11  }
  0x4b   : > { %s2151_s4 = scalar_lea.hbm %s3325_s2, %s1737_s20  ;;  %s230_s6 = scalar_lea.vmem [#allocation6], %s1738_s26 }
  0x4c   : > { %s242_s18 = sshll.u32 %s230_s6, 4  ;;  %s1880_s0 = scalar_lea.hbm %s2151_s4, 384  ;;  %s2155_s18 = int_to_ptr.vmem [resolvable:$true] %s242_s18 }
  0x4d   : > { %p1881_p11 = scmp.ne.s32.totalorder %s2151_s4, %s1880_s0  ;;  %s1885_s30 = scalar_lea.hbm %s3325_s2, 18432 }
  0x4e   : > { %p1886_p0 = scmp.lt.u32.totalorder %s2151_s4, %s3325_s2  ;;  %p1887_p2 = scmp.lt.u32.totalorder %s1885_s30, %s1880_s0 }
  0x4f   : > { %p1883_p5 = pnand %p1881_p11, %p2075_p13  ;;  %p1889_p7 = scmp.lt.u32.totalorder %s1880_s0, %s2151_s4 }
  0x50   : > { %p1888_p3 = por %p1887_p2, %p1886_p0 }
  0x51   : > { %p1884_p12 = pneg %p1883_p5 }
  0x52   : > { %p1890_p10 = por %p1889_p7, %p1888_p3 }
  0x54   : > { %p1891_p1 = pnand %p1890_p10, %p1884_p12 }
  0x56   : > { %1894 = shalt.err (!%p1891_p1)
}
  0x57   : > { %s1895_s24 = scalar_lea.vmem %s2155_s18, 384  ;;  %s1971_s26 = smov [#allocation6]  }
  0x58   : > { %p1896_p4 = scmp.ne.s32.totalorder %s2155_s18, %s1895_s24  ;;  %s1900_s21 = sshll.u32 %s1971_s26, 4  ;;  %s1901_s21 = int_to_ptr.vmem [resolvable:$false] %s1900_s21 }
  0x59   : > { %s1902_s28 = scalar_lea.vmem %s1901_s21, 768  ;;  %p1903_p11 = scmp.lt.s32.totalorder %s2155_s18, %s1901_s21 }
  0x5a   : > { %p1898_p6 = pnand %p1896_p4, %p2075_p13  ;;  %p1904_p5 = scmp.lt.s32.totalorder %s1902_s28, %s1895_s24 }
  0x5c   : > { %p1899_p8 = pneg %p1898_p6  ;;  %p1905_p0 = por %p1904_p5, %p1903_p11 }
  0x5e   : > { %p1906_p2 = pnand %p1905_p0, %p1899_p8 }
  0x60   : > { %1909 = shalt.err (!%p1906_p2)
}
  0x61   : > { %1761 = dma.hbm_to_vmem [thread:$0]  (!%p2053_p9), %s2151_s4, 384, %s2155_s18, %s2069_s8, %s1970_s7, %s1967_s9, %s1968_s11  }
  0x62   : > { %p3371_p13 = scmp.ne.s32.totalorder %s3369_s12, 0 }
  0x64   : > { %254 = sbr.rel (%p3371_p13) target bundleno = 472 (0x1d8), region = 32 }
  0x6b   : > { %s256_s0 = sand.u32 1, %s1948_s13   ;;  %p3372_p12 = scmp.ne.s32.totalorder %s3364_s22, 0 }
  0x6c   : > { %s257_s10 = scalar_lea.sflag [#allocation3], %s256_s0 }
  0x6d   : > { %1935 = dma.done.wait (%p3372_p12), %s257_s10, 384  }
  0x6e   : > { %1937 = vsyncadd (%p3372_p12), %s257_s10, 4294966912  ;;  %s3373_s27 = sadd.s32 4294967295, %s1964_s17   ;;  %s1744_s25 = smul.u32 576, %s256_s0 }
  0x6f   : > { %s265_s6 = sand.u32 1, %s3373_s27  }
  0x70   : > { %s266_s29 = scalar_lea.sflag [#allocation5], %s265_s6  ;;  %s2191_s30 = scalar_lea.vmem [#allocation4], %s1744_s25 }
  0x71   : > { %1939 = dma.done.wait (%p3372_p12), %s266_s29, 9600  }
  0x72   : > { %1941 = vsyncadd (%p3372_p12), %s266_s29, 4294957696  ;;  %v343_v0 = vld [vmem:[%s2191_s30 + $0x8] sm:$0xff]  ;;  %v344_v1 = vld [vmem:[%s2191_s30 + $0x10] sm:$0xff]  ;;  %vm604_vm0 = vcmask 1046528   ;;  %vm679_vm1 = vcmask 1040384   ;;  %vm801_vm2 = vcmask 1045504  }
  0x73   : > { %v345_v2 = vld [vmem:[%s2191_s30 + $0x18] sm:$0xff]  ;;  %v1685_v3 = vld [vmem:[%s2191_s30 + $0xc8] sm:$0xff]  ;;  %v1686_v4 = vld [vmem:[%s2191_s30 + $0xd0] sm:$0xff]  ;;  %vm875_vm3 = vcmask 1041408   ;;  %v1972_v14 = vmov 1.0   ;;  %s1973_s22 = smov 127  }
  0x74   : > { %v1687_v5 = vld [vmem:[%s2191_s30 + $0xd8] sm:$0xff]  ;;  %v392_v6 = vmin.f32 %v343_v0, %v1685_v3  ;;  %v393_v7 = vmin.f32 %v344_v1, %v1686_v4  ;;  %v1709_v9 = vld [vmem:[%s2191_s30 + $0x188] sm:$0xff]  ;;  %v1710_v10 = vld [vmem:[%s2191_s30 + $0x190] sm:$0xff]  ;;  %v680_v15 = vrot.slane %v1972_v14, 7  ;;  %v876_v23 = vrot.slane %v1972_v14, 6  ;;  %s1974_s8 = smov 1  }
  0x75   : > { %v394_v8 = vmin.f32 %v345_v2, %v1687_v5  ;;  %v1711_v11 = vld [vmem:[%s2191_s30 + $0x198] sm:$0xff]  ;;  %v342_v12 = vld [vmem:[%s2191_s30] sm:$0xff]  ;;  %v2215_v25 = vrot.slane %v1972_v14, 1  ;;  %v2217_v26 = vrot.slane %v1972_v14, 2  ;;  %v347_v0 = vld [vmem:[%s2191_s30 + $0x28] sm:$0xff]  ;;  %s1975_s9 = smov 126  }
  0x76   : > { %v1684_v13 = vld [vmem:[%s2191_s30 + $0xc0] sm:$0xff]  ;;  %v2208_v16 = vmin.f32 %v392_v6, %v1709_v9  ;;  %v442_v17 = vmin.f32 %v393_v7, %v1710_v10  ;;  %v1689_v1 = vld [vmem:[%s2191_s30 + $0xe8] sm:$0xff]  ;;  %v348_v6 = vld [vmem:[%s2191_s30 + $0x30] sm:$0xff]  ;;  %s1976_s11 = smov 2   ;;  %p325_p9 = scmp.lt.s32.totalorder %s1956_s15, 1 }
  0x77   : > { %v2210_v18 = vmin.f32 %v394_v8, %v1711_v11  ;;  %v391_v19 = vmin.f32 %v342_v12, %v1684_v13  ;;  %v346_v20 = vld [vmem:[%s2191_s30 + $0x20] sm:$0xff]  ;;  %v1690_v7 = vld [vmem:[%s2191_s30 + $0xf0] sm:$0xff]  ;;  %v1713_v12 = vld [vmem:[%s2191_s30 + $0x1a8] sm:$0xff] }
  0x78   : > { %v1688_v21 = vld [vmem:[%s2191_s30 + $0xe0] sm:$0xff]  ;;  %v608_v27 = vrot.slane %v442_v17, 1  ;;  %v683_v29 = vrot.slane %v2208_v16, 7  ;;  %v685_v30 = vrot.slane %v442_v17, 7  ;;  %v805_v31 = vrot.slane %v442_v17, 2  ;;  %v349_v13 = vld [vmem:[%s2191_s30 + $0x38] sm:$0xff] }
  0x79   : > { %v1708_v22 = vld [vmem:[%s2191_s30 + $0x180] sm:$0xff]  ;;  %v395_v24 = vmin.f32 %v346_v20, %v1688_v21  ;;  %v610_v28 = vrot.slane %v2210_v18, 1  ;;  %v807_v32 = vrot.slane %v2210_v18, 2  ;;  %v879_v33 = vrot.slane %v2208_v16, 6  ;;  %v1691_v14 = vld [vmem:[%s2191_s30 + $0xf8] sm:$0xff]  ;;  %v1714_v21 = vld [vmem:[%s2191_s30 + $0x1b0] sm:$0xff] }
  0x7a   : > { %v881_v34 = vrot.slane %v442_v17, 6  ;;  %v686_v36 = vsel %vm679_vm1, %v683_v29, %v685_v30  ;;  %v440_v37 = vmin.f32 %v391_v19, %v1708_v22  ;;  %v606_v38 = vrot.slane %v2208_v16, 1  ;;  %v1712_v39 = vld [vmem:[%s2191_s30 + $0x1a0] sm:$0xff]  ;;  %s3494_s15 = smov (!%p325_p9, %s1956_s15), 1 }
  0x7b   : > { %v611_v35 = vsel %vm604_vm0, %v608_v27, %v610_v28  ;;  %v808_v41 = vsel %vm801_vm2, %v805_v31, %v807_v32  ;;  %v803_v43 = vrot.slane %v2208_v16, 2  ;;  %v2230_v50 = vmin.f32 %v395_v24, %v1712_v39  ;;  %v350_v22 = vld [vmem:[%s2191_s30 + $0x40] sm:$0xff]  ;;  %s1745_s12 = smul.u32 192, %s3494_s15 }
  0x7c   : > { %v755_v40 = vmin.f32 %v611_v35, %v686_v36  ;;  %v882_v42 = vsel %vm875_vm3, %v879_v33, %v881_v34  ;;  %v605_v45 = vrot.slane %v440_v37, 1  ;;  %v681_v46 = vrot.slane %v440_v37, 7 }
  0x7d   : > { %v951_v44 = vmin.f32 %v808_v41, %v882_v42  ;;  %v802_v47 = vrot.slane %v440_v37, 2  ;;  %v877_v49 = vrot.slane %v440_v37, 6  ;;  %v687_v51 = vrot.slane %v2210_v18, 7  ;;  %s3085_s4 = scalar_lea.vmem %s3326_s3, %s1745_s12 }
  0x7e   : > { %v779_v48 = vmin.f32 %v442_v17, %v755_v40  ;;  %v607_v52 = vsel %vm604_vm0, %v605_v45, %v606_v38  ;;  %v682_v53 = vsel %vm679_vm1, %v680_v15, %v681_v46  ;;  %v883_v55 = vrot.slane %v2210_v18, 6  ;;  %v1716_v45 = vld [vmem:[%s2191_s30 + $0x1c0] sm:$0xff] }
  0x7f   : > { %v804_v54 = vsel %vm801_vm2, %v802_v47, %v803_v43  ;;  %v753_v57 = vmin.f32 %v607_v52, %v682_v53  ;;  %v878_v58 = vsel %vm875_vm3, %v876_v23, %v877_v49  ;;  %v612_v59 = vrot.slane %v2230_v50, 1  ;;  %v1692_v23 = vld [vmem:[%s2191_s30 + $0x100] sm:$0xff]  ;;  %v351_v52 = vld [vmem:[%s2191_s30 + $0x48] sm:$0xff] }
  0x80   : > { %v2237_v56 = vmin.f32 %v779_v48, %v951_v44  ;;  %v949_v60 = vmin.f32 %v804_v54, %v878_v58  ;;  %v688_v61 = vsel %vm679_vm1, %v685_v30, %v687_v51  ;;  %v809_v62 = vrot.slane %v2230_v50, 2  ;;  %v1715_v44 = vld [vmem:[%s2191_s30 + $0x1b8] sm:$0xff]  ;;  %v1693_v53 = vld [vmem:[%s2191_s30 + $0x108] sm:$0xff] }
  0x81   : > { %v884_v63 = vsel %vm875_vm3, %v881_v34, %v883_v55  ;;  %v777_v2 = vmin.f32 %v440_v37, %v753_v57  ;;  %v613_v3 = vsel %vm604_vm0, %v610_v28, %v612_v59  ;;  %v609_v4 = vsel %vm604_vm0, %v606_v38, %v608_v27 }
  0x82   : > { %1028 = vrot.lane.b32.xlu1 %v2237_v56, %s1973_s22  ;;  %v684_v5 = vsel %vm679_vm1, %v681_v46, %v683_v29  ;;  %v756_v8 = vmin.f32 %v613_v3, %v688_v61  ;;  %v810_v9 = vsel %vm801_vm2, %v807_v32, %v809_v62  ;;  %v806_v11 = vsel %vm801_vm2, %v803_v43, %v805_v31 }
  0x83   : > { %v754_v10 = vmin.f32 %v609_v4, %v684_v5  ;;  %v2258_v15 = vmin.f32 %v777_v2, %v949_v60  ;;  %v952_v17 = vmin.f32 %v810_v9, %v884_v63  ;;  %v880_v19 = vsel %vm875_vm3, %v877_v49, %v879_v33 }
  0x84   : > { %v396_v20 = vmin.f32 %v347_v0, %v1689_v1  ;;  %v780_v24 = vmin.f32 %v2210_v18, %v756_v8  ;;  %v950_v28 = vmin.f32 %v806_v11, %v880_v19  ;;  %v397_v29 = vmin.f32 %v348_v6, %v1690_v7 }
  0x85   : > { %v778_v27 = vmin.f32 %v2208_v16, %v754_v10  ;;  %1024 = vrot.lane.b32.xlu0 %v2258_v15, %s1973_s22  ;;  %v689_v31 = vrot.slane %v2230_v50, 7  ;;  %v885_v32 = vrot.slane %v2230_v50, 6  ;;  %v398_v33 = vmin.f32 %v349_v13, %v1691_v14  ;;  %v352_v13 = vld [vmem:[%s2191_s30 + $0x50] sm:$0xff] }
  0x86   : > { %v2268_v30 = vmin.f32 %v396_v20, %v1713_v12  ;;  %v2272_v34 = vmin.f32 %v780_v24, %v952_v17  ;;  %v2276_v18 = vmin.f32 %v397_v29, %v1714_v21  ;;  %v399_v16 = vmin.f32 %v350_v22, %v1692_v23  ;;  %v1694_v14 = vld [vmem:[%s2191_s30 + $0x110] sm:$0xff]  ;;  %v1717_v17 = vld [vmem:[%s2191_s30 + $0x1c8] sm:$0xff]  ;;  %v353_v23 = vld [vmem:[%s2191_s30 + $0x58] sm:$0xff] }
  0x87   : > { %v2274_v35 = vmin.f32 %v778_v27, %v950_v28  ;;  %v690_v42 = vsel %vm679_vm1, %v687_v51, %v689_v31  ;;  %v886_v43 = vsel %vm875_vm3, %v883_v55, %v885_v32  ;;  %v2300_v61 = vmin.f32 %v398_v33, %v1715_v44  ;;  %v1695_v24 = vld [vmem:[%s2191_s30 + $0x118] sm:$0xff] }
  0x88   : > { %v614_v36 = vrot.slane %v2268_v30, 1  ;;  %v691_v37 = vrot.slane %v2268_v30, 7  ;;  %v811_v38 = vrot.slane %v2268_v30, 2  ;;  %v887_v39 = vrot.slane %v2268_v30, 6  ;;  %1030 = vrot.lane.b32.xlu1 %v2272_v34, %s1973_s22 }
  0x89   : > { %v616_v40 = vrot.slane %v2276_v18, 1  ;;  %v813_v41 = vrot.slane %v2276_v18, 2  ;;  %1026 = vrot.lane.b32.xlu0 %v2274_v35, %s1973_s22  ;;  %v2302_v63 = vmin.f32 %v399_v16, %v1716_v45  ;;  %v400_v1 = vmin.f32 %v351_v52, %v1693_v53 }
  0x8a   : > { %v692_v46 = vsel %vm679_vm1, %v689_v31, %v691_v37  ;;  %v888_v47 = vsel %vm875_vm3, %v885_v32, %v887_v39  ;;  %v615_v48 = vsel %vm604_vm0, %v612_v59, %v614_v36  ;;  %v812_v49 = vsel %vm801_vm2, %v809_v62, %v811_v38  ;;  %v1718_v31 = vld [vmem:[%s2191_s30 + $0x1d0] sm:$0xff] }
  0x8b   : > { %v617_v54 = vsel %vm604_vm0, %v614_v36, %v616_v40  ;;  %v814_v51 = vsel %vm801_vm2, %v811_v38, %v813_v41  ;;  %v757_v55 = vmin.f32 %v615_v48, %v690_v42  ;;  %v953_v57 = vmin.f32 %v812_v49, %v886_v43  ;;  %v354_v48 = vld [vmem:[%s2191_s30 + $0x60] sm:$0xff] }
  0x8c   : > { %v758_v58 = vmin.f32 %v617_v54, %v692_v46  ;;  %v954_v60 = vmin.f32 %v814_v51, %v888_v47  ;;  %v693_v59 = vrot.slane %v2276_v18, 7  ;;  %v889_v62 = vrot.slane %v2276_v18, 6  ;;  %v1696_v49 = vld [vmem:[%s2191_s30 + $0x120] sm:$0xff] }
  0x8d   : > { %v781_v0 = vmin.f32 %v2230_v50, %v757_v55  ;;  %v618_v3 = vrot.slane %v2300_v61, 1  ;;  %v620_v4 = vrot.slane %v2302_v63, 1  ;;  %v695_v5 = vrot.slane %v2300_v61, 7  ;;  %v1719_v55 = vld [vmem:[%s2191_s30 + $0x1d8] sm:$0xff] }
  0x8e   : > { %v782_v2 = vmin.f32 %v2268_v30, %v758_v58  ;;  %v815_v50 = vrot.slane %v2300_v61, 2  ;;  %v817_v7 = vrot.slane %v2302_v63, 2  ;;  %v891_v8 = vrot.slane %v2300_v61, 6 }
  0x8f   : > { %v2311_v6 = vmin.f32 %v781_v0, %v953_v57  ;;  %v621_v10 = vsel %vm604_vm0, %v618_v3, %v620_v4  ;;  %v696_v11 = vsel %vm679_vm1, %v693_v59, %v695_v5  ;;  %v619_v12 = vsel %vm604_vm0, %v616_v40, %v618_v3  ;;  %v1720_v0 = vld [vmem:[%s2191_s30 + $0x1e0] sm:$0xff] }
  0x90   : > { %v2316_v9 = vmin.f32 %v782_v2, %v954_v60  ;;  %v760_v19 = vmin.f32 %v621_v10, %v696_v11  ;;  %v818_v20 = vsel %vm801_vm2, %v815_v50, %v817_v7  ;;  %v892_v21 = vsel %vm875_vm3, %v889_v62, %v891_v8 }
  0x91   : > { %1032 = vrot.lane.b32.xlu0 %v2311_v6, %s1973_s22  ;;  %v694_v22 = vsel %vm679_vm1, %v691_v37, %v693_v59  ;;  %v956_v27 = vmin.f32 %v818_v20, %v892_v21  ;;  %v816_v29 = vsel %vm801_vm2, %v813_v41, %v815_v50  ;;  %v890_v30 = vsel %vm875_vm3, %v887_v39, %v889_v62  ;;  %v355_v59 = vld [vmem:[%s2191_s30 + $0x68] sm:$0xff] }
  0x92   : > { %1034 = vrot.lane.b32.xlu1 %v2316_v9, %s1973_s22  ;;  %v759_v28 = vmin.f32 %v619_v12, %v694_v22  ;;  %v784_v32 = vmin.f32 %v2300_v61, %v760_v19  ;;  %v955_v33 = vmin.f32 %v816_v29, %v890_v30  ;;  %v401_v16 = vmin.f32 %v352_v13, %v1694_v14  ;;  %v1697_v62 = vld [vmem:[%s2191_s30 + $0x128] sm:$0xff]  ;;  %v356_v30 = vld [vmem:[%s2191_s30 + $0x70] sm:$0xff] }
  0x93   : > { %v2337_v36 = vmin.f32 %v400_v1, %v1717_v17  ;;  %v697_v38 = vrot.slane %v2302_v63, 7  ;;  %v893_v40 = vrot.slane %v2302_v63, 6  ;;  %v402_v42 = vmin.f32 %v353_v23, %v1695_v24 }
  0x94   : > { %v783_v37 = vmin.f32 %v2276_v18, %v759_v28  ;;  %v2342_v41 = vmin.f32 %v784_v32, %v956_v27  ;;  %v2344_v39 = vmin.f32 %v401_v16, %v1718_v31  ;;  %v404_v13 = vmin.f32 %v355_v59, %v1697_v62  ;;  %v1698_v31 = vld [vmem:[%s2191_s30 + $0x130] sm:$0xff]  ;;  %v1721_v32 = vld [vmem:[%s2191_s30 + $0x1e8] sm:$0xff] }
  0x95   : > { %v622_v43 = vrot.slane %v2337_v36, 1  ;;  %v699_v44 = vrot.slane %v2337_v36, 7  ;;  %v819_v46 = vrot.slane %v2337_v36, 2  ;;  %v895_v18 = vrot.slane %v2337_v36, 6 }
  0x96   : > { %v2348_v45 = vmin.f32 %v783_v37, %v955_v33  ;;  %v698_v47 = vsel %vm679_vm1, %v695_v5, %v697_v38  ;;  %1038 = vrot.lane.b32.xlu1 %v2342_v41, %s1973_s22  ;;  %v624_v52 = vrot.slane %v2344_v39, 1  ;;  %v821_v54 = vrot.slane %v2344_v39, 2 }
  0x97   : > { %v700_v53 = vsel %vm679_vm1, %v697_v38, %v699_v44  ;;  %v623_v51 = vsel %vm604_vm0, %v620_v4, %v622_v43  ;;  %v896_v57 = vsel %vm875_vm3, %v893_v40, %v895_v18  ;;  %v820_v60 = vsel %vm801_vm2, %v817_v7, %v819_v46  ;;  %v357_v38 = vld [vmem:[%s2191_s30 + $0x78] sm:$0xff] }
  0x98   : > { %1036 = vrot.lane.b32.xlu0 %v2348_v45, %s1973_s22  ;;  %v761_v58 = vmin.f32 %v623_v51, %v698_v47  ;;  %v894_v61 = vsel %vm875_vm3, %v891_v8, %v893_v40  ;;  %v625_v1 = vsel %vm604_vm0, %v622_v43, %v624_v52  ;;  %v822_v2 = vsel %vm801_vm2, %v819_v46, %v821_v54  ;;  %v1699_v40 = vld [vmem:[%s2191_s30 + $0x138] sm:$0xff]  ;;  %v1722_v47 = vld [vmem:[%s2191_s30 + $0x1f0] sm:$0xff] }
  0x99   : > { %v957_v3 = vmin.f32 %v820_v60, %v894_v61  ;;  %v403_v4 = vmin.f32 %v354_v48, %v1696_v49  ;;  %v762_v5 = vmin.f32 %v625_v1, %v700_v53  ;;  %v958_v50 = vmin.f32 %v822_v2, %v896_v57  ;;  %v358_v1 = vld [vmem:[%s2191_s30 + $0x80] sm:$0xff] }
  0x9a   : > { %v785_v10 = vmin.f32 %v2302_v63, %v761_v58  ;;  %v2373_v11 = vmin.f32 %v402_v42, %v1719_v55  ;;  %v701_v7 = vrot.slane %v2344_v39, 7  ;;  %v897_v8 = vrot.slane %v2344_v39, 6  ;;  %v1700_v2 = vld [vmem:[%s2191_s30 + $0x140] sm:$0xff] }
  0x9b   : > { %v2375_v12 = vmin.f32 %v403_v4, %v1720_v0  ;;  %v786_v14 = vmin.f32 %v2337_v36, %v762_v5  ;;  %v2409_v53 = vmin.f32 %v404_v13, %v1721_v32  ;;  %v406_v58 = vmin.f32 %v357_v38, %v1699_v40 }
  0x9c   : > { %v2380_v17 = vmin.f32 %v785_v10, %v957_v3  ;;  %v626_v19 = vrot.slane %v2373_v11, 1  ;;  %v703_v63 = vrot.slane %v2373_v11, 7  ;;  %v823_v21 = vrot.slane %v2373_v11, 2  ;;  %v1723_v10 = vld [vmem:[%s2191_s30 + $0x1f8] sm:$0xff] }
  0x9d   : > { %v628_v20 = vrot.slane %v2375_v12, 1  ;;  %v825_v22 = vrot.slane %v2375_v12, 2  ;;  %v899_v23 = vrot.slane %v2373_v11, 6  ;;  %v2388_v24 = vmin.f32 %v786_v14, %v958_v50  ;;  %v1724_v14 = vld [vmem:[%s2191_s30 + $0x200] sm:$0xff] }
  0x9e   : > { %1040 = vrot.lane.b32.xlu0 %v2380_v17, %s1973_s22  ;;  %v704_v27 = vsel %vm679_vm1, %v701_v7, %v703_v63  ;;  %v627_v28 = vsel %vm604_vm0, %v624_v52, %v626_v19  ;;  %v702_v29 = vsel %vm679_vm1, %v699_v44, %v701_v7  ;;  %v824_v46 = vsel %vm801_vm2, %v821_v54, %v823_v21 }
  0x9f   : > { %v629_v33 = vsel %vm604_vm0, %v626_v19, %v628_v20  ;;  %v826_v16 = vsel %vm801_vm2, %v823_v21, %v825_v22  ;;  %v900_v36 = vsel %vm875_vm3, %v897_v8, %v899_v23  ;;  %v763_v37 = vmin.f32 %v627_v28, %v702_v29  ;;  %1042 = vrot.lane.b32.xlu1 %v2388_v24, %s1973_s22  ;;  %v359_v19 = vld [vmem:[%s2191_s30 + $0x88] sm:$0xff] }
  0xa0   : > { %v764_v42 = vmin.f32 %v629_v33, %v704_v27  ;;  %v960_v43 = vmin.f32 %v826_v16, %v900_v36  ;;  %v898_v44 = vsel %vm875_vm3, %v895_v18, %v897_v8  ;;  %v405_v52 = vmin.f32 %v356_v30, %v1698_v31 }
  0xa1   : > { %v787_v48 = vmin.f32 %v2344_v39, %v763_v37  ;;  %v959_v49 = vmin.f32 %v824_v46, %v898_v44  ;;  %v705_v55 = vrot.slane %v2375_v12, 7  ;;  %v901_v57 = vrot.slane %v2375_v12, 6 }
  0xa2   : > { %v788_v51 = vmin.f32 %v2373_v11, %v764_v42  ;;  %v2416_v18 = vmin.f32 %v405_v52, %v1722_v47  ;;  %v630_v39 = vrot.slane %v2409_v53, 1  ;;  %v707_v60 = vrot.slane %v2409_v53, 7  ;;  %v360_v52 = vld [vmem:[%s2191_s30 + $0x90] sm:$0xff] }
  0xa3   : > { %v2414_v54 = vmin.f32 %v787_v48, %v959_v49  ;;  %v827_v0 = vrot.slane %v2409_v53, 2  ;;  %v903_v59 = vrot.slane %v2409_v53, 6  ;;  %v706_v62 = vsel %vm679_vm1, %v703_v63, %v705_v55  ;;  %v1701_v63 = vld [vmem:[%s2191_s30 + $0x148] sm:$0xff] }
  0xa4   : > { %v2420_v61 = vmin.f32 %v788_v51, %v960_v43  ;;  %v632_v3 = vrot.slane %v2416_v18, 1  ;;  %v708_v4 = vsel %vm679_vm1, %v705_v55, %v707_v60  ;;  %v829_v5 = vrot.slane %v2416_v18, 2  ;;  %v1725_v51 = vld [vmem:[%s2191_s30 + $0x208] sm:$0xff] }
  0xa5   : > { %1044 = vrot.lane.b32.xlu0 %v2414_v54, %s1973_s22  ;;  %v631_v50 = vsel %vm604_vm0, %v628_v20, %v630_v39  ;;  %v904_v11 = vsel %vm875_vm3, %v901_v57, %v903_v59  ;;  %v828_v8 = vsel %vm801_vm2, %v825_v22, %v827_v0  ;;  %v902_v13 = vsel %vm875_vm3, %v899_v23, %v901_v57 }
  0xa6   : > { %1046 = vrot.lane.b32.xlu1 %v2420_v61, %s1973_s22  ;;  %v765_v7 = vmin.f32 %v631_v50, %v706_v62  ;;  %v633_v21 = vsel %vm604_vm0, %v630_v39, %v632_v3  ;;  %v830_v27 = vsel %vm801_vm2, %v827_v0, %v829_v5  ;;  %v961_v28 = vmin.f32 %v828_v8, %v902_v13  ;;  %v361_v0 = vld [vmem:[%s2191_s30 + $0x98] sm:$0xff] }
  0xa7   : > { %v407_v20 = vmin.f32 %v358_v1, %v1700_v2  ;;  %v766_v29 = vmin.f32 %v633_v21, %v708_v4  ;;  %v962_v30 = vmin.f32 %v830_v27, %v904_v11  ;;  %v2445_v32 = vmin.f32 %v406_v58, %v1723_v10  ;;  %v1703_v62 = vld [vmem:[%s2191_s30 + $0x158] sm:$0xff]  ;;  %v1726_v4 = vld [vmem:[%s2191_s30 + $0x210] sm:$0xff] }
  0xa8   : > { %v789_v31 = vmin.f32 %v2375_v12, %v765_v7  ;;  %v709_v22 = vrot.slane %v2416_v18, 7  ;;  %v905_v23 = vrot.slane %v2416_v18, 6  ;;  %v408_v16 = vmin.f32 %v359_v19, %v1701_v63 }
  0xa9   : > { %v2447_v33 = vmin.f32 %v407_v20, %v1724_v14  ;;  %v790_v36 = vmin.f32 %v2409_v53, %v766_v29  ;;  %v634_v38 = vrot.slane %v2445_v32, 1  ;;  %v711_v12 = vrot.slane %v2445_v32, 7  ;;  %v1702_v53 = vld [vmem:[%s2191_s30 + $0x150] sm:$0xff]  ;;  %v362_v29 = vld [vmem:[%s2191_s30 + $0xa0] sm:$0xff] }
  0xaa   : > { %v2452_v37 = vmin.f32 %v789_v31, %v961_v28  ;;  %v831_v42 = vrot.slane %v2445_v32, 2  ;;  %v907_v46 = vrot.slane %v2445_v32, 6  ;;  %v710_v49 = vsel %vm679_vm1, %v707_v60, %v709_v22 }
  0xab   : > { %v636_v40 = vrot.slane %v2447_v33, 1  ;;  %v833_v43 = vrot.slane %v2447_v33, 2  ;;  %v2460_v44 = vmin.f32 %v790_v36, %v962_v30  ;;  %v712_v47 = vsel %vm679_vm1, %v709_v22, %v711_v12  ;;  %v1704_v30 = vld [vmem:[%s2191_s30 + $0x160] sm:$0xff] }
  0xac   : > { %3374 = vst [vmem:[#allocation9_spill] sm:$0xff] %v2452_v37  ;;  %1048 = vrot.lane.b32.xlu0 %v2452_v37, %s1973_s22  ;;  %v635_v48 = vsel %vm604_vm0, %v632_v3, %v634_v38  ;;  %v908_v58 = vsel %vm875_vm3, %v905_v23, %v907_v46  ;;  %v832_v3 = vsel %vm801_vm2, %v829_v5, %v831_v42  ;;  %v713_v13 = vrot.slane %v2447_v33, 7 }
  0xad   : > { %3375 = vst [vmem:[#allocation10_spill] sm:$0xff] %v2460_v44  ;;  %v637_v55 = vsel %vm604_vm0, %v634_v38, %v636_v40  ;;  %v834_v57 = vsel %vm801_vm2, %v831_v42, %v833_v43  ;;  %v767_v39 = vmin.f32 %v635_v48, %v710_v49  ;;  %1050 = vrot.lane.b32.xlu1 %v2460_v44, %s1973_s22  ;;  %v909_v14 = vrot.slane %v2447_v33, 6  ;;  %v363_v48 = vld [vmem:[%s2191_s30 + $0xa8] sm:$0xff] }
  0xae   : > { %v768_v1 = vmin.f32 %v637_v55, %v712_v47  ;;  %v964_v2 = vmin.f32 %v834_v57, %v908_v58  ;;  %v906_v60 = vsel %vm875_vm3, %v903_v59, %v905_v23  ;;  %v409_v11 = vmin.f32 %v360_v52, %v1702_v53  ;;  %v1728_v47 = vld [vmem:[%s2191_s30 + $0x220] sm:$0xff]  ;;  %v1705_v49 = vld [vmem:[%s2191_s30 + $0x168] sm:$0xff] }
  0xaf   : > { %v791_v50 = vmin.f32 %v2416_v18, %v767_v39  ;;  %v963_v10 = vmin.f32 %v832_v3, %v906_v60  ;;  %v2481_v7 = vmin.f32 %v408_v16, %v1725_v51  ;;  %v410_v19 = vmin.f32 %v361_v0, %v1703_v62  ;;  %v1727_v16 = vld [vmem:[%s2191_s30 + $0x218] sm:$0xff] }
  0xb0   : > { %v792_v8 = vmin.f32 %v2445_v32, %v768_v1  ;;  %v2488_v59 = vmin.f32 %v409_v11, %v1726_v4  ;;  %v714_v20 = vsel %vm679_vm1, %v711_v12, %v713_v13  ;;  %v910_v42 = vsel %vm875_vm3, %v907_v46, %v909_v14 }
  0xb1   : > { %v2486_v5 = vmin.f32 %v791_v50, %v963_v10  ;;  %v638_v18 = vrot.slane %v2481_v7, 1  ;;  %v715_v63 = vrot.slane %v2481_v7, 7  ;;  %v835_v27 = vrot.slane %v2481_v7, 2 }
  0xb2   : > { %v2492_v21 = vmin.f32 %v792_v8, %v964_v2  ;;  %v911_v28 = vrot.slane %v2481_v7, 6  ;;  %v640_v31 = vrot.slane %v2488_v59, 1  ;;  %v837_v22 = vrot.slane %v2488_v59, 2 }
  0xb3   : > { %3376 = vst [vmem:[#allocation11_spill] sm:$0xff] %v2486_v5  ;;  %1052 = vrot.lane.b32.xlu0 %v2486_v5, %s1973_s22  ;;  %v716_v32 = vsel %vm679_vm1, %v713_v13, %v715_v63  ;;  %v639_v23 = vsel %vm604_vm0, %v636_v40, %v638_v18  ;;  %v836_v12 = vsel %vm801_vm2, %v833_v43, %v835_v27  ;;  %v717_v43 = vrot.slane %v2488_v59, 7 }
  0xb4   : > { %3377 = vst [vmem:[#allocation12_spill] sm:$0xff] %v2492_v21  ;;  %1054 = vrot.lane.b32.xlu1 %v2492_v21, %s1973_s22  ;;  %v912_v36 = vsel %vm875_vm3, %v909_v14, %v911_v28  ;;  %v769_v38 = vmin.f32 %v639_v23, %v714_v20  ;;  %v641_v52 = vsel %vm604_vm0, %v638_v18, %v640_v31  ;;  %v913_v46 = vrot.slane %v2488_v59, 6  ;;  %v364_v14 = vld [vmem:[%s2191_s30 + $0xb0] sm:$0xff]  ;;  %v1729_v18 = vld [vmem:[%s2191_s30 + $0x228] sm:$0xff]  ;;  %v1707_v23 = vld [vmem:[%s2191_s30 + $0x178] sm:$0xff] }
  0xb5   : > { %v838_v53 = vsel %vm801_vm2, %v835_v27, %v837_v22  ;;  %v965_v51 = vmin.f32 %v836_v12, %v910_v42  ;;  %v411_v40 = vmin.f32 %v362_v29, %v1704_v30  ;;  %v770_v55 = vmin.f32 %v641_v52, %v716_v32  ;;  %v365_v32 = vld [vmem:[%s2191_s30 + $0xb8] sm:$0xff] }
  0xb6   : > { %v966_v57 = vmin.f32 %v838_v53, %v912_v36  ;;  %v793_v58 = vmin.f32 %v2447_v33, %v769_v38  ;;  %v459_v39 = vmin.f32 %v410_v19, %v1727_v16  ;;  %v412_v62 = vmin.f32 %v363_v48, %v1705_v49  ;;  %v1706_v19 = vld [vmem:[%s2191_s30 + $0x170] sm:$0xff] }
  0xb7   : > { %v2517_v0 = vmin.f32 %v411_v40, %v1728_v47  ;;  %v794_v1 = vmin.f32 %v2481_v7, %v770_v55  ;;  %v718_v13 = vsel %vm679_vm1, %v715_v63, %v717_v43  ;;  %v914_v63 = vsel %vm875_vm3, %v911_v28, %v913_v46  ;;  %v1730_v38 = vld [vmem:[%s2191_s30 + $0x230] sm:$0xff] }
  0xb8   : > { %v2522_v2 = vmin.f32 %v793_v58, %v965_v51  ;;  %v642_v3 = vrot.slane %v459_v39, 1  ;;  %v719_v60 = vrot.slane %v459_v39, 7  ;;  %v839_v33 = vrot.slane %v459_v39, 2 }
  0xb9   : > { %v644_v4 = vrot.slane %v2517_v0, 1  ;;  %v841_v50 = vrot.slane %v2517_v0, 2  ;;  %v915_v10 = vrot.slane %v459_v39, 6  ;;  %v2526_v11 = vmin.f32 %v794_v1, %v966_v57 }
  0xba   : > { %3378 = vst [vmem:[#allocation13_spill] sm:$0xff] %v2522_v2  ;;  %1056 = vrot.lane.b32.xlu0 %v2522_v2, %s1973_s22  ;;  %v720_v8 = vsel %vm679_vm1, %v717_v43, %v719_v60  ;;  %v643_v7 = vsel %vm604_vm0, %v640_v31, %v642_v3  ;;  %v840_v36 = vsel %vm801_vm2, %v837_v22, %v839_v33  ;;  %v721_v52 = vrot.slane %v2517_v0, 7 }
  0xbb   : > { %3379 = vst [vmem:[#allocation14_spill] sm:$0xff] %v2526_v11  ;;  %v645_v27 = vsel %vm604_vm0, %v642_v3, %v644_v4  ;;  %v842_v20 = vsel %vm801_vm2, %v839_v33, %v841_v50  ;;  %v916_v29 = vsel %vm875_vm3, %v913_v46, %v915_v10  ;;  %v771_v30 = vmin.f32 %v643_v7, %v718_v13  ;;  %v1731_v46 = vld [vmem:[%s2191_s30 + $0x238] sm:$0xff] }
  0xbc   : > { %1058 = vrot.lane.b32.xlu1 %v2526_v11, %s1973_s22  ;;  %v772_v16 = vmin.f32 %v645_v27, %v720_v8  ;;  %v968_v31 = vmin.f32 %v842_v20, %v916_v29  ;;  %v967_v42 = vmin.f32 %v840_v36, %v914_v63  ;;  %v413_v47 = vmin.f32 %v364_v14, %v1706_v19 }
  0xbd   : > { %v795_v12 = vmin.f32 %v2488_v59, %v771_v30  ;;  %v461_v48 = vmin.f32 %v412_v62, %v1729_v18  ;;  %v917_v53 = vrot.slane %v2517_v0, 6  ;;  %v414_v51 = vmin.f32 %v365_v32, %v1707_v23 }
  0xbe   : > { %v796_v49 = vmin.f32 %v459_v39, %v772_v16  ;;  %v462_v55 = vmin.f32 %v413_v47, %v1730_v38  ;;  %v722_v59 = vsel %vm679_vm1, %v719_v60, %v721_v52 }
  0xbf   : > { %v2549_v40 = vmin.f32 %v795_v12, %v967_v42  ;;  %v646_v57 = vrot.slane %v461_v48, 1  ;;  %v723_v22 = vrot.slane %v461_v48, 7  ;;  %v843_v28 = vrot.slane %v461_v48, 2 }
  0xc0   : > { %v2551_v58 = vmin.f32 %v796_v49, %v968_v31  ;;  %v919_v43 = vrot.slane %v461_v48, 6  ;;  %v648_v39 = vrot.slane %v462_v55, 1  ;;  %v845_v1 = vrot.slane %v462_v55, 2 }
  0xc1   : > { %3380 = vst [vmem:[#allocation15_spill] sm:$0xff] %v2549_v40  ;;  %1060 = vrot.lane.b32.xlu0 %v2549_v40, %s1973_s22  ;;  %v724_v62 = vsel %vm679_vm1, %v721_v52, %v723_v22  ;;  %v647_v3 = vsel %vm604_vm0, %v644_v4, %v646_v57  ;;  %v844_v7 = vsel %vm801_vm2, %v841_v50, %v843_v28  ;;  %v725_v29 = vrot.slane %v462_v55, 7 }
  0xc2   : > { %3381 = vst [vmem:[#allocation16_spill] sm:$0xff] %v2551_v58  ;;  %1062 = vrot.lane.b32.xlu1 %v2551_v58, %s1973_s22  ;;  %v920_v33 = vsel %vm875_vm3, %v917_v53, %v919_v43  ;;  %v773_v8 = vmin.f32 %v647_v3, %v722_v59  ;;  %v918_v60 = vsel %vm875_vm3, %v915_v10, %v917_v53  ;;  %v921_v16 = vrot.slane %v462_v55, 6 }
  0xc3   : > { %v649_v13 = vsel %vm604_vm0, %v646_v57, %v648_v39  ;;  %v846_v14 = vsel %vm801_vm2, %v843_v28, %v845_v1  ;;  %v969_v19 = vmin.f32 %v844_v7, %v918_v60  ;;  %v463_v18 = vmin.f32 %v414_v51, %v1731_v46 }
  0xc4   : > { %v774_v27 = vmin.f32 %v649_v13, %v724_v62  ;;  %v970_v20 = vmin.f32 %v846_v14, %v920_v33  ;;  %v797_v4 = vmin.f32 %v2517_v0, %v773_v8  ;;  %v726_v10 = vsel %vm679_vm1, %v723_v22, %v725_v29 }
  0xc5   : > { %v650_v30 = vrot.slane %v463_v18, 1  ;;  %v727_v32 = vrot.slane %v463_v18, 7  ;;  %v847_v23 = vrot.slane %v463_v18, 2  ;;  %v923_v50 = vrot.slane %v463_v18, 6 }
  0xc6   : > { %v798_v31 = vmin.f32 %v461_v48, %v774_v27  ;;  %v2567_v36 = vmin.f32 %v797_v4, %v969_v19 }
  0xc7   : > { %v653_v63 = vsel %vm604_vm0, %v650_v30, %v2215_v25  ;;  %v728_v38 = vsel %vm679_vm1, %v725_v29, %v727_v32  ;;  %v850_v12 = vsel %vm801_vm2, %v847_v23, %v2217_v26  ;;  %v651_v0 = vsel %vm604_vm0, %v648_v39, %v650_v30 }
  0xc8   : > { %3382 = vst [vmem:[#allocation17_spill] sm:$0xff] %v2567_v36  ;;  %v2576_v42 = vmin.f32 %v798_v31, %v970_v20  ;;  %1064 = vrot.lane.b32.xlu0 %v2567_v36, %s1973_s22  ;;  %v776_v47 = vmin.f32 %v653_v63, %v728_v38  ;;  %v924_v48 = vsel %vm875_vm3, %v921_v16, %v923_v50  ;;  %v997_v30 = vlaneseq }
  0xc9   : > { %v775_v49 = vmin.f32 %v651_v0, %v726_v10  ;;  %v972_v52 = vmin.f32 %v850_v12, %v924_v48  ;;  %v848_v53 = vsel %vm801_vm2, %v845_v1, %v847_v23  ;;  %v922_v25 = vsel %vm875_vm3, %v919_v43, %v921_v16 }
  0xca   : > { %3383 = vst [vmem:[#allocation18_spill] sm:$0xff] %v2576_v42  ;;  %1066 = vrot.lane.b32.xlu1 %v2576_v42, %s1973_s22  ;;  %v800_v26 = vmin.f32 %v463_v18, %v776_v47  ;;  %v971_v57 = vmin.f32 %v848_v53, %v922_v25  ;;  %v2719_v16 = vand.u32 127, %v997_v30 }
  0xcb   : > { %v799_v51 = vmin.f32 %v462_v55, %v775_v49 }
  0xcc   : > { %v2585_v22 = vmin.f32 %v800_v26, %v972_v52  ;;  %vm999_vm4 = vcmp.lt.s32.totalorder %v2719_v16, 127  ;;  %vm1120_vm5 = vcmp.ge.s32.totalorder %v2719_v16, 1  ;;  %vm1265_vm6 = vcmp.lt.s32.totalorder %v2719_v16, 126 }
  0xcd   : > { %v2587_v28 = vmin.f32 %v799_v51, %v971_v57  ;;  %vm1362_vm7 = vcmp.ge.s32.totalorder %v2719_v16, 2 }
  0xce   : > { %3384 = vst [vmem:[#allocation19_spill] sm:$0xff] %v2585_v22  ;;  %1070 = vrot.lane.b32.xlu1 %v2585_v22, %s1973_s22 }
  0xcf   : > { %3385 = vst [vmem:[#allocation20_spill] sm:$0xff] %v2587_v28  ;;  %1068 = vrot.lane.b32.xlu0 %v2587_v28, %s1973_s22 }
  0xd2   : > { %1123 = vrot.lane.b32.xlu1 %v2274_v35, %s1974_s8 }
  0xd3   : > { %1121 = vrot.lane.b32.xlu0 %v2258_v15, %s1974_s8 }
  0xd6   : > { %1127 = vrot.lane.b32.xlu1 %v2272_v34, %s1974_s8 }
  0xd7   : > { %1125 = vrot.lane.b32.xlu0 %v2237_v56, %s1974_s8 }
  0xda   : > { %1131 = vrot.lane.b32.xlu1 %v2316_v9, %s1974_s8 }
  0xdb   : > { %1129 = vrot.lane.b32.xlu0 %v2311_v6, %s1974_s8 }
  0xde   : > { %1135 = vrot.lane.b32.xlu1 %v2342_v41, %s1974_s8 }
  0xdf   : > { %1133 = vrot.lane.b32.xlu0 %v2348_v45, %s1974_s8 }
  0xe2   : > { %1139 = vrot.lane.b32.xlu1 %v2388_v24, %s1974_s8 }
  0xe3   : > { %1137 = vrot.lane.b32.xlu0 %v2380_v17, %s1974_s8 }
  0xe6   : > { %1143 = vrot.lane.b32.xlu1 %v2420_v61, %s1974_s8 }
  0xe7   : > { %1141 = vrot.lane.b32.xlu0 %v2414_v54, %s1974_s8 }
  0xea   : > { %1147 = vrot.lane.b32.xlu1 %v2460_v44, %s1974_s8 }
  0xeb   : > { %1145 = vrot.lane.b32.xlu0 %v2452_v37, %s1974_s8 }
  0xee   : > { %1151 = vrot.lane.b32.xlu1 %v2492_v21, %s1974_s8 }
  0xef   : > { %1149 = vrot.lane.b32.xlu0 %v2486_v5, %s1974_s8 }
  0xf2   : > { %1155 = vrot.lane.b32.xlu1 %v2526_v11, %s1974_s8 }
  0xf3   : > { %1153 = vrot.lane.b32.xlu0 %v2522_v2, %s1974_s8 }
  0xf4   : > { %v2619_v43 = vpop.permute.xlu1 %1028 }
  0xf5   : > { %v2763_v25 = vsel %vm999_vm4, %v2619_v43, 1.0 }
  0xf6   : > { %1159 = vrot.lane.b32.xlu1 %v2551_v58, %s1974_s8 }
  0xf7   : > { %1157 = vrot.lane.b32.xlu0 %v2549_v40, %s1974_s8  ;;  %v2617_v55 = vpop.permute.xlu0 %1024 }
  0xf8   : > { %v2738_v38 = vsel %vm999_vm4, %v2617_v55, 1.0 }
  0xfa   : > { %1163 = vrot.lane.b32.xlu1 %v2576_v42, %s1974_s8  ;;  %v2629_v46 = vpop.permute.xlu1 %1030 }
  0xfb   : > { %1161 = vrot.lane.b32.xlu0 %v2567_v36, %s1974_s8  ;;  %v1027_v59 = vpop.permute.xlu0 %1026  ;;  %v2768_v26 = vsel %vm999_vm4, %v2629_v46, 1.0 }
  0xfc   : > { %v2742_v12 = vsel %vm999_vm4, %v1027_v59, 1.0 }
  0xfe   : > { %1167 = vrot.lane.b32.xlu1 %v2585_v22, %s1974_s8 }
  0xff   : > { %1165 = vrot.lane.b32.xlu0 %v2587_v28, %s1974_s8 }
 0x102   : > { %1268 = vrot.lane.b32.xlu1 %v2274_v35, %s1975_s9 }
 0x103   : > { %1266 = vrot.lane.b32.xlu0 %v2258_v15, %s1975_s9  ;;  %v2635_v39 = vpop.permute.xlu0 %1032 }
 0x104   : > { %v2637_v62 = vpop.permute.xlu1 %1034 }
 0x105   : > { %v2789_v30 = vsel %vm999_vm4, %v2637_v62, 1.0 }
 0x106   : > { %1272 = vrot.lane.b32.xlu1 %v2272_v34, %s1975_s9 }
 0x107   : > { %1270 = vrot.lane.b32.xlu0 %v2237_v56, %s1975_s9 }
 0x108   : > { %v2649_v3 = vpop.permute.xlu1 %1038 }
 0x10a   : > { %1276 = vrot.lane.b32.xlu1 %v2316_v9, %s1975_s9  ;;  %v2643_v1 = vpop.permute.xlu0 %1036 }
 0x10b   : > { %1274 = vrot.lane.b32.xlu0 %v2311_v6, %s1975_s9 }
 0x10e   : > { %1280 = vrot.lane.b32.xlu1 %v2342_v41, %s1975_s9 }
 0x10f   : > { %1278 = vrot.lane.b32.xlu0 %v2348_v45, %s1975_s9 }
 0x110   : > { %v2655_v33 = vpop.permute.xlu0 %1040 }
 0x111   : > { %v2657_v8 = vpop.permute.xlu1 %1042 }
 0x112   : > { %1284 = vrot.lane.b32.xlu1 %v2388_v24, %s1975_s9 }
 0x113   : > { %1282 = vrot.lane.b32.xlu0 %v2380_v17, %s1975_s9 }
 0x116   : > { %1288 = vrot.lane.b32.xlu1 %v2420_v61, %s1975_s9 }
 0x117   : > { %1286 = vrot.lane.b32.xlu0 %v2414_v54, %s1975_s9  ;;  %v2663_v7 = vpop.permute.xlu0 %1044 }
 0x118   : > { %v2669_v60 = vpop.permute.xlu1 %1046 }
 0x11a   : > { %1292 = vrot.lane.b32.xlu1 %v2460_v44, %s1975_s9 }
 0x11b   : > { %1290 = vrot.lane.b32.xlu0 %v2452_v37, %s1975_s9 }
 0x11e   : > { %1296 = vrot.lane.b32.xlu1 %v2492_v21, %s1975_s9  ;;  %v2675_v13 = vpop.permute.xlu0 %1048 }
 0x11f   : > { %1294 = vrot.lane.b32.xlu0 %v2486_v5, %s1975_s9  ;;  %v2677_v14 = vpop.permute.xlu1 %1050 }
 0x122   : > { %1300 = vrot.lane.b32.xlu1 %v2526_v11, %s1975_s9 }
 0x123   : > { %1298 = vrot.lane.b32.xlu0 %v2522_v2, %s1975_s9 }
 0x125   : > { %v2683_v19 = vpop.permute.xlu0 %1052 }
 0x126   : > { %1304 = vrot.lane.b32.xlu1 %v2551_v58, %s1975_s9  ;;  %v2689_v18 = vpop.permute.xlu1 %1054 }
 0x127   : > { %1302 = vrot.lane.b32.xlu0 %v2549_v40, %s1975_s9 }
 0x12a   : > { %1308 = vrot.lane.b32.xlu1 %v2576_v42, %s1975_s9 }
 0x12b   : > { %1306 = vrot.lane.b32.xlu0 %v2567_v36, %s1975_s9 }
 0x12c   : > { %v2695_v27 = vpop.permute.xlu0 %1056 }
 0x12e   : > { %1312 = vrot.lane.b32.xlu1 %v2585_v22, %s1975_s9  ;;  %v2697_v20 = vpop.permute.xlu1 %1058 }
 0x12f   : > { %1310 = vrot.lane.b32.xlu0 %v2587_v28, %s1975_s9 }
 0x132   : > { %1365 = vrot.lane.b32.xlu1 %v2274_v35, %s1976_s11 }
 0x133   : > { %1363 = vrot.lane.b32.xlu0 %v2258_v15, %s1976_s11  ;;  %v2703_v4 = vpop.permute.xlu0 %1060 }
 0x134   : > { %v2709_v29 = vpop.permute.xlu1 %1062 }
 0x136   : > { %1369 = vrot.lane.b32.xlu1 %v2272_v34, %s1976_s11 }
 0x137   : > { %1367 = vrot.lane.b32.xlu0 %v2237_v56, %s1976_s11 }
 0x13a   : > { %1373 = vrot.lane.b32.xlu1 %v2316_v9, %s1976_s11  ;;  %v2715_v32 = vpop.permute.xlu0 %1064 }
 0x13b   : > { %1371 = vrot.lane.b32.xlu0 %v2311_v6, %s1976_s11 }
 0x13c   : > { %v2717_v23 = vpop.permute.xlu1 %1066 }
 0x13e   : > { %1377 = vrot.lane.b32.xlu1 %v2342_v41, %s1976_s11 }
 0x13f   : > { %1375 = vrot.lane.b32.xlu0 %v2348_v45, %s1976_s11 }
 0x140   : > { %v2725_v31 = vpop.permute.xlu1 %1070 }
 0x141   : > { %v2727_v50 = vpop.permute.xlu0 %1068 }
 0x142   : > { %1381 = vrot.lane.b32.xlu1 %v2388_v24, %s1976_s11 }
 0x143   : > { %1379 = vrot.lane.b32.xlu0 %v2380_v17, %s1976_s11 }
 0x144   : > { %v1124_v10 = vpop.permute.xlu1 %1123 }
 0x145   : > { %v1122_v63 = vpop.permute.xlu0 %1121  ;;  %v2746_v0 = vsel %vm1120_vm5, %v1124_v10, 1.0  ;;  %v2794_v10 = vsel %vm999_vm4, %v2635_v39, 1.0 }
 0x146   : > { %v2750_v47 = vsel %vm1120_vm5, %v1122_v63, 1.0  ;;  %1385 = vrot.lane.b32.xlu1 %v2420_v61, %s1976_s11 }
 0x147   : > { %1383 = vrot.lane.b32.xlu0 %v2414_v54, %s1976_s11 }
 0x148   : > { %v1128_v52 = vpop.permute.xlu1 %1127 }
 0x149   : > { %v1126_v53 = vpop.permute.xlu0 %1125  ;;  %v2772_v51 = vsel %vm1120_vm5, %v1128_v52, 1.0 }
 0x14a   : > { %v2776_v57 = vsel %vm1120_vm5, %v1126_v53, 1.0  ;;  %1389 = vrot.lane.b32.xlu1 %v2460_v44, %s1976_s11 }
 0x14b   : > { %1387 = vrot.lane.b32.xlu0 %v2452_v37, %s1976_s11 }
 0x14c   : > { %v1132_v59 = vpop.permute.xlu1 %1131 }
 0x14d   : > { %v1130_v46 = vpop.permute.xlu0 %1129  ;;  %v2798_v63 = vsel %vm1120_vm5, %v1132_v59, 1.0  ;;  %v2815_v59 = vsel %vm999_vm4, %v2649_v3, 1.0 }
 0x14e   : > { %v2802_v52 = vsel %vm1120_vm5, %v1130_v46, 1.0  ;;  %1393 = vrot.lane.b32.xlu1 %v2492_v21, %s1976_s11  ;;  %v2820_v46 = vsel %vm999_vm4, %v2643_v1, 1.0 }
 0x14f   : > { %1391 = vrot.lane.b32.xlu0 %v2486_v5, %s1976_s11 }
 0x150   : > { %v1136_v39 = vpop.permute.xlu1 %1135 }
 0x151   : > { %v1134_v43 = vpop.permute.xlu0 %1133  ;;  %v2824_v62 = vsel %vm1120_vm5, %v1136_v39, 1.0  ;;  %v2841_v39 = vsel %vm999_vm4, %v2657_v8, 1.0 }
 0x152   : > { %v2828_v53 = vsel %vm1120_vm5, %v1134_v43, 1.0  ;;  %1397 = vrot.lane.b32.xlu1 %v2526_v11, %s1976_s11  ;;  %v2846_v43 = vsel %vm999_vm4, %v2655_v33, 1.0 }
 0x153   : > { %1395 = vrot.lane.b32.xlu0 %v2522_v2, %s1976_s11 }
 0x154   : > { %v1140_v1 = vpop.permute.xlu1 %1139 }
 0x155   : > { %v1138_v49 = vpop.permute.xlu0 %1137  ;;  %v2850_v3 = vsel %vm1120_vm5, %v1140_v1, 1.0  ;;  %v2867_v1 = vsel %vm999_vm4, %v2669_v60, 1.0 }
 0x156   : > { %v2854_v55 = vsel %vm1120_vm5, %v1138_v49, 1.0  ;;  %1401 = vrot.lane.b32.xlu1 %v2551_v58, %s1976_s11  ;;  %v2872_v49 = vsel %vm999_vm4, %v2663_v7, 1.0 }
 0x157   : > { %1399 = vrot.lane.b32.xlu0 %v2549_v40, %s1976_s11 }
 0x158   : > { %v1144_v33 = vpop.permute.xlu1 %1143 }
 0x159   : > { %v1142_v2 = vpop.permute.xlu0 %1141  ;;  %v2876_v8 = vsel %vm1120_vm5, %v1144_v33, 1.0  ;;  %v2893_v33 = vsel %vm999_vm4, %v2677_v14, 1.0 }
 0x15a   : > { %v2880_v48 = vsel %vm1120_vm5, %v1142_v2, 1.0  ;;  %1405 = vrot.lane.b32.xlu1 %v2576_v42, %s1976_s11  ;;  %v2898_v2 = vsel %vm999_vm4, %v2675_v13, 1.0 }
 0x15b   : > { %1403 = vrot.lane.b32.xlu0 %v2567_v36, %s1976_s11  ;;  %3386 = vst [vmem:[#allocation21_spill] sm:$0xff] %v2898_v2 }
 0x15c   : > { %v1148_v7 = vpop.permute.xlu1 %1147 }
 0x15d   : > { %v1146_v58 = vpop.permute.xlu0 %1145  ;;  %v2902_v60 = vsel %vm1120_vm5, %v1148_v7, 1.0  ;;  %v2919_v7 = vsel %vm999_vm4, %v2689_v18, 1.0 }
 0x15e   : > { %v2906_v40 = vsel %vm1120_vm5, %v1146_v58, 1.0  ;;  %1409 = vrot.lane.b32.xlu1 %v2585_v22, %s1976_s11  ;;  %3388 = vst [vmem:[#allocation23_spill] sm:$0xff] %v2919_v7  ;;  %v2924_v58 = vsel %vm999_vm4, %v2683_v19, 1.0  ;;  %v2941_v19 = vsel %vm999_vm4, %v2697_v20, 1.0 }
 0x15f   : > { %3387 = vst [vmem:[#allocation22_spill] sm:$0xff] %v2906_v40  ;;  %1407 = vrot.lane.b32.xlu0 %v2587_v28, %s1976_s11  ;;  %3389 = vst [vmem:[#allocation24_spill] sm:$0xff] %v2924_v58 }
 0x160   : > { %v1152_v13 = vpop.permute.xlu1 %1151  ;;  %3392 = vst [vmem:[#allocation27_spill] sm:$0xff] %v2941_v19 }
 0x161   : > { %v1150_v42 = vpop.permute.xlu0 %1149  ;;  %v2928_v14 = vsel %vm1120_vm5, %v1152_v13, 1.0  ;;  %v2946_v13 = vsel %vm999_vm4, %v2695_v27, 1.0  ;;  %v2963_v27 = vsel %vm999_vm4, %v2709_v29, 1.0 }
 0x162   : > { %3390 = vst [vmem:[#allocation25_spill] sm:$0xff] %v2928_v14  ;;  %v2932_v36 = vsel %vm1120_vm5, %v1150_v42, 1.0  ;;  %3393 = vst [vmem:[#allocation28_spill] sm:$0xff] %v2946_v13 }
 0x163   : > { %3391 = vst [vmem:[#allocation26_spill] sm:$0xff] %v2932_v36  ;;  %3396 = vst [vmem:[#allocation31_spill] sm:$0xff] %v2963_v27 }
 0x164   : > { %v1156_v22 = vpop.permute.xlu1 %1155 }
 0x165   : > { %v1154_v11 = vpop.permute.xlu0 %1153  ;;  %v2950_v42 = vsel %vm1120_vm5, %v1156_v22, 1.0  ;;  %v2968_v22 = vsel %vm999_vm4, %v2703_v4, 1.0  ;;  %v2985_v4 = vsel %vm999_vm4, %v2717_v23, 1.0 }
 0x166   : > { %3394 = vst [vmem:[#allocation29_spill] sm:$0xff] %v2950_v42  ;;  %v2954_v28 = vsel %vm1120_vm5, %v1154_v11, 1.0  ;;  %3397 = vst [vmem:[#allocation32_spill] sm:$0xff] %v2968_v22 }
 0x167   : > { %3395 = vst [vmem:[#allocation30_spill] sm:$0xff] %v2954_v28  ;;  %3400 = vst [vmem:[#allocation35_spill] sm:$0xff] %v2985_v4 }
 0x168   : > { %v1160_v5 = vpop.permute.xlu1 %1159 }
 0x169   : > { %v1158_v36 = vpop.permute.xlu0 %1157  ;;  %v2972_v11 = vsel %vm1120_vm5, %v1160_v5, 1.0  ;;  %v2990_v5 = vsel %vm999_vm4, %v2715_v32, 1.0  ;;  %v3007_v32 = vsel %vm999_vm4, %v2725_v31, 1.0 }
 0x16a   : > { %3398 = vst [vmem:[#allocation33_spill] sm:$0xff] %v2972_v11  ;;  %v2976_v18 = vsel %vm1120_vm5, %v1158_v36, 1.0  ;;  %3401 = vst [vmem:[#allocation36_spill] sm:$0xff] %v2990_v5 }
 0x16b   : > { %3399 = vst [vmem:[#allocation34_spill] sm:$0xff] %v2976_v18  ;;  %3404 = vst [vmem:[#allocation39_spill] sm:$0xff] %v3007_v32 }
 0x16c   : > { %v1164_v28 = vpop.permute.xlu1 %1163 }
 0x16d   : > { %v1162_v13 = vpop.permute.xlu0 %1161  ;;  %v2994_v36 = vsel %vm1120_vm5, %v1164_v28, 1.0  ;;  %v3012_v28 = vsel %vm999_vm4, %v2727_v50, 1.0 }
 0x16e   : > { %3402 = vst [vmem:[#allocation37_spill] sm:$0xff] %v2994_v36  ;;  %v2998_v20 = vsel %vm1120_vm5, %v1162_v13, 1.0  ;;  %3405 = vst [vmem:[#allocation40_spill] sm:$0xff] %v3012_v28 }
 0x16f   : > { %3403 = vst [vmem:[#allocation38_spill] sm:$0xff] %v2998_v20 }
 0x170   : > { %v1168_v18 = vpop.permute.xlu1 %1167 }
 0x171   : > { %v1166_v22 = vpop.permute.xlu0 %1165  ;;  %v3016_v13 = vsel %vm1120_vm5, %v1168_v18, 1.0 }
 0x172   : > { %3406 = vst [vmem:[#allocation41_spill] sm:$0xff] %v3016_v13  ;;  %v3020_v29 = vsel %vm1120_vm5, %v1166_v22, 1.0 }
 0x173   : > { %3407 = vst [vmem:[#allocation42_spill] sm:$0xff] %v3020_v29 }
 0x174   : > { %v1269_v20 = vpop.permute.xlu1 %1268 }
 0x175   : > { %v1267_v5 = vpop.permute.xlu0 %1266 }
 0x178   : > { %v1273_v36 = vpop.permute.xlu1 %1272 }
 0x179   : > { %v1271_v4 = vpop.permute.xlu0 %1270 }
 0x17c   : > { %v1277_v50 = vpop.permute.xlu1 %1276 }
 0x17d   : > { %v1275_v11 = vpop.permute.xlu0 %1274 }
 0x180   : > { %v3026_v27 = vpop.permute.xlu1 %1280 }
 0x181   : > { %v3028_v18 = vpop.permute.xlu0 %1278 }
 0x184   : > { %v3030_v22 = vpop.permute.xlu1 %1284 }
 0x185   : > { %v3032_v42 = vpop.permute.xlu0 %1282 }
 0x188   : > { %v3034_v23 = vpop.permute.xlu1 %1288 }
 0x189   : > { %v3036_v13 = vpop.permute.xlu0 %1286 }
 0x18c   : > { %v3038_v31 = vpop.permute.xlu1 %1292 }
 0x18d   : > { %v3040_v29 = vpop.permute.xlu0 %1290 }
 0x190   : > { %v3042_v28 = vpop.permute.xlu1 %1296 }
 0x191   : > { %3408 = vst [vmem:[#allocation43_spill] sm:$0xff] %v3042_v28  ;;  %v3044_v32 = vpop.permute.xlu0 %1294 }
 0x192   : > { %3409 = vst [vmem:[#allocation44_spill] sm:$0xff] %v3044_v32  ;;  %v3419_v32 = vmin.f32 %v2738_v38, %v2750_v47  ;;  %v1340_v38 = vsel %vm1265_vm6, %v1271_v4, 1.0 }
 0x194   : > { %v3046_v19 = vpop.permute.xlu1 %1300  ;;  %v1241_v28 = vmin.f32 %v2258_v15, %v3419_v32  ;;  %v3423_v32 = vmin.f32 %v2794_v10, %v2802_v52 }
 0x195   : > { %3410 = vst [vmem:[#allocation45_spill] sm:$0xff] %v3046_v19  ;;  %v3048_v58 = vpop.permute.xlu0 %1298 }
 0x196   : > { %3411 = vst [vmem:[#allocation46_spill] sm:$0xff] %v3048_v58 }
 0x198   : > { %v3050_v21 = vpop.permute.xlu1 %1304 }
 0x199   : > { %3412 = vst [vmem:[#allocation47_spill] sm:$0xff] %v3050_v21  ;;  %v3052_v14 = vpop.permute.xlu0 %1302 }
 0x19a   : > { %3413 = vst [vmem:[#allocation48_spill] sm:$0xff] %v3052_v14  ;;  %v1339_v14 = vsel %vm1265_vm6, %v1269_v20, 1.0 }
 0x19c   : > { %v3055_v7 = vpop.permute.xlu1 %1308 }
 0x19d   : > { %3414 = vst [vmem:[#allocation49_spill] sm:$0xff] %v3055_v7  ;;  %v3057_v37 = vpop.permute.xlu0 %1306  ;;  %v1338_v7 = vsel %vm1265_vm6, %v1267_v5, 1.0 }
 0x19e   : > { %3415 = vst [vmem:[#allocation50_spill] sm:$0xff] %v3057_v37 }
 0x1a0   : > { %v3060_v40 = vpop.permute.xlu1 %1312 }
 0x1a1   : > { %3416 = vst [vmem:[#allocation51_spill] sm:$0xff] %v3060_v40  ;;  %v3062_v2 = vpop.permute.xlu0 %1310 }
 0x1a2   : > { %3417 = vst [vmem:[#allocation52_spill] sm:$0xff] %v3062_v2  ;;  %v3418_v2 = vmin.f32 %v2742_v12, %v2746_v0 }
 0x1a4   : > { %v1366_v58 = vpop.permute.xlu1 %1365  ;;  %v1242_v21 = vmin.f32 %v2274_v35, %v3418_v2  ;;  %v1341_v35 = vsel %vm1265_vm6, %v1273_v36, 1.0 }
 0x1a5   : > { %v1364_v19 = vpop.permute.xlu0 %1363  ;;  %v1436_v37 = vsel %vm1362_vm7, %v1366_v58, 1.0 }
 0x1a6   : > { %v1435_v40 = vsel %vm1362_vm7, %v1364_v19, 1.0  ;;  %v1460_v20 = vmin.f32 %v1339_v14, %v1436_v37 }
 0x1a7   : > { %v1459_v44 = vmin.f32 %v1338_v7, %v1435_v40  ;;  %v3420_v40 = vmin.f32 %v2768_v26, %v2772_v51  ;;  %v1343_v26 = vsel %vm1265_vm6, %v1277_v50, 1.0  ;;  %v3422_v51 = vmin.f32 %v2789_v30, %v2798_v63 }
 0x1a8   : > { %v1484_v58 = vmin.f32 %v1242_v21, %v1460_v20  ;;  %v1370_v5 = vpop.permute.xlu1 %1369  ;;  %v1345_v30 = vsel %vm1265_vm6, %v3026_v27, 1.0  ;;  %v3424_v63 = vmin.f32 %v2815_v59, %v2824_v62  ;;  %v1347_v62 = vsel %vm1265_vm6, %v3030_v22, 1.0 }
 0x1a9   : > { %v1483_v19 = vmin.f32 %v1241_v28, %v1459_v44  ;;  %v1368_v12 = vpop.permute.xlu0 %1367  ;;  %v1438_v15 = vsel %vm1362_vm7, %v1370_v5, 1.0  ;;  %v1244_v21 = vmin.f32 %v2272_v34, %v3420_v40  ;;  %v3421_v44 = vmin.f32 %v2763_v25, %v2776_v57 }
 0x1aa   : > { %v1437_v37 = vsel %vm1362_vm7, %v1368_v12, 1.0  ;;  %1508 = vst [vmem:[%s3085_s4 + $0x8] sm:$0xff] %v1484_v58  ;;  %v1462_v47 = vmin.f32 %v1341_v35, %v1438_v15  ;;  %v1342_v34 = vsel %vm1265_vm6, %v1275_v11, 1.0  ;;  %v1246_v57 = vmin.f32 %v2316_v9, %v3422_v51  ;;  %v3432_v51 = vld [vmem:[#allocation21_spill] sm:$0xff] }
 0x1ab   : > { %v1243_v0 = vmin.f32 %v2237_v56, %v3421_v44  ;;  %1507 = vst [vmem:[%s3085_s4] sm:$0xff] %v1483_v19  ;;  %v1461_v2 = vmin.f32 %v1340_v38, %v1437_v37  ;;  %v1245_v28 = vmin.f32 %v2311_v6, %v3423_v32  ;;  %v1344_v9 = vsel %vm1265_vm6, %v3028_v18, 1.0 }
 0x1ac   : > { %v1486_v14 = vmin.f32 %v1244_v21, %v1462_v47  ;;  %v1374_v4 = vpop.permute.xlu1 %1373  ;;  %v1248_v52 = vmin.f32 %v2342_v41, %v3424_v63  ;;  %v3425_v12 = vmin.f32 %v2820_v46, %v2828_v53  ;;  %v1346_v41 = vsel %vm1265_vm6, %v3032_v42, 1.0  ;;  %v3439_v63 = vld [vmem:[#allocation25_spill] sm:$0xff] }
 0x1ad   : > { %v1485_v7 = vmin.f32 %v1243_v0, %v1461_v2  ;;  %v1372_v36 = vpop.permute.xlu0 %1371  ;;  %v1440_v25 = vsel %vm1362_vm7, %v1374_v4, 1.0  ;;  %v3426_v59 = vmin.f32 %v2841_v39, %v2850_v3  ;;  %v3427_v21 = vmin.f32 %v2846_v43, %v2854_v55 }
 0x1ae   : > { %v1439_v56 = vsel %vm1362_vm7, %v1372_v36, 1.0  ;;  %1510 = vst [vmem:[%s3085_s4 + $0x18] sm:$0xff] %v1486_v14  ;;  %v1464_v11 = vmin.f32 %v1343_v26, %v1440_v25  ;;  %v1247_v27 = vmin.f32 %v2348_v45, %v3425_v12  ;;  %v1349_v3 = vsel %vm1265_vm6, %v3034_v23, 1.0  ;;  %v3441_v12 = vld [vmem:[#allocation12_spill] sm:$0xff] }
 0x1af   : > { %1509 = vst [vmem:[%s3085_s4 + $0x10] sm:$0xff] %v1485_v7  ;;  %v1463_v50 = vmin.f32 %v1342_v34, %v1439_v56  ;;  %v1250_v46 = vmin.f32 %v2388_v24, %v3426_v59  ;;  %v1249_v22 = vmin.f32 %v2380_v17, %v3427_v21  ;;  %v1348_v24 = vsel %vm1265_vm6, %v3036_v13, 1.0 }
 0x1b0   : > { %v1488_v20 = vmin.f32 %v1246_v57, %v1464_v11  ;;  %v1378_v19 = vpop.permute.xlu1 %1377  ;;  %v3428_v39 = vmin.f32 %v2867_v1, %v2876_v8  ;;  %v3429_v7 = vmin.f32 %v2872_v49, %v2880_v48  ;;  %v1351_v8 = vsel %vm1265_vm6, %v3038_v31, 1.0  ;;  %v3431_v49 = vld [vmem:[#allocation10_spill] sm:$0xff] }
 0x1b1   : > { %v1487_v58 = vmin.f32 %v1245_v28, %v1463_v50  ;;  %v1376_v5 = vpop.permute.xlu0 %1375  ;;  %v1442_v6 = vsel %vm1362_vm7, %v1378_v19, 1.0  ;;  %v3430_v1 = vmin.f32 %v2893_v33, %v2902_v60  ;;  %v3433_v57 = vld [vmem:[#allocation22_spill] sm:$0xff]  ;;  %v3435_v28 = vld [vmem:[#allocation9_spill] sm:$0xff]  ;;  %v3437_v33 = vld [vmem:[#allocation44_spill] sm:$0xff] }
 0x1b2   : > { %v1441_v10 = vsel %vm1362_vm7, %v1376_v5, 1.0  ;;  %1512 = vst [vmem:[%s3085_s4 + $0x28] sm:$0xff] %v1488_v20  ;;  %v1466_v18 = vmin.f32 %v1345_v30, %v1442_v6  ;;  %v1252_v43 = vmin.f32 %v2420_v61, %v3428_v39  ;;  %v1251_v23 = vmin.f32 %v2414_v54, %v3429_v7  ;;  %v3436_v5 = vld [vmem:[#allocation43_spill] sm:$0xff] }
 0x1b3   : > { %1511 = vst [vmem:[%s3085_s4 + $0x20] sm:$0xff] %v1487_v58  ;;  %v1465_v35 = vmin.f32 %v1344_v9, %v1441_v10  ;;  %v1350_v61 = vsel %vm1265_vm6, %v3040_v29, 1.0  ;;  %v1254_v56 = vmin.f32 %v3431_v49, %v3430_v1  ;;  %v3434_v32 = vmin.f32 %v3432_v51, %v3433_v57  ;;  %v3438_v10 = vld [vmem:[#allocation23_spill] sm:$0xff]  ;;  %v3461_v57 = vld [vmem:[#allocation16_spill] sm:$0xff] }
 0x1b4   : > { %v1490_v38 = vmin.f32 %v1248_v52, %v1466_v18  ;;  %v1382_v37 = vpop.permute.xlu1 %1381  ;;  %v1353_v60 = vsel %vm1265_vm6, %v3436_v5, 1.0  ;;  %v1352_v30 = vsel %vm1265_vm6, %v3437_v33, 1.0  ;;  %v3440_v52 = vmin.f32 %v3438_v10, %v3439_v63  ;;  %v3442_v18 = vld [vmem:[#allocation24_spill] sm:$0xff]  ;;  %v3458_v49 = vld [vmem:[#allocation31_spill] sm:$0xff] }
 0x1b5   : > { %v1489_v15 = vmin.f32 %v1247_v27, %v1465_v35  ;;  %v1380_v40 = vpop.permute.xlu0 %1379  ;;  %v1444_v45 = vsel %vm1362_vm7, %v1382_v37, 1.0  ;;  %v1253_v31 = vmin.f32 %v3435_v28, %v3434_v32  ;;  %v3443_v35 = vld [vmem:[#allocation26_spill] sm:$0xff]  ;;  %v3462_v28 = vld [vmem:[#allocation32_spill] sm:$0xff] }
 0x1b6   : > { %v1443_v53 = vsel %vm1362_vm7, %v1380_v40, 1.0  ;;  %1514 = vst [vmem:[%s3085_s4 + $0x38] sm:$0xff] %v1490_v38  ;;  %v1468_v42 = vmin.f32 %v1347_v62, %v1444_v45  ;;  %v1256_v27 = vmin.f32 %v3441_v12, %v3440_v52  ;;  %v3444_v38 = vmin.f32 %v3442_v18, %v3443_v35  ;;  %v3468_v12 = vld [vmem:[#allocation35_spill] sm:$0xff]  ;;  %v3471_v35 = vld [vmem:[#allocation18_spill] sm:$0xff] }
 0x1b7   : > { %1513 = vst [vmem:[%s3085_s4 + $0x30] sm:$0xff] %v1489_v15  ;;  %v1467_v44 = vmin.f32 %v1346_v41, %v1443_v53  ;;  %v3445_v15 = vld [vmem:[#allocation11_spill] sm:$0xff] }
 0x1b8   : > { %v1492_v0 = vmin.f32 %v1250_v46, %v1468_v42  ;;  %v1386_v2 = vpop.permute.xlu1 %1385  ;;  %v1255_v37 = vmin.f32 %v3445_v15, %v3444_v38  ;;  %v3446_v46 = vld [vmem:[#allocation45_spill] sm:$0xff]  ;;  %v3472_v15 = vld [vmem:[#allocation36_spill] sm:$0xff] }
 0x1b9   : > { %v1491_v47 = vmin.f32 %v1249_v22, %v1467_v44  ;;  %v1384_v14 = vpop.permute.xlu0 %1383  ;;  %v1446_v17 = vsel %vm1362_vm7, %v1386_v2, 1.0  ;;  %v1355_v21 = vsel %vm1265_vm6, %v3446_v46, 1.0  ;;  %v3447_v22 = vld [vmem:[#allocation46_spill] sm:$0xff]  ;;  %v3449_v2 = vld [vmem:[#allocation29_spill] sm:$0xff] }
 0x1ba   : > { %v1445_v55 = vsel %vm1362_vm7, %v1384_v14, 1.0  ;;  %1516 = vst [vmem:[%s3085_s4 + $0x48] sm:$0xff] %v1492_v0  ;;  %v1470_v13 = vmin.f32 %v1349_v3, %v1446_v17  ;;  %v1354_v42 = vsel %vm1265_vm6, %v3447_v22, 1.0  ;;  %v3451_v3 = vld [vmem:[#allocation14_spill] sm:$0xff]  ;;  %v3452_v17 = vld [vmem:[#allocation28_spill] sm:$0xff] }
 0x1bb   : > { %1515 = vst [vmem:[%s3085_s4 + $0x40] sm:$0xff] %v1491_v47  ;;  %v1469_v4 = vmin.f32 %v1348_v24, %v1445_v55  ;;  %v3448_v47 = vld [vmem:[#allocation27_spill] sm:$0xff]  ;;  %v3453_v55 = vld [vmem:[#allocation30_spill] sm:$0xff] }
 0x1bc   : > { %v1494_v36 = vmin.f32 %v1252_v43, %v1470_v13  ;;  %v1390_v34 = vpop.permute.xlu1 %1389  ;;  %v3450_v14 = vmin.f32 %v3448_v47, %v3449_v2  ;;  %v3454_v39 = vmin.f32 %v3452_v17, %v3453_v55  ;;  %v3455_v43 = vld [vmem:[#allocation13_spill] sm:$0xff]  ;;  %v3481_v55 = vld [vmem:[#allocation19_spill] sm:$0xff] }
 0x1bd   : > { %v1493_v26 = vmin.f32 %v1251_v23, %v1469_v4  ;;  %v1388_v25 = vpop.permute.xlu0 %1387  ;;  %v1448_v54 = vsel %vm1362_vm7, %v1390_v34, 1.0 }
 0x1be   : > { %v1447_v48 = vsel %vm1362_vm7, %v1388_v25, 1.0  ;;  %1518 = vst [vmem:[%s3085_s4 + $0x58] sm:$0xff] %v1494_v36  ;;  %v1472_v29 = vmin.f32 %v1351_v8, %v1448_v54  ;;  %v1258_v24 = vmin.f32 %v3451_v3, %v3450_v14  ;;  %v1257_v7 = vmin.f32 %v3455_v43, %v3454_v39  ;;  %v3456_v25 = vld [vmem:[#allocation47_spill] sm:$0xff]  ;;  %v3482_v43 = vld [vmem:[#allocation40_spill] sm:$0xff] }
 0x1bf   : > { %1517 = vst [vmem:[%s3085_s4 + $0x50] sm:$0xff] %v1493_v26  ;;  %v1471_v11 = vmin.f32 %v1350_v61, %v1447_v48  ;;  %v1357_v8 = vsel %vm1265_vm6, %v3456_v25, 1.0  ;;  %v3457_v61 = vld [vmem:[#allocation48_spill] sm:$0xff]  ;;  %v3478_v3 = vld [vmem:[#allocation39_spill] sm:$0xff] }
 0x1c0   : > { %v1496_v50 = vmin.f32 %v1254_v56, %v1472_v29  ;;  %v1394_v58 = vpop.permute.xlu1 %1393  ;;  %v1356_v54 = vsel %vm1265_vm6, %v3457_v61, 1.0  ;;  %v3459_v56 = vld [vmem:[#allocation33_spill] sm:$0xff] }
 0x1c1   : > { %v1495_v20 = vmin.f32 %v1253_v31, %v1471_v11  ;;  %v1392_v19 = vpop.permute.xlu0 %1391  ;;  %v1450_v9 = vsel %vm1362_vm7, %v1394_v58, 1.0  ;;  %v3460_v51 = vmin.f32 %v3458_v49, %v3459_v56  ;;  %v3463_v31 = vld [vmem:[#allocation34_spill] sm:$0xff]  ;;  %v3465_v11 = vld [vmem:[#allocation15_spill] sm:$0xff] }
 0x1c2   : > { %v1449_v6 = vsel %vm1362_vm7, %v1392_v19, 1.0  ;;  %1520 = vst [vmem:[%s3085_s4 + $0x68] sm:$0xff] %v1496_v50  ;;  %v1474_v40 = vmin.f32 %v1353_v60, %v1450_v9  ;;  %v3464_v29 = vmin.f32 %v3462_v28, %v3463_v31 }
 0x1c3   : > { %1519 = vst [vmem:[%s3085_s4 + $0x60] sm:$0xff] %v1495_v20  ;;  %v1473_v62 = vmin.f32 %v1352_v30, %v1449_v6  ;;  %v1260_v32 = vmin.f32 %v3461_v57, %v3460_v51  ;;  %v3466_v30 = vld [vmem:[#allocation49_spill] sm:$0xff]  ;;  %v3467_v6 = vld [vmem:[#allocation50_spill] sm:$0xff] }
 0x1c4   : > { %v1498_v41 = vmin.f32 %v1256_v27, %v1474_v40  ;;  %v1398_v53 = vpop.permute.xlu1 %1397  ;;  %v1259_v50 = vmin.f32 %v3465_v11, %v3464_v29  ;;  %v1359_v9 = vsel %vm1265_vm6, %v3466_v30, 1.0  ;;  %v1358_v10 = vsel %vm1265_vm6, %v3467_v6, 1.0  ;;  %v3469_v27 = vld [vmem:[#allocation37_spill] sm:$0xff] }
 0x1c5   : > { %v1497_v45 = vmin.f32 %v1255_v37, %v1473_v62  ;;  %v1396_v59 = vpop.permute.xlu0 %1395  ;;  %v1452_v44 = vsel %vm1362_vm7, %v1398_v53, 1.0  ;;  %v3470_v18 = vmin.f32 %v3468_v12, %v3469_v27  ;;  %v3473_v37 = vld [vmem:[#allocation38_spill] sm:$0xff]  ;;  %v3475_v62 = vld [vmem:[#allocation17_spill] sm:$0xff] }
 0x1c6   : > { %v1451_v0 = vsel %vm1362_vm7, %v1396_v59, 1.0  ;;  %1522 = vst [vmem:[%s3085_s4 + $0x78] sm:$0xff] %v1498_v41  ;;  %v1476_v23 = vmin.f32 %v1355_v21, %v1452_v44  ;;  %v3474_v40 = vmin.f32 %v3472_v15, %v3473_v37 }
 0x1c7   : > { %1521 = vst [vmem:[%s3085_s4 + $0x70] sm:$0xff] %v1497_v45  ;;  %v1475_v13 = vmin.f32 %v1354_v42, %v1451_v0  ;;  %v1262_v38 = vmin.f32 %v3471_v35, %v3470_v18  ;;  %v3476_v42 = vld [vmem:[#allocation51_spill] sm:$0xff]  ;;  %v3477_v0 = vld [vmem:[#allocation52_spill] sm:$0xff] }
 0x1c8   : > { %v1500_v4 = vmin.f32 %v1258_v24, %v1476_v23  ;;  %v1402_v26 = vpop.permute.xlu1 %1401  ;;  %v1261_v41 = vmin.f32 %v3475_v62, %v3474_v40  ;;  %v1361_v44 = vsel %vm1265_vm6, %v3476_v42, 1.0  ;;  %v1360_v47 = vsel %vm1265_vm6, %v3477_v0, 1.0  ;;  %v3479_v24 = vld [vmem:[#allocation41_spill] sm:$0xff] }
 0x1c9   : > { %v1499_v36 = vmin.f32 %v1257_v7, %v1475_v13  ;;  %v1400_v34 = vpop.permute.xlu0 %1399  ;;  %v1454_v48 = vsel %vm1362_vm7, %v1402_v26, 1.0  ;;  %v3480_v17 = vmin.f32 %v3478_v3, %v3479_v24  ;;  %v3483_v7 = vld [vmem:[#allocation42_spill] sm:$0xff]  ;;  %v3485_v13 = vld [vmem:[#allocation20_spill] sm:$0xff] }
 0x1ca   : > { %v1453_v1 = vsel %vm1362_vm7, %v1400_v34, 1.0  ;;  %1524 = vst [vmem:[%s3085_s4 + $0x88] sm:$0xff] %v1500_v4  ;;  %v1478_v20 = vmin.f32 %v1357_v8, %v1454_v48  ;;  %v3484_v23 = vmin.f32 %v3482_v43, %v3483_v7 }
 0x1cb   : > { %1523 = vst [vmem:[%s3085_s4 + $0x80] sm:$0xff] %v1499_v36  ;;  %v1477_v58 = vmin.f32 %v1356_v54, %v1453_v1  ;;  %v1264_v39 = vmin.f32 %v3481_v55, %v3480_v17 }
 0x1cc   : > { %v1502_v19 = vmin.f32 %v1260_v32, %v1478_v20  ;;  %v1406_v60 = vpop.permute.xlu1 %1405  ;;  %v1263_v4 = vmin.f32 %v3485_v13, %v3484_v23 }
 0x1cd   : > { %v1501_v5 = vmin.f32 %v1259_v50, %v1477_v58  ;;  %v1404_v33 = vpop.permute.xlu0 %1403  ;;  %v1456_v63 = vsel %vm1362_vm7, %v1406_v60, 1.0 }
 0x1ce   : > { %v1455_v52 = vsel %vm1362_vm7, %v1404_v33, 1.0  ;;  %1526 = vst [vmem:[%s3085_s4 + $0x98] sm:$0xff] %v1502_v19  ;;  %v1480_v45 = vmin.f32 %v1359_v9, %v1456_v63 }
 0x1cf   : > { %1525 = vst [vmem:[%s3085_s4 + $0x90] sm:$0xff] %v1501_v5  ;;  %v1479_v53 = vmin.f32 %v1358_v10, %v1455_v52 }
 0x1d0   : > { %v1504_v59 = vmin.f32 %v1262_v38, %v1480_v45  ;;  %v1410_v21 = vpop.permute.xlu1 %1409 }
 0x1d1   : > { %v1503_v46 = vmin.f32 %v1261_v41, %v1479_v53  ;;  %v1408_v22 = vpop.permute.xlu0 %1407  ;;  %v1458_v2 = vsel %vm1362_vm7, %v1410_v21, 1.0 }
 0x1d2   : > { %v1457_v14 = vsel %vm1362_vm7, %v1408_v22, 1.0  ;;  %1528 = vst [vmem:[%s3085_s4 + $0xa8] sm:$0xff] %v1504_v59  ;;  %v1482_v36 = vmin.f32 %v1361_v44, %v1458_v2 }
 0x1d3   : > { %1527 = vst [vmem:[%s3085_s4 + $0xa0] sm:$0xff] %v1503_v46  ;;  %v1481_v26 = vmin.f32 %v1360_v47, %v1457_v14 }
 0x1d4   : > { %v1506_v34 = vmin.f32 %v1264_v39, %v1482_v36 }
 0x1d5   : > { %v1505_v25 = vmin.f32 %v1263_v4, %v1481_v26 }
 0x1d6   : > { %1530 = vst [vmem:[%s3085_s4 + $0xb8] sm:$0xff] %v1506_v34 }
 0x1d7   : > { %1529 = vst [vmem:[%s3085_s4 + $0xb0] sm:$0xff] %v1505_v25 }
 0x1d8 PF: > { %s19_s17 = sadd.s32 1, %s1964_s17   ;;  %s3486_s12 = smov %s1948_s13 }
 0x1d9   : > { %p16_p3 = scmp.ge.s32.totalorder %s19_s17, 4   ;;  %s3487_s13 = smov %s1952_s14 }
 0x1da   : > { %s3488_s14 = smov %s2044_s23  ;;  %s3489_s15 = smov %s1960_s16 }
 0x1db   : > { %s3490_s16 = smov %s3492_s19  ;;  %18 = sbr.rel (!%p16_p3) target bundleno = 8 (0x8), region = 102 }
 0x1e2   :  { %1561 = vsyncpa [#allocation3], 1 }
 0x1e3   :  { %1563 = vsyncpa [#allocation3 + $0x1], 1 }
 0x1e4   :  { %1564 = vsyncpa [#allocation5], 1 }
 0x1e5   :  { %1566 = vsyncpa [#allocation5 + $0x1], 1 }

// kernel: cr_loss.3
= control target key start
LH: loop header
LB: loop body
LE: loop exit
PB: predicated region body
PF: predicated region fallthrough
CT: control target
= control target key end

     0   :  { %8 = vsyncpa [#allocation4], 0  ;;  %s2091_s12 = smov 0   ;;  %s2093_s13 = smov 0   ;;  %s4905_s0 = inlined_call_operand.vmem [shape: f32[2,3], index: 0, kind: input, shape index: {}]   ;;  %s4906_s1 = inlined_call_operand.vmem [shape: f32[2,3,192,128], index: 1, kind: input, shape index: {}]   ;;  %s4907_s2 = inlined_call_operand.vmem [shape: f32[2,3,192,128], index: 2, kind: input, shape index: {}]   ;;  %s4908_s3 = inlined_call_operand.vmem [shape: f32[2,8,128], index: 3, kind: output, shape index: {}]  }
   0x1   :  { %s2095_s14 = smov 0  }
   0x2 LB: > { %s1690_s15 = sadd.s32 4294967295, %s2068_s14   ;;  %s26_s16 = sadd.s32 1, %s2064_s13  ;;  %s2068_s14 = sphi %s2095_s14, %s14_s14   ;;  %s2064_s13 = sphi %s2093_s13, %s6192_s13   ;;  %s2060_s12 = sphi %s2091_s12, %s6191_s12  }
   0x3   : > { %p28_p0 = scmp.ge.s32.totalorder %s26_s16, 2  ;;  %p1692_p1 = scmp.ge.s32.totalorder %s2068_s14, 1 }
   0x4   : > { %p134_p2 = scmp.lt.s32.totalorder %s2068_s14, 3  ;;  %p2116_p4 = scmp.eq.s32.totalorder %s1690_s15, 0 }
   0x5   : > { %s6194_s16 = smov (%p28_p0, %s26_s16), 0  ;;  %s147_s21 = sshll.u32 %s4905_s0, 4  ;;  %s148_s21 = int_to_ptr.vmem [resolvable:$true] %s147_s21 }
   0x6   : > { %p2112_p3 = pnand %p1692_p1, %p134_p2  ;;  %s2027_s22 = scalar_lea.vmem %s148_s21, 32 }
   0x7   : > { %p2028_p7 = scmp.ne.s32.totalorder %s148_s21, %s2027_s22  ;;  %p2035_p11 = scmp.lt.s32.totalorder %s148_s21, %s148_s21 }
   0x8   : > { %p1804_p5 = pneg %p2112_p3  ;;  %p2036_p12 = scmp.lt.s32.totalorder %s2027_s22, %s2027_s22 }
   0xa   : > { %p1805_p6 = pnand %p2116_p4, %p1804_p5  ;;  %p2037_p13 = por %p2036_p12, %p2035_p11 }
   0xc   : > { %p2029_p8 = pneg %p1805_p6 }
   0xe   : > { %p2030_p9 = pnand %p2029_p8, %p2028_p7 }
  0x10   : > { %p2031_p10 = pneg %p2030_p9 }
  0x12   : > { %p2038_p0 = pnand %p2037_p13, %p2031_p10 }
  0x14   : > { %2041 = shalt.err (!%p2038_p0)
}
  0x15   : > { %s2070_s23 = smov [#allocation3]   ;;  %186 = sbr.rel (%p2112_p3) target bundleno = 416 (0x1a0), region = 32 }
  0x16   : > { %1807 = dma.vmem_to_smem (!%p1805_p6), %s148_s21, 32, %s2070_s23, [#allocation4]  }
  0x1c   : > { %2055 = dma.done.wait (%p2116_p4), [#allocation4], 32  }
  0x1d   : > { %2057 = vsyncadd (%p2116_p4), [#allocation4], 4294967264 }
  0x1e   : > { %192 = sfence }
  0x1f   : > { %p224_p1 = scmp.lt.s32.totalorder %s2060_s12, 1  ;;  %s1796_s25 = sshll.u32 %s2060_s12, 7 }
  0x20   : > { %s594_s27 = sadd.s32 1, %s1796_s25  ;;  %s596_s28 = sadd.s32 2, %s1796_s25 }
  0x21   : > { %s2135_s24 = scalar_select %p224_p1, %s2060_s12, 1 }
  0x22   : > { %s2146_s5 = sld [smem:[#allocation3 + %s1796_s25]] }
  0x23   : > { %s1799_s26 = smul.u32 576, %s2135_s24  ;;  %s2148_s6 = sld [smem:[#allocation3 + %s594_s27]] }
  0x24   : > { %s2150_s7 = sld [smem:[#allocation3 + %s596_s28]]  ;;  %s1699_s11 = sshll.u32 %s2135_s24, 3 }
  0x25   : > { %s2144_s4 = scalar_lea.vmem %s4906_s1, %s1799_s26  ;;  %s2412_s10 = scalar_lea.vmem %s4907_s2, %s1799_s26 }
  0x26   : > { %v2153_v0 = vld [vmem:[%s2144_s4] sm:$0xff]  ;;  %v2156_v1 = vld [vmem:[%s2144_s4 + $0x8] sm:$0xff]  ;;  %v2162_v3 = vld [vmem:[%s2144_s4 + $0x10] sm:$0xff]  ;;  %s246_s17 = scalar_lea.vmem %s4908_s3, %s1699_s11 }
  0x27   : > { %v2159_v2 = vld [vmem:[%s2144_s4 + $0xc0] sm:$0xff]  ;;  %v2165_v4 = vld [vmem:[%s2144_s4 + $0x18] sm:$0xff]  ;;  %v2168_v5 = vld [vmem:[%s2144_s4 + $0xc8] sm:$0xff] }
  0x28   : > { %5271 = vst [vmem:[#allocation6_spill] sm:$0xff] %v2159_v2  ;;  %5272 = vst [vmem:[#allocation7_spill] sm:$0xff] %v2168_v5  ;;  %v2171_v6 = vld [vmem:[%s2144_s4 + $0x20] sm:$0xff]  ;;  %v2174_v7 = vld [vmem:[%s2144_s4 + $0x28] sm:$0xff]  ;;  %v400_v16 = vadd.f32 %v2159_v2, %v2153_v0  ;;  %v401_v23 = vadd.f32 %v2168_v5, %v2156_v1  ;;  %v2243_v31 = vstv %s2146_s5 }
  0x29   : > { %v2177_v8 = vld [vmem:[%s2144_s4 + $0xd0] sm:$0xff]  ;;  %v2180_v9 = vld [vmem:[%s2144_s4 + $0xd8] sm:$0xff]  ;;  %v2189_v12 = vld [vmem:[%s2144_s4 + $0x40] sm:$0xff]  ;;  %5291 = vst [vmem:[#allocation26_spill] sm:$0xff] %v2243_v31  ;;  %v2263_v38 = vstv %s2148_s6 }
  0x2a   : > { %5273 = vst [vmem:[#allocation8_spill] sm:$0xff] %v2177_v8  ;;  %5274 = vst [vmem:[#allocation9_spill] sm:$0xff] %v2180_v9  ;;  %v2183_v10 = vld [vmem:[%s2144_s4 + $0x30] sm:$0xff]  ;;  %v2186_v11 = vld [vmem:[%s2144_s4 + $0x38] sm:$0xff]  ;;  %v402_v30 = vadd.f32 %v2177_v8, %v2162_v3  ;;  %v403_v37 = vadd.f32 %v2180_v9, %v2165_v4  ;;  %v2286_v47 = vstv %s2150_s7 }
  0x2b   : > { %5275 = vst [vmem:[#allocation10_spill] sm:$0xff] %v2189_v12  ;;  %v2192_v13 = vld [vmem:[%s2144_s4 + $0xe0] sm:$0xff]  ;;  %v2195_v14 = vld [vmem:[%s2144_s4 + $0xe8] sm:$0xff]  ;;  %v2198_v15 = vld [vmem:[%s2144_s4 + $0xf0] sm:$0xff] }
  0x2c   : > { %5276 = vst [vmem:[#allocation11_spill] sm:$0xff] %v2192_v13  ;;  %5277 = vst [vmem:[#allocation12_spill] sm:$0xff] %v2195_v14  ;;  %v2203_v17 = vld [vmem:[%s2144_s4 + $0x48] sm:$0xff]  ;;  %v2206_v18 = vld [vmem:[%s2144_s4 + $0x50] sm:$0xff]  ;;  %v404_v44 = vadd.f32 %v2192_v13, %v2171_v6  ;;  %v405_v45 = vadd.f32 %v2195_v14, %v2174_v7  ;;  %v406_v53 = vadd.f32 %v2198_v15, %v2183_v10 }
  0x2d   : > { %5278 = vst [vmem:[#allocation13_spill] sm:$0xff] %v2198_v15  ;;  %5279 = vst [vmem:[#allocation14_spill] sm:$0xff] %v2203_v17  ;;  %v2209_v19 = vld [vmem:[%s2144_s4 + $0x58] sm:$0xff]  ;;  %v2215_v21 = vld [vmem:[%s2144_s4 + $0x100] sm:$0xff] }
  0x2e   : > { %5280 = vst [vmem:[#allocation15_spill] sm:$0xff] %v2206_v18  ;;  %5281 = vst [vmem:[#allocation16_spill] sm:$0xff] %v2209_v19  ;;  %v2212_v20 = vld [vmem:[%s2144_s4 + $0xf8] sm:$0xff]  ;;  %v2218_v22 = vld [vmem:[%s2144_s4 + $0x180] sm:$0xff]  ;;  %v408_v55 = vadd.f32 %v2215_v21, %v2189_v12 }
  0x2f   : > { %5282 = vst [vmem:[#allocation17_spill] sm:$0xff] %v2212_v20  ;;  %5283 = vst [vmem:[#allocation18_spill] sm:$0xff] %v2215_v21  ;;  %v2223_v24 = vld [vmem:[%s2144_s4 + $0x60] sm:$0xff]  ;;  %v2226_v25 = vld [vmem:[%s2144_s4 + $0x68] sm:$0xff]  ;;  %v424_v46 = vadd.f32 %v2218_v22, %v400_v16  ;;  %v407_v54 = vadd.f32 %v2212_v20, %v2186_v11 }
  0x30   : > { %5284 = vst [vmem:[#allocation19_spill] sm:$0xff] %v2218_v22  ;;  %5285 = vst [vmem:[#allocation20_spill] sm:$0xff] %v2223_v24  ;;  %v2229_v26 = vld [vmem:[%s2144_s4 + $0x70] sm:$0xff]  ;;  %v2232_v27 = vld [vmem:[%s2144_s4 + $0x108] sm:$0xff] }
  0x31   : > { %5286 = vst [vmem:[#allocation21_spill] sm:$0xff] %v2226_v25  ;;  %5287 = vst [vmem:[#allocation22_spill] sm:$0xff] %v2229_v26  ;;  %v2235_v28 = vld [vmem:[%s2144_s4 + $0x110] sm:$0xff]  ;;  %v2238_v29 = vld [vmem:[%s2144_s4 + $0x188] sm:$0xff]  ;;  %v409_v62 = vadd.f32 %v2232_v27, %v2203_v17 }
  0x32   : > { %5288 = vst [vmem:[#allocation23_spill] sm:$0xff] %v2232_v27  ;;  %5289 = vst [vmem:[#allocation24_spill] sm:$0xff] %v2235_v28  ;;  %v2246_v32 = vld [vmem:[%s2144_s4 + $0x78] sm:$0xff]  ;;  %v2249_v33 = vld [vmem:[%s2144_s4 + $0x80] sm:$0xff]  ;;  %v425_v56 = vadd.f32 %v2238_v29, %v401_v23  ;;  %v410_v63 = vadd.f32 %v2235_v28, %v2206_v18 }
  0x33   : > { %5290 = vst [vmem:[#allocation25_spill] sm:$0xff] %v2238_v29  ;;  %5292 = vst [vmem:[#allocation27_spill] sm:$0xff] %v2246_v32  ;;  %v2252_v34 = vld [vmem:[%s2144_s4 + $0x118] sm:$0xff]  ;;  %v2255_v35 = vld [vmem:[%s2144_s4 + $0x120] sm:$0xff] }
  0x34   : > { %5293 = vst [vmem:[#allocation28_spill] sm:$0xff] %v2249_v33  ;;  %5294 = vst [vmem:[#allocation29_spill] sm:$0xff] %v2252_v34  ;;  %v2258_v36 = vld [vmem:[%s2144_s4 + $0x190] sm:$0xff]  ;;  %v2266_v39 = vld [vmem:[%s2144_s4 + $0x88] sm:$0xff]  ;;  %v411_v16 = vadd.f32 %v2252_v34, %v2209_v19  ;;  %v449_v13 = vmax.f32 %v425_v56, 1e-06 }
  0x35   : > { %5295 = vst [vmem:[#allocation30_spill] sm:$0xff] %v2255_v35  ;;  %5296 = vst [vmem:[#allocation31_spill] sm:$0xff] %v2258_v36  ;;  %v2269_v40 = vld [vmem:[%s2144_s4 + $0x90] sm:$0xff]  ;;  %v2272_v41 = vld [vmem:[%s2144_s4 + $0x128] sm:$0xff]  ;;  %v426_v23 = vadd.f32 %v2258_v36, %v402_v30 }
  0x36   : > { %5297 = vst [vmem:[#allocation32_spill] sm:$0xff] %v2263_v38  ;;  %5298 = vst [vmem:[#allocation33_spill] sm:$0xff] %v2266_v39  ;;  %v2275_v42 = vld [vmem:[%s2144_s4 + $0x130] sm:$0xff]  ;;  %v2278_v43 = vld [vmem:[%s2144_s4 + $0x198] sm:$0xff]  ;;  %v412_v38 = vadd.f32 %v2255_v35, %v2223_v24  ;;  %v413_v28 = vadd.f32 %v2272_v41, %v2226_v25 }
  0x37   : > { %5299 = vst [vmem:[#allocation34_spill] sm:$0xff] %v2269_v40  ;;  %5300 = vst [vmem:[#allocation35_spill] sm:$0xff] %v2272_v41  ;;  %v2289_v48 = vld [vmem:[%s2144_s4 + $0x98] sm:$0xff]  ;;  %v2292_v49 = vld [vmem:[%s2144_s4 + $0xa0] sm:$0xff]  ;;  %v414_v34 = vadd.f32 %v2275_v42, %v2229_v26  ;;  %v427_v30 = vadd.f32 %v2278_v43, %v403_v37 }
  0x38   : > { %5301 = vst [vmem:[#allocation36_spill] sm:$0xff] %v2275_v42  ;;  %5302 = vst [vmem:[#allocation37_spill] sm:$0xff] %v2278_v43  ;;  %v2295_v50 = vld [vmem:[%s2144_s4 + $0x138] sm:$0xff]  ;;  %v2298_v51 = vld [vmem:[%s2144_s4 + $0x140] sm:$0xff]  ;;  %v448_v42 = vmax.f32 %v424_v46, 1e-06 }
  0x39   : > { %5303 = vst [vmem:[#allocation38_spill] sm:$0xff] %v2286_v47  ;;  %5304 = vst [vmem:[#allocation39_spill] sm:$0xff] %v2289_v48  ;;  %v2301_v52 = vld [vmem:[%s2144_s4 + $0x1a0] sm:$0xff]  ;;  %v2311_v57 = vld [vmem:[%s2144_s4 + $0xa8] sm:$0xff]  ;;  %v415_v20 = vadd.f32 %v2295_v50, %v2246_v32  ;;  %v416_v35 = vadd.f32 %v2298_v51, %v2249_v33 }
  0x3a   : > { %5305 = vst [vmem:[#allocation40_spill] sm:$0xff] %v2292_v49  ;;  %5306 = vst [vmem:[#allocation41_spill] sm:$0xff] %v2295_v50  ;;  %v2314_v58 = vld [vmem:[%s2144_s4 + $0xb0] sm:$0xff]  ;;  %v2317_v59 = vld [vmem:[%s2144_s4 + $0x148] sm:$0xff]  ;;  %v428_v41 = vadd.f32 %v2301_v52, %v404_v44  ;;  %1835 = vrcp.f32 %v448_v42 }
  0x3b   : > { %5307 = vst [vmem:[#allocation42_spill] sm:$0xff] %v2298_v51  ;;  %5308 = vst [vmem:[#allocation43_spill] sm:$0xff] %v2301_v52  ;;  %v2320_v60 = vld [vmem:[%s2144_s4 + $0x150] sm:$0xff]  ;;  %v2323_v61 = vld [vmem:[%s2144_s4 + $0x1a8] sm:$0xff]  ;;  %v417_v14 = vadd.f32 %v2317_v59, %v2266_v39  ;;  %1837 = vrcp.f32 %v449_v13 }
  0x3c   : > { %5309 = vst [vmem:[#allocation44_spill] sm:$0xff] %v2311_v57  ;;  %5310 = vst [vmem:[#allocation45_spill] sm:$0xff] %v2314_v58  ;;  %v2333_v47 = vld [vmem:[%s2144_s4 + $0x158] sm:$0xff]  ;;  %v2336_v29 = vld [vmem:[%s2144_s4 + $0x160] sm:$0xff]  ;;  %v418_v50 = vadd.f32 %v2320_v60, %v2269_v40  ;;  %v429_v51 = vadd.f32 %v2323_v61, %v405_v45  ;;  %v452_v2 = vmax.f32 %v428_v41, 1e-06 }
  0x3d   : > { %5311 = vst [vmem:[#allocation46_spill] sm:$0xff] %v2317_v59  ;;  %5312 = vst [vmem:[#allocation47_spill] sm:$0xff] %v2320_v60  ;;  %v2339_v22 = vld [vmem:[%s2144_s4 + $0x1b0] sm:$0xff]  ;;  %v2349_v36 = vld [vmem:[%s2144_s4 + $0x168] sm:$0xff]  ;;  %v419_v52 = vadd.f32 %v2333_v47, %v2289_v48  ;;  %v420_v9 = vadd.f32 %v2336_v29, %v2292_v49  ;;  %v450_v60 = vmax.f32 %v426_v23, 1e-06 }
  0x3e   : > { %5313 = vst [vmem:[#allocation48_spill] sm:$0xff] %v2323_v61  ;;  %5314 = vst [vmem:[#allocation49_spill] sm:$0xff] %v2333_v47  ;;  %v2352_v27 = vld [vmem:[%s2144_s4 + $0x170] sm:$0xff]  ;;  %v2355_v21 = vld [vmem:[%s2144_s4 + $0x1b8] sm:$0xff]  ;;  %v430_v59 = vadd.f32 %v2339_v22, %v406_v53  ;;  %v421_v56 = vadd.f32 %v2349_v36, %v2311_v57  ;;  %v453_v41 = vmax.f32 %v429_v51, 1e-06 }
  0x3f   : > { %5315 = vst [vmem:[#allocation50_spill] sm:$0xff] %v2336_v29  ;;  %5316 = vst [vmem:[#allocation51_spill] sm:$0xff] %v2339_v22  ;;  %v2363_v15 = vld [vmem:[%s2144_s4 + $0xb8] sm:$0xff]  ;;  %v2369_v43 = vld [vmem:[%s2144_s4 + $0x1c0] sm:$0xff]  ;;  %v422_v61 = vadd.f32 %v2352_v27, %v2314_v58  ;;  %v431_v47 = vadd.f32 %v2355_v21, %v407_v54  ;;  %v451_v29 = vmax.f32 %v427_v30, 1e-06  ;;  %1839 = vrcp.f32 %v450_v60 }
  0x40   : > { %5317 = vst [vmem:[#allocation52_spill] sm:$0xff] %v2349_v36  ;;  %5318 = vst [vmem:[#allocation53_spill] sm:$0xff] %v2352_v27  ;;  %v2366_v37 = vld [vmem:[%s2144_s4 + $0x178] sm:$0xff]  ;;  %v2377_v44 = vld [vmem:[%s2144_s4 + $0x1c8] sm:$0xff]  ;;  %v432_v22 = vadd.f32 %v2369_v43, %v408_v55  ;;  %v454_v36 = vmax.f32 %v430_v59, 1e-06 }
  0x41   : > { %5319 = vst [vmem:[#allocation54_spill] sm:$0xff] %v2355_v21  ;;  %5320 = vst [vmem:[#allocation55_spill] sm:$0xff] %v2363_v15  ;;  %v2380_v46 = vld [vmem:[%s2144_s4 + $0x1d0] sm:$0xff]  ;;  %v2388_v8 = vld [vmem:[%s2144_s4 + $0x1d8] sm:$0xff]  ;;  %v423_v23 = vadd.f32 %v2366_v37, %v2363_v15  ;;  %v433_v21 = vadd.f32 %v2377_v44, %v409_v62  ;;  %1841 = vrcp.f32 %v451_v29 }
  0x42   : > { %5321 = vst [vmem:[#allocation56_spill] sm:$0xff] %v2366_v37  ;;  %5322 = vst [vmem:[#allocation57_spill] sm:$0xff] %v2369_v43  ;;  %v2391_v45 = vld [vmem:[%s2144_s4 + $0x1e0] sm:$0xff]  ;;  %v2399_v5 = vld [vmem:[%s2144_s4 + $0x1e8] sm:$0xff]  ;;  %v2422_v37 = vadd.f32 %v2380_v46, %v410_v63  ;;  %v2431_v43 = vadd.f32 %v2388_v8, %v411_v16  ;;  %1843 = vrcp.f32 %v452_v2 }
  0x43   : > { %5323 = vst [vmem:[#allocation58_spill] sm:$0xff] %v2377_v44  ;;  %5324 = vst [vmem:[#allocation59_spill] sm:$0xff] %v2380_v46  ;;  %v2402_v53 = vld [vmem:[%s2144_s4 + $0x1f0] sm:$0xff]  ;;  %v2415_v54 = vld [vmem:[%s2144_s4 + $0x1f8] sm:$0xff]  ;;  %v2434_v27 = vadd.f32 %v2391_v45, %v412_v38  ;;  %v2446_v63 = vadd.f32 %v2399_v5, %v413_v28  ;;  %1845 = vrcp.f32 %v453_v41 }
  0x44   : > { %5325 = vst [vmem:[#allocation60_spill] sm:$0xff] %v2388_v8  ;;  %5326 = vst [vmem:[#allocation61_spill] sm:$0xff] %v2391_v45  ;;  %v2418_v30 = vld [vmem:[%s2144_s4 + $0x200] sm:$0xff]  ;;  %v2425_v42 = vld [vmem:[%s2144_s4 + $0x208] sm:$0xff]  ;;  %v2449_v16 = vadd.f32 %v2402_v53, %v414_v34  ;;  %v455_v8 = vmax.f32 %v431_v47, 1e-06  ;;  %v2461_v45 = vadd.f32 %v2415_v54, %v415_v20  ;;  %1847 = vrcp.f32 %v454_v36 }
  0x45   : > { %5327 = vst [vmem:[#allocation62_spill] sm:$0xff] %v2399_v5  ;;  %5328 = vst [vmem:[#allocation63_spill] sm:$0xff] %v2402_v53  ;;  %v2428_v55 = vld [vmem:[%s2144_s4 + $0x210] sm:$0xff]  ;;  %v2437_v62 = vld [vmem:[%s2144_s4 + $0x218] sm:$0xff]  ;;  %v2464_v28 = vadd.f32 %v2418_v30, %v416_v35  ;;  %v456_v34 = vmax.f32 %v432_v22, 1e-06  ;;  %v2476_v5 = vadd.f32 %v2425_v42, %v417_v14 }
  0x46   : > { %5329 = vst [vmem:[#allocation64_spill] sm:$0xff] %v2415_v54  ;;  %5330 = vst [vmem:[#allocation65_spill] sm:$0xff] %v2418_v30  ;;  %v2440_v51 = vld [vmem:[%s2144_s4 + $0x220] sm:$0xff]  ;;  %v2443_v13 = vld [vmem:[%s2144_s4 + $0x228] sm:$0xff]  ;;  %v2479_v20 = vadd.f32 %v2428_v55, %v418_v50  ;;  %v457_v35 = vmax.f32 %v433_v21, 1e-06  ;;  %v2494_v14 = vadd.f32 %v2437_v62, %v419_v52  ;;  %1849 = vrcp.f32 %v455_v8 }
  0x47   : > { %5331 = vst [vmem:[#allocation66_spill] sm:$0xff] %v2425_v42  ;;  %5332 = vst [vmem:[#allocation67_spill] sm:$0xff] %v2428_v55  ;;  %v2452_v38 = vld [vmem:[%s2144_s4 + $0x230] sm:$0xff]  ;;  %v2455_v59 = vld [vmem:[%s2144_s4 + $0x238] sm:$0xff]  ;;  %v2497_v50 = vadd.f32 %v2440_v51, %v420_v9  ;;  %v458_v21 = vmax.f32 %v2422_v37, 1e-06  ;;  %v2513_v52 = vadd.f32 %v2443_v13, %v421_v56  ;;  %1851 = vrcp.f32 %v456_v34 }
  0x48   : > { %5333 = vst [vmem:[#allocation68_spill] sm:$0xff] %v2437_v62  ;;  %5334 = vst [vmem:[#allocation69_spill] sm:$0xff] %v2440_v51  ;;  %v2458_v60 = vld [vmem:[%s2412_s10] sm:$0xff]  ;;  %v2467_v47 = vld [vmem:[%s2412_s10 + $0x8] sm:$0xff]  ;;  %v2516_v9 = vadd.f32 %v2452_v38, %v422_v61  ;;  %v459_v36 = vmax.f32 %v2431_v43, 1e-06  ;;  %v2532_v56 = vadd.f32 %v2455_v59, %v423_v23  ;;  %1853 = vrcp.f32 %v457_v35 }
  0x49   : > { %5335 = vst [vmem:[#allocation70_spill] sm:$0xff] %v2443_v13  ;;  %5336 = vst [vmem:[#allocation71_spill] sm:$0xff] %v2452_v38  ;;  %v2470_v29 = vld [vmem:[%s2412_s10 + $0x10] sm:$0xff]  ;;  %v2473_v53 = vld [vmem:[%s2412_s10 + $0x18] sm:$0xff]  ;;  %v460_v61 = vmax.f32 %v2434_v27, 1e-06  ;;  %1855 = vrcp.f32 %v458_v21 }
  0x4a   : > { %5337 = vst [vmem:[#allocation72_spill] sm:$0xff] %v2455_v59  ;;  %5338 = vst [vmem:[#allocation73_spill] sm:$0xff] %v2458_v60  ;;  %v2482_v22 = vld [vmem:[%s2412_s10 + $0x20] sm:$0xff]  ;;  %v2485_v2 = vld [vmem:[%s2412_s10 + $0x28] sm:$0xff]  ;;  %v461_v43 = vmax.f32 %v2446_v63, 1e-06  ;;  %v2557_v63 = vpop.eup %1835  ;;  %1857 = vrcp.f32 %v459_v36 }
  0x4b   : > { %5339 = vst [vmem:[#allocation74_spill] sm:$0xff] %v2467_v47  ;;  %5340 = vst [vmem:[#allocation75_spill] sm:$0xff] %v2470_v29  ;;  %v2488_v30 = vld [vmem:[%s2412_s10 + $0xc0] sm:$0xff]  ;;  %v2491_v54 = vld [vmem:[%s2412_s10 + $0xc8] sm:$0xff]  ;;  %v462_v15 = vmax.f32 %v2449_v16, 1e-06  ;;  %1859 = vrcp.f32 %v460_v61 }
  0x4c   : > { %5341 = vst [vmem:[#allocation76_spill] sm:$0xff] %v2473_v53  ;;  %5342 = vst [vmem:[#allocation77_spill] sm:$0xff] %v2482_v22  ;;  %v2501_v41 = vld [vmem:[%s2412_s10 + $0x30] sm:$0xff]  ;;  %v2504_v55 = vld [vmem:[%s2412_s10 + $0x38] sm:$0xff]  ;;  %v2551_v27 = vadd.f32 %v2488_v30, %v2458_v60  ;;  %v2555_v23 = vadd.f32 %v2491_v54, %v2467_v47  ;;  %v463_v35 = vmax.f32 %v2461_v45, 1e-06  ;;  %v2580_v47 = vpop.eup %1837  ;;  %1861 = vrcp.f32 %v461_v43 }
  0x4d   : > { %5343 = vst [vmem:[#allocation78_spill] sm:$0xff] %v2485_v2  ;;  %5344 = vst [vmem:[#allocation79_spill] sm:$0xff] %v2488_v30  ;;  %v2507_v42 = vld [vmem:[%s2412_s10 + $0xd0] sm:$0xff]  ;;  %v2510_v46 = vld [vmem:[%s2412_s10 + $0xd8] sm:$0xff]  ;;  %v464_v21 = vmax.f32 %v2464_v28, 1e-06  ;;  %1863 = vrcp.f32 %v462_v15 }
  0x4e   : > { %5345 = vst [vmem:[#allocation80_spill] sm:$0xff] %v2491_v54  ;;  %5346 = vst [vmem:[#allocation81_spill] sm:$0xff] %v2501_v41  ;;  %v2520_v37 = vld [vmem:[%s2412_s10 + $0x40] sm:$0xff]  ;;  %v2523_v51 = vld [vmem:[%s2412_s10 + $0x48] sm:$0xff]  ;;  %v2574_v54 = vadd.f32 %v2507_v42, %v2470_v29  ;;  %v2578_v30 = vadd.f32 %v2510_v46, %v2473_v53  ;;  %v2603_v53 = vpop.eup %1839  ;;  %v465_v36 = vmax.f32 %v2476_v5, 1e-06  ;;  %1865 = vrcp.f32 %v463_v35 }
  0x4f   : > { %5347 = vst [vmem:[#allocation82_spill] sm:$0xff] %v2504_v55  ;;  %5348 = vst [vmem:[#allocation83_spill] sm:$0xff] %v2507_v42  ;;  %v2526_v62 = vld [vmem:[%s2412_s10 + $0xe0] sm:$0xff]  ;;  %v2529_v44 = vld [vmem:[%s2412_s10 + $0xe8] sm:$0xff]  ;;  %v466_v61 = vmax.f32 %v2479_v20, 1e-06  ;;  %1867 = vrcp.f32 %v464_v21 }
  0x50   : > { %5349 = vst [vmem:[#allocation84_spill] sm:$0xff] %v2510_v46  ;;  %5350 = vst [vmem:[#allocation85_spill] sm:$0xff] %v2520_v37  ;;  %v2537_v8 = vld [vmem:[%s2412_s10 + $0x50] sm:$0xff]  ;;  %v2540_v38 = vld [vmem:[%s2412_s10 + $0x58] sm:$0xff]  ;;  %v2597_v46 = vadd.f32 %v2526_v62, %v2482_v22  ;;  %v2601_v42 = vadd.f32 %v2529_v44, %v2485_v2  ;;  %v2626_v2 = vpop.eup %1841  ;;  %v468_v15 = vmax.f32 %v2497_v50, 1e-06  ;;  %1869 = vrcp.f32 %v465_v36 }
  0x51   : > { %5351 = vst [vmem:[#allocation86_spill] sm:$0xff] %v2523_v51  ;;  %5352 = vst [vmem:[#allocation87_spill] sm:$0xff] %v2526_v62  ;;  %v2543_v13 = vld [vmem:[%s2412_s10 + $0xf0] sm:$0xff]  ;;  %v2546_v31 = vld [vmem:[%s2412_s10 + $0xf8] sm:$0xff]  ;;  %v469_v50 = vmax.f32 %v2513_v52, 1e-06  ;;  %1871 = vrcp.f32 %v466_v61 }
  0x52   : > { %5353 = vst [vmem:[#allocation88_spill] sm:$0xff] %v2529_v44  ;;  %5354 = vst [vmem:[#allocation89_spill] sm:$0xff] %v2537_v8  ;;  %v2560_v34 = vld [vmem:[%s2412_s10 + $0x60] sm:$0xff]  ;;  %v2563_v59 = vld [vmem:[%s2412_s10 + $0x68] sm:$0xff]  ;;  %v2620_v44 = vadd.f32 %v2543_v13, %v2501_v41  ;;  %v2624_v62 = vadd.f32 %v2546_v31, %v2504_v55  ;;  %v2649_v55 = vpop.eup %1843  ;;  %v470_v52 = vmax.f32 %v2516_v9, 1e-06 }
  0x53   : > { %5355 = vst [vmem:[#allocation90_spill] sm:$0xff] %v2540_v38  ;;  %5356 = vst [vmem:[#allocation91_spill] sm:$0xff] %v2543_v13  ;;  %v2566_v58 = vld [vmem:[%s2412_s10 + $0x100] sm:$0xff]  ;;  %v2569_v16 = vld [vmem:[%s2412_s10 + $0x108] sm:$0xff]  ;;  %v471_v9 = vmax.f32 %v2532_v56, 1e-06 }
  0x54   : > { %5357 = vst [vmem:[#allocation92_spill] sm:$0xff] %v2546_v31  ;;  %5358 = vst [vmem:[#allocation93_spill] sm:$0xff] %v2560_v34  ;;  %v2583_v60 = vld [vmem:[%s2412_s10 + $0x70] sm:$0xff]  ;;  %v2586_v57 = vld [vmem:[%s2412_s10 + $0x78] sm:$0xff]  ;;  %v2643_v31 = vadd.f32 %v2566_v58, %v2520_v37  ;;  %v2647_v13 = vadd.f32 %v2569_v16, %v2523_v51  ;;  %v2675_v37 = vpop.eup %1845 }
  0x55   : > { %5359 = vst [vmem:[#allocation94_spill] sm:$0xff] %v2563_v59  ;;  %5360 = vst [vmem:[#allocation95_spill] sm:$0xff] %v2566_v58  ;;  %v2589_v49 = vld [vmem:[%s2412_s10 + $0x110] sm:$0xff]  ;;  %v2592_v45 = vld [vmem:[%s2412_s10 + $0x118] sm:$0xff]  ;;  %v467_v58 = vmax.f32 %v2494_v14, 1e-06 }
  0x56   : > { %5361 = vst [vmem:[#allocation96_spill] sm:$0xff] %v2569_v16  ;;  %5362 = vst [vmem:[#allocation97_spill] sm:$0xff] %v2583_v60  ;;  %v2606_v29 = vld [vmem:[%s2412_s10 + $0x80] sm:$0xff]  ;;  %v2609_v48 = vld [vmem:[%s2412_s10 + $0x88] sm:$0xff]  ;;  %v2669_v16 = vadd.f32 %v2589_v49, %v2537_v8  ;;  %v2673_v51 = vadd.f32 %v2592_v45, %v2540_v38 }
  0x57   : > { %5363 = vst [vmem:[#allocation98_spill] sm:$0xff] %v2586_v57  ;;  %5364 = vst [vmem:[#allocation99_spill] sm:$0xff] %v2589_v49  ;;  %v2612_v40 = vld [vmem:[%s2412_s10 + $0x120] sm:$0xff]  ;;  %v2615_v28 = vld [vmem:[%s2412_s10 + $0x128] sm:$0xff]  ;;  %v2695_v49 = vpop.eup %1847  ;;  %1873 = vrcp.f32 %v467_v58 }
  0x58   : > { %5365 = vst [vmem:[#allocation100_spill] sm:$0xff] %v2592_v45  ;;  %5366 = vst [vmem:[#allocation101_spill] sm:$0xff] %v2606_v29  ;;  %v2629_v22 = vld [vmem:[%s2412_s10 + $0x90] sm:$0xff]  ;;  %v2632_v39 = vld [vmem:[%s2412_s10 + $0x98] sm:$0xff]  ;;  %v2689_v14 = vadd.f32 %v2612_v40, %v2560_v34  ;;  %v2693_v45 = vadd.f32 %v2615_v28, %v2563_v59  ;;  %1875 = vrcp.f32 %v468_v15 }
  0x59   : > { %5367 = vst [vmem:[#allocation102_spill] sm:$0xff] %v2609_v48  ;;  %5368 = vst [vmem:[#allocation103_spill] sm:$0xff] %v2612_v40  ;;  %v2635_v33 = vld [vmem:[%s2412_s10 + $0x130] sm:$0xff]  ;;  %v2638_v5 = vld [vmem:[%s2412_s10 + $0x138] sm:$0xff]  ;;  %v2715_v40 = vpop.eup %1849  ;;  %1877 = vrcp.f32 %v469_v50 }
  0x5a   : > { %5369 = vst [vmem:[#allocation104_spill] sm:$0xff] %v2615_v28  ;;  %5370 = vst [vmem:[#allocation105_spill] sm:$0xff] %v2629_v22  ;;  %v2652_v41 = vld [vmem:[%s2412_s10 + $0xa0] sm:$0xff]  ;;  %v2655_v32 = vld [vmem:[%s2412_s10 + $0xa8] sm:$0xff]  ;;  %v2709_v35 = vadd.f32 %v2635_v33, %v2583_v60  ;;  %v2713_v28 = vadd.f32 %v2638_v5, %v2586_v57  ;;  %1879 = vrcp.f32 %v470_v52 }
  0x5b   : > { %5371 = vst [vmem:[#allocation106_spill] sm:$0xff] %v2632_v39  ;;  %5372 = vst [vmem:[#allocation107_spill] sm:$0xff] %v2635_v33  ;;  %v2658_v26 = vld [vmem:[%s2412_s10 + $0xb0] sm:$0xff]  ;;  %v2661_v20 = vld [vmem:[%s2412_s10 + $0x140] sm:$0xff]  ;;  %v2733_v33 = vpop.eup %1851  ;;  %1881 = vrcp.f32 %v471_v9 }
  0x5c   : > { %5373 = vst [vmem:[#allocation108_spill] sm:$0xff] %v2638_v5  ;;  %5374 = vst [vmem:[#allocation109_spill] sm:$0xff] %v2652_v41  ;;  %v2664_v43 = vld [vmem:[%s2412_s10 + $0x148] sm:$0xff]  ;;  %v2678_v25 = vld [vmem:[%s2412_s10 + $0xb8] sm:$0xff]  ;;  %v512_v21 = vadd.f32 %v2661_v20, %v2606_v29 }
  0x5d   : > { %5375 = vst [vmem:[#allocation110_spill] sm:$0xff] %v2655_v32  ;;  %5376 = vst [vmem:[#allocation111_spill] sm:$0xff] %v2658_v26  ;;  %v2681_v24 = vld [vmem:[%s2412_s10 + $0x150] sm:$0xff]  ;;  %v2684_v19 = vld [vmem:[%s2412_s10 + $0x158] sm:$0xff]  ;;  %v2731_v5 = vadd.f32 %v2664_v43, %v2609_v48 }
  0x5e   : > { %5377 = vst [vmem:[#allocation112_spill] sm:$0xff] %v2661_v20  ;;  %5378 = vst [vmem:[#allocation113_spill] sm:$0xff] %v2664_v43  ;;  %v2698_v38 = vld [vmem:[%s2412_s10 + $0x160] sm:$0xff]  ;;  %v2701_v8 = vld [vmem:[%s2412_s10 + $0x168] sm:$0xff]  ;;  %v514_v36 = vadd.f32 %v2681_v24, %v2629_v22  ;;  %v515_v43 = vadd.f32 %v2684_v19, %v2632_v39  ;;  %v2749_v20 = vpop.eup %1853 }
  0x5f   : > { %5379 = vst [vmem:[#allocation114_spill] sm:$0xff] %v2678_v25  ;;  %5380 = vst [vmem:[#allocation115_spill] sm:$0xff] %v2681_v24  ;;  %v2704_v18 = vld [vmem:[%s2412_s10 + $0x170] sm:$0xff]  ;;  %v2718_v59 = vld [vmem:[%s2412_s10 + $0x178] sm:$0xff]  ;;  %v516_v56 = vadd.f32 %v2698_v38, %v2652_v41  ;;  %v517_v61 = vadd.f32 %v2701_v8, %v2655_v32  ;;  %v2766_v24 = vpop.eup %1855 }
  0x60   : > { %5381 = vst [vmem:[#allocation116_spill] sm:$0xff] %v2684_v19  ;;  %5382 = vst [vmem:[#allocation117_spill] sm:$0xff] %v2698_v38  ;;  %v2721_v34 = vld [vmem:[%s2412_s10 + $0x180] sm:$0xff]  ;;  %v2724_v17 = vld [vmem:[%s2412_s10 + $0x188] sm:$0xff]  ;;  %v518_v19 = vadd.f32 %v2704_v18, %v2658_v26  ;;  %v519_v58 = vadd.f32 %v2718_v59, %v2678_v25  ;;  %v2783_v38 = vpop.eup %1857 }
  0x61   : > { %5383 = vst [vmem:[#allocation118_spill] sm:$0xff] %v2701_v8  ;;  %5384 = vst [vmem:[#allocation119_spill] sm:$0xff] %v2704_v18  ;;  %v2736_v57 = vld [vmem:[%s2412_s10 + $0x190] sm:$0xff]  ;;  %v2739_v60 = vld [vmem:[%s2412_s10 + $0x198] sm:$0xff]  ;;  %v520_v8 = vadd.f32 %v2721_v34, %v2551_v27  ;;  %v521_v18 = vadd.f32 %v2724_v17, %v2555_v23 }
  0x62   : > { %5385 = vst [vmem:[#allocation120_spill] sm:$0xff] %v2718_v59  ;;  %5386 = vst [vmem:[#allocation121_spill] sm:$0xff] %v2721_v34  ;;  %v2742_v12 = vld [vmem:[%s2412_s10 + $0x1a0] sm:$0xff]  ;;  %v2752_v48 = vld [vmem:[%s2412_s10 + $0x1a8] sm:$0xff]  ;;  %v522_v15 = vadd.f32 %v2736_v57, %v2574_v54  ;;  %v523_v27 = vadd.f32 %v2739_v60, %v2578_v30 }
  0x63   : > { %5387 = vst [vmem:[#allocation122_spill] sm:$0xff] %v2724_v17  ;;  %5388 = vst [vmem:[#allocation123_spill] sm:$0xff] %v2733_v33  ;;  %v2755_v29 = vld [vmem:[%s2412_s10 + $0x1b0] sm:$0xff]  ;;  %v2758_v33 = vld [vmem:[%s2412_s10 + $0x1b8] sm:$0xff]  ;;  %v2800_v23 = vadd.f32 %v2742_v12, %v2597_v46  ;;  %v2802_v17 = vpop.eup %1859  ;;  %v2815_v54 = vadd.f32 %v2752_v48, %v2601_v42  ;;  %v544_v9 = vmax.f32 %v520_v8, 1e-06 }
  0x64   : > { %5389 = vst [vmem:[#allocation124_spill] sm:$0xff] %v2736_v57  ;;  %5390 = vst [vmem:[#allocation125_spill] sm:$0xff] %v2739_v60  ;;  %v2769_v39 = vld [vmem:[%s2412_s10 + $0x1c0] sm:$0xff]  ;;  %v2772_v22 = vld [vmem:[%s2412_s10 + $0x1c8] sm:$0xff]  ;;  %v2819_v46 = vadd.f32 %v2755_v29, %v2620_v44  ;;  %v2823_v30 = vadd.f32 %v2758_v33, %v2624_v62  ;;  %v2825_v50 = vpop.eup %1861 }
  0x65   : > { %5391 = vst [vmem:[#allocation126_spill] sm:$0xff] %v2742_v12  ;;  %5392 = vst [vmem:[#allocation127_spill] sm:$0xff] %v2749_v20  ;;  %v2775_v20 = vld [vmem:[%s2412_s10 + $0x1d0] sm:$0xff]  ;;  %v2786_v26 = vld [vmem:[%s2412_s10 + $0x1d8] sm:$0xff]  ;;  %v2838_v42 = vadd.f32 %v2769_v39, %v2643_v31  ;;  %v2842_v44 = vadd.f32 %v2772_v22, %v2647_v13  ;;  %1883 = vrcp.f32 %v544_v9 }
  0x66   : > { %5393 = vst [vmem:[#allocation128_spill] sm:$0xff] %v2752_v48  ;;  %5394 = vst [vmem:[#allocation129_spill] sm:$0xff] %v2755_v29  ;;  %v2789_v32 = vld [vmem:[%s2412_s10 + $0x1e0] sm:$0xff]  ;;  %v2792_v41 = vld [vmem:[%s2412_s10 + $0x1e8] sm:$0xff]  ;;  %v2846_v62 = vadd.f32 %v2775_v20, %v2669_v16  ;;  %v2861_v31 = vadd.f32 %v2786_v26, %v2673_v51 }
  0x67   : > { %5395 = vst [vmem:[#allocation130_spill] sm:$0xff] %v2758_v33  ;;  %5396 = vst [vmem:[#allocation131_spill] sm:$0xff] %v2769_v39  ;;  %v2805_v34 = vld [vmem:[%s2412_s10 + $0x1f0] sm:$0xff]  ;;  %v2808_v59 = vld [vmem:[%s2412_s10 + $0x1f8] sm:$0xff]  ;;  %v2848_v33 = vpop.eup %1863  ;;  %v2865_v13 = vadd.f32 %v2789_v32, %v2689_v14  ;;  %v2869_v16 = vadd.f32 %v2792_v41, %v2693_v45 }
  0x68   : > { %5397 = vst [vmem:[#allocation132_spill] sm:$0xff] %v2772_v22  ;;  %5398 = vst [vmem:[#allocation133_spill] sm:$0xff] %v2775_v20  ;;  %v2811_v25 = vld [vmem:[%s2412_s10 + $0x200] sm:$0xff]  ;;  %v2828_v12 = vld [vmem:[%s2412_s10 + $0x208] sm:$0xff]  ;;  %v2871_v20 = vpop.eup %1865  ;;  %v2878_v39 = vadd.f32 %v2805_v34, %v2709_v35  ;;  %v2882_v51 = vadd.f32 %v2808_v59, %v2713_v28  ;;  %v554_v9 = vmax.f32 %v2846_v62, 1e-06 }
  0x69   : > { %5399 = vst [vmem:[#allocation134_spill] sm:$0xff] %v2786_v26  ;;  %5400 = vst [vmem:[#allocation135_spill] sm:$0xff] %v2789_v32  ;;  %v2831_v60 = vld [vmem:[%s2412_s10 + $0x210] sm:$0xff]  ;;  %v2834_v52 = vld [vmem:[%s2412_s10 + $0x218] sm:$0xff]  ;;  %v2885_v14 = vadd.f32 %v2811_v25, %v512_v21  ;;  %v545_v32 = vmax.f32 %v521_v18, 1e-06  ;;  %v2887_v26 = vpop.eup %1867  ;;  %v2891_v8 = vadd.f32 %v2828_v12, %v2731_v5 }
  0x6a   : > { %5401 = vst [vmem:[#allocation136_spill] sm:$0xff] %v2792_v41  ;;  %5402 = vst [vmem:[#allocation137_spill] sm:$0xff] %v2805_v34  ;;  %v2851_v29 = vld [vmem:[%s2412_s10 + $0x220] sm:$0xff]  ;;  %v2854_v48 = vld [vmem:[%s2412_s10 + $0x228] sm:$0xff]  ;;  %v2894_v45 = vadd.f32 %v2831_v60, %v514_v36  ;;  %v2897_v35 = vadd.f32 %v2834_v52, %v515_v43  ;;  %v546_v34 = vmax.f32 %v522_v15, 1e-06  ;;  %v2899_v41 = vpop.eup %1869  ;;  %v2918_v15 = vmul.f32 %v2557_v63, %v2153_v0 }
  0x6b   : > { %5403 = vst [vmem:[#allocation138_spill] sm:$0xff] %v2808_v59  ;;  %5404 = vst [vmem:[#allocation139_spill] sm:$0xff] %v2811_v25  ;;  %v2857_v57 = vld [vmem:[%s2412_s10 + $0x230] sm:$0xff]  ;;  %v2874_v22 = vld [vmem:[%s2412_s10 + $0x238] sm:$0xff]  ;;  %v2902_v28 = vadd.f32 %v2851_v29, %v516_v56  ;;  %v2905_v18 = vadd.f32 %v2854_v48, %v517_v61  ;;  %v547_v5 = vmax.f32 %v523_v27, 1e-06  ;;  %1885 = vrcp.f32 %v545_v32 }
  0x6c   : > { %5405 = vst [vmem:[#allocation140_spill] sm:$0xff] %v2828_v12  ;;  %5406 = vst [vmem:[#allocation141_spill] sm:$0xff] %v2831_v60  ;;  %v2908_v21 = vadd.f32 %v2857_v57, %v518_v19  ;;  %v2910_v12 = vpop.eup %1871  ;;  %v2913_v36 = vadd.f32 %v2874_v22, %v519_v58  ;;  %v548_v43 = vmax.f32 %v2800_v23, 1e-06  ;;  %v549_v61 = vmax.f32 %v2815_v54, 1e-06 }
  0x6d   : > { %5407 = vst [vmem:[#allocation142_spill] sm:$0xff] %v2834_v52  ;;  %5408 = vst [vmem:[#allocation143_spill] sm:$0xff] %v2851_v29  ;;  %v2920_v56 = vpop.eup %1873  ;;  %v550_v19 = vmax.f32 %v2819_v46, 1e-06  ;;  %v551_v27 = vmax.f32 %v2823_v30, 1e-06  ;;  %1887 = vrcp.f32 %v546_v34 }
  0x6e   : > { %5409 = vst [vmem:[#allocation144_spill] sm:$0xff] %v2854_v48  ;;  %5410 = vst [vmem:[#allocation145_spill] sm:$0xff] %v2857_v57  ;;  %v2925_v57 = vpop.eup %1875  ;;  %v552_v58 = vmax.f32 %v2838_v42, 1e-06  ;;  %v553_v23 = vmax.f32 %v2842_v44, 1e-06  ;;  %1889 = vrcp.f32 %v547_v5 }
  0x6f   : > { %5411 = vst [vmem:[#allocation146_spill] sm:$0xff] %v2874_v22  ;;  %5412 = vst [vmem:[#allocation147_spill] sm:$0xff] %v2887_v26  ;;  %v2930_v0 = vpop.eup %1877  ;;  %v555_v22 = vmax.f32 %v2861_v31, 1e-06  ;;  %v556_v54 = vmax.f32 %v2865_v13, 1e-06  ;;  %1891 = vrcp.f32 %v548_v43  ;;  %v602_v43 = vmul.f32 %v2649_v55, %v2171_v6 }
  0x70   : > { %5413 = vst [vmem:[#allocation148_spill] sm:$0xff] %v2899_v41  ;;  %v557_v46 = vmax.f32 %v2869_v16, 1e-06  ;;  %v2935_v30 = vpop.eup %1879  ;;  %v558_v32 = vmax.f32 %v2878_v39, 1e-06  ;;  %1893 = vrcp.f32 %v549_v61  ;;  %v603_v61 = vmul.f32 %v2675_v37, %v2174_v7  ;;  %v5418_v39 = vld [vmem:[#allocation127_spill] sm:$0xff] }
  0x71   : > { %v559_v42 = vmax.f32 %v2882_v51, 1e-06  ;;  %v560_v44 = vmax.f32 %v2885_v14, 1e-06  ;;  %v2940_v62 = vpop.eup %1881  ;;  %v561_v34 = vmax.f32 %v2891_v8, 1e-06  ;;  %1895 = vrcp.f32 %v550_v19 }
  0x72   : > { %v562_v31 = vmax.f32 %v2894_v45, 1e-06  ;;  %1897 = vrcp.f32 %v551_v27  ;;  %v599_v14 = vmul.f32 %v2580_v47, %v2156_v1  ;;  %v600_v8 = vmul.f32 %v2603_v53, %v2162_v3  ;;  %v5414_v27 = vld [vmem:[#allocation10_spill] sm:$0xff]  ;;  %v5415_v51 = vld [vmem:[#allocation123_spill] sm:$0xff]  ;;  %v5420_v7 = vld [vmem:[#allocation16_spill] sm:$0xff] }
  0x73   : > { %1899 = vrcp.f32 %v552_v58  ;;  %v601_v45 = vmul.f32 %v2626_v2, %v2165_v4  ;;  %v604_v19 = vmul.f32 %v2695_v49, %v2183_v10  ;;  %v605_v1 = vmul.f32 %v2715_v40, %v2186_v11  ;;  %v2965_v58 = vpop.eup %1883  ;;  %v5417_v4 = vld [vmem:[#allocation14_spill] sm:$0xff]  ;;  %v5419_v6 = vld [vmem:[#allocation15_spill] sm:$0xff]  ;;  %v5422_v10 = vld [vmem:[#allocation20_spill] sm:$0xff] }
  0x74   : > { %1901 = vrcp.f32 %v553_v23  ;;  %v606_v3 = vmul.f32 %v5415_v51, %v5414_v27  ;;  %5416 = vst [vmem:[#allocation10_spill] sm:$0xff] %v2965_v58  ;;  %v607_v5 = vmul.f32 %v5418_v39, %v5417_v4  ;;  %v608_v16 = vmul.f32 %v2766_v24, %v5419_v6  ;;  %v5423_v48 = vld [vmem:[#allocation21_spill] sm:$0xff]  ;;  %v5424_v29 = vld [vmem:[#allocation22_spill] sm:$0xff]  ;;  %v5426_v4 = vld [vmem:[#allocation27_spill] sm:$0xff] }
  0x75   : > { %1903 = vrcp.f32 %v554_v9  ;;  %v609_v23 = vmul.f32 %v2783_v38, %v5420_v7  ;;  %v2973_v13 = vpop.eup %1885  ;;  %v610_v11 = vmul.f32 %v2802_v17, %v5422_v10  ;;  %v611_v27 = vmul.f32 %v2825_v50, %v5423_v48  ;;  %v5427_v60 = vld [vmem:[#allocation28_spill] sm:$0xff]  ;;  %v5428_v25 = vld [vmem:[#allocation33_spill] sm:$0xff]  ;;  %v5430_v10 = vld [vmem:[#allocation34_spill] sm:$0xff] }
  0x76   : > { %5421 = vst [vmem:[#allocation123_spill] sm:$0xff] %v2973_v13  ;;  %1905 = vrcp.f32 %v555_v22  ;;  %v612_v9 = vmul.f32 %v2848_v33, %v5424_v29  ;;  %v613_v6 = vmul.f32 %v2871_v20, %v5426_v4  ;;  %v614_v7 = vmul.f32 %v2887_v26, %v5427_v60  ;;  %v5431_v13 = vld [vmem:[#allocation39_spill] sm:$0xff]  ;;  %v5433_v4 = vld [vmem:[#allocation44_spill] sm:$0xff]  ;;  %v5434_v26 = vld [vmem:[#allocation45_spill] sm:$0xff] }
  0x77   : > { %v2981_v52 = vpop.eup %1887  ;;  %1907 = vrcp.f32 %v556_v54  ;;  %v615_v22 = vmul.f32 %v2899_v41, %v5428_v25  ;;  %v616_v48 = vmul.f32 %v2910_v12, %v5430_v10  ;;  %v617_v29 = vmul.f32 %v2920_v56, %v5431_v13  ;;  %v5436_v10 = vld [vmem:[#allocation26_spill] sm:$0xff] }
  0x78   : > { %5425 = vst [vmem:[#allocation14_spill] sm:$0xff] %v2981_v52  ;;  %v2989_v59 = vpop.eup %1889  ;;  %1909 = vrcp.f32 %v557_v46  ;;  %v5432_v52 = vld [vmem:[#allocation40_spill] sm:$0xff]  ;;  %v619_v60 = vmul.f32 %v2930_v0, %v5433_v4  ;;  %v620_v25 = vmul.f32 %v2935_v30, %v5434_v26  ;;  %v3009_v13 = vsub.f32 %v2918_v15, %v5436_v10 }
  0x79   : > { %5429 = vst [vmem:[#allocation127_spill] sm:$0xff] %v2989_v59  ;;  %v618_v54 = vmul.f32 %v2925_v57, %v5432_v52  ;;  %v2997_v58 = vpop.eup %1891  ;;  %1911 = vrcp.f32 %v558_v32  ;;  %v5435_v59 = vld [vmem:[#allocation55_spill] sm:$0xff]  ;;  %v3012_v52 = vsub.f32 %v599_v14, %v5436_v10  ;;  %v3015_v32 = vsub.f32 %v600_v8, %v5436_v10 }
  0x7a   : > { %v621_v46 = vmul.f32 %v2940_v62, %v5435_v59  ;;  %v3005_v41 = vpop.eup %1893  ;;  %1913 = vrcp.f32 %v559_v42  ;;  %5437 = vst [vmem:[#allocation15_spill] sm:$0xff] %v3009_v13  ;;  %v3020_v26 = vsub.f32 %v601_v45, %v5436_v10  ;;  %v3023_v59 = vsub.f32 %v602_v43, %v5436_v10  ;;  %v5493_v13 = vld [vmem:[#allocation47_spill] sm:$0xff] }
  0x7b   : > { %5438 = vst [vmem:[#allocation16_spill] sm:$0xff] %v3012_v52  ;;  %5439 = vst [vmem:[#allocation20_spill] sm:$0xff] %v3015_v32  ;;  %v3017_v4 = vpop.eup %1895  ;;  %1915 = vrcp.f32 %v560_v44  ;;  %v3026_v42 = vsub.f32 %v603_v61, %v5436_v10  ;;  %v3031_v14 = vsub.f32 %v604_v19, %v5436_v10  ;;  %v3034_v8 = vsub.f32 %v605_v1, %v5436_v10  ;;  %v5491_v32 = vld [vmem:[#allocation46_spill] sm:$0xff]  ;;  %v5492_v52 = vld [vmem:[#allocation148_spill] sm:$0xff] }
  0x7c   : > { %5440 = vst [vmem:[#allocation21_spill] sm:$0xff] %v3020_v26  ;;  %5441 = vst [vmem:[#allocation22_spill] sm:$0xff] %v3023_v59  ;;  %v3028_v15 = vpop.eup %1897  ;;  %1917 = vrcp.f32 %v561_v34  ;;  %v3037_v44 = vsub.f32 %v606_v3, %v5436_v10  ;;  %v3042_v43 = vsub.f32 %v607_v5, %v5436_v10  ;;  %v3045_v61 = vsub.f32 %v608_v16, %v5436_v10  ;;  %v5490_v59 = vld [vmem:[#allocation147_spill] sm:$0xff] }
  0x7d   : > { %5442 = vst [vmem:[#allocation27_spill] sm:$0xff] %v3026_v42  ;;  %5443 = vst [vmem:[#allocation28_spill] sm:$0xff] %v3031_v14  ;;  %v3039_v45 = vpop.eup %1899  ;;  %1919 = vrcp.f32 %v562_v31  ;;  %v3048_v34 = vsub.f32 %v609_v23, %v5436_v10  ;;  %v5449_v1 = vmax.f32 %v2897_v35, 1e-06  ;;  %v3055_v3 = vsub.f32 %v610_v11, %v5436_v10 }
  0x7e   : > { %5444 = vst [vmem:[#allocation33_spill] sm:$0xff] %v3034_v8  ;;  %5445 = vst [vmem:[#allocation34_spill] sm:$0xff] %v3037_v44  ;;  %v3050_v19 = vpop.eup %1901  ;;  %v3058_v44 = vsub.f32 %v611_v27, %v5436_v10  ;;  %v3061_v31 = vsub.f32 %v612_v9, %v5436_v10  ;;  %v5453_v16 = vmax.f32 %v2902_v28, 1e-06  ;;  %v3068_v23 = vsub.f32 %v613_v6, %v5436_v10  ;;  %v5486_v8 = vld [vmem:[#allocation36_spill] sm:$0xff] }
  0x7f   : > { %5446 = vst [vmem:[#allocation39_spill] sm:$0xff] %v3042_v43  ;;  %5447 = vst [vmem:[#allocation40_spill] sm:$0xff] %v3045_v61  ;;  %1921 = vrcp.f32 %v5449_v1  ;;  %v3063_v5 = vpop.eup %1903  ;;  %v3071_v35 = vsub.f32 %v614_v7, %v5436_v10  ;;  %v3074_v11 = vsub.f32 %v615_v22, %v5436_v10  ;;  %v5458_v27 = vmax.f32 %v2905_v18, 1e-06  ;;  %v5485_v43 = vld [vmem:[#allocation35_spill] sm:$0xff] }
  0x80   : > { %5448 = vst [vmem:[#allocation44_spill] sm:$0xff] %v3048_v34  ;;  %5450 = vst [vmem:[#allocation45_spill] sm:$0xff] %v3055_v3  ;;  %1923 = vrcp.f32 %v5453_v16  ;;  %v3076_v1 = vpop.eup %1905  ;;  %v3081_v9 = vsub.f32 %v616_v48, %v5436_v10  ;;  %v3084_v28 = vsub.f32 %v617_v29, %v5436_v10  ;;  %v3087_v6 = vsub.f32 %v618_v54, %v5436_v10  ;;  %v5469_v54 = vld [vmem:[#allocation6_spill] sm:$0xff] }
  0x81   : > { %5451 = vst [vmem:[#allocation55_spill] sm:$0xff] %v3058_v44  ;;  %5452 = vst [vmem:[#allocation149_spill] sm:$0xff] %v3061_v31  ;;  %1925 = vrcp.f32 %v5458_v27  ;;  %v3089_v16 = vpop.eup %1907  ;;  %v5463_v7 = vmax.f32 %v2908_v21, 1e-06  ;;  %v3094_v22 = vsub.f32 %v619_v60, %v5436_v10  ;;  %v3097_v18 = vsub.f32 %v620_v25, %v5436_v10  ;;  %v5473_v25 = vld [vmem:[#allocation9_spill] sm:$0xff]  ;;  %v5480_v31 = vld [vmem:[#allocation23_spill] sm:$0xff] }
  0x82   : > { %5454 = vst [vmem:[#allocation150_spill] sm:$0xff] %v3068_v23  ;;  %5455 = vst [vmem:[#allocation151_spill] sm:$0xff] %v3071_v35  ;;  %v3100_v48 = vsub.f32 %v621_v46, %v5436_v10  ;;  %v3102_v27 = vpop.eup %1909  ;;  %v5468_v29 = vmax.f32 %v2913_v36, 1e-06  ;;  %v650_v46 = vmul.f32 %v2626_v2, %v5473_v25  ;;  %v656_v25 = vmul.f32 %v5418_v39, %v5480_v31  ;;  %v5481_v44 = vld [vmem:[#allocation24_spill] sm:$0xff]  ;;  %v5488_v31 = vld [vmem:[#allocation41_spill] sm:$0xff] }
  0x83   : > { %5456 = vst [vmem:[#allocation152_spill] sm:$0xff] %v3074_v11  ;;  %5457 = vst [vmem:[#allocation153_spill] sm:$0xff] %v3076_v1  ;;  %1927 = vrcp.f32 %v5463_v7  ;;  %v5471_v7 = vld [vmem:[#allocation8_spill] sm:$0xff]  ;;  %v662_v42 = vmul.f32 %v2871_v20, %v5488_v31 }
  0x84   : > { %5459 = vst [vmem:[#allocation154_spill] sm:$0xff] %v3081_v9  ;;  %5460 = vst [vmem:[#allocation155_spill] sm:$0xff] %v3084_v28  ;;  %1929 = vrcp.f32 %v5468_v29  ;;  %v5470_v28 = vld [vmem:[#allocation7_spill] sm:$0xff]  ;;  %v649_v60 = vmul.f32 %v2603_v53, %v5471_v7  ;;  %v5475_v9 = vld [vmem:[#allocation12_spill] sm:$0xff] }
  0x85   : > { %5461 = vst [vmem:[#allocation156_spill] sm:$0xff] %v3087_v6  ;;  %5462 = vst [vmem:[#allocation157_spill] sm:$0xff] %v3089_v16  ;;  %v647_v6 = vmul.f32 %v2557_v63, %v5469_v54  ;;  %v648_v21 = vmul.f32 %v2580_v47, %v5470_v28  ;;  %v652_v36 = vmul.f32 %v2675_v37, %v5475_v9  ;;  %v5476_v29 = vld [vmem:[#allocation13_spill] sm:$0xff]  ;;  %v5479_v7 = vld [vmem:[#allocation18_spill] sm:$0xff] }
  0x86   : > { %5464 = vst [vmem:[#allocation158_spill] sm:$0xff] %v3094_v22  ;;  %5465 = vst [vmem:[#allocation159_spill] sm:$0xff] %v3097_v18  ;;  %v3112_v22 = vpop.eup %1911  ;;  %v653_v54 = vmul.f32 %v2695_v49, %v5476_v29  ;;  %v5478_v28 = vld [vmem:[#allocation17_spill] sm:$0xff]  ;;  %v655_v23 = vmul.f32 %v5415_v51, %v5479_v7  ;;  %v5484_v29 = vld [vmem:[#allocation30_spill] sm:$0xff]  ;;  %v661_v7 = vmul.f32 %v2848_v33, %v5486_v8 }
  0x87   : > { %5466 = vst [vmem:[#allocation160_spill] sm:$0xff] %v3100_v48  ;;  %5467 = vst [vmem:[#allocation161_spill] sm:$0xff] %v3102_v27  ;;  %v5474_v48 = vld [vmem:[#allocation11_spill] sm:$0xff]  ;;  %v3122_v11 = vpop.eup %1913  ;;  %v654_v35 = vmul.f32 %v2715_v40, %v5478_v28  ;;  %v5483_v9 = vld [vmem:[#allocation29_spill] sm:$0xff]  ;;  %v659_v61 = vmul.f32 %v2802_v17, %v5484_v29  ;;  %v660_v28 = vmul.f32 %v2825_v50, %v5485_v43 }
  0x88   : > { %5472 = vst [vmem:[#allocation6_spill] sm:$0xff] %v3112_v22  ;;  %v651_v18 = vmul.f32 %v2649_v55, %v5474_v48  ;;  %5477 = vst [vmem:[#allocation7_spill] sm:$0xff] %v3122_v11  ;;  %v657_v48 = vmul.f32 %v2766_v24, %v5481_v44  ;;  %v3132_v3 = vpop.eup %1915  ;;  %v658_v34 = vmul.f32 %v2783_v38, %v5483_v9  ;;  %v5489_v44 = vld [vmem:[#allocation42_spill] sm:$0xff]  ;;  %v5495_v43 = vld [vmem:[#allocation49_spill] sm:$0xff] }
  0x89   : > { %5482 = vst [vmem:[#allocation8_spill] sm:$0xff] %v3132_v3  ;;  %v3142_v14 = vpop.eup %1917  ;;  %v663_v26 = vmul.f32 %v5490_v59, %v5489_v44  ;;  %v664_v9 = vmul.f32 %v5492_v52, %v5491_v32  ;;  %v665_v29 = vmul.f32 %v2910_v12, %v5493_v13  ;;  %v666_v3 = vmul.f32 %v2920_v56, %v5495_v43  ;;  %v5496_v8 = vld [vmem:[#allocation50_spill] sm:$0xff]  ;;  %v5497_v11 = vld [vmem:[#allocation52_spill] sm:$0xff]  ;;  %v5498_v22 = vld [vmem:[#allocation53_spill] sm:$0xff] }
  0x8a   : > { %5487 = vst [vmem:[#allocation9_spill] sm:$0xff] %v3142_v14  ;;  %v3152_v10 = vpop.eup %1919  ;;  %v667_v14 = vmul.f32 %v2925_v57, %v5496_v8  ;;  %v668_v31 = vmul.f32 %v2930_v0, %v5497_v11  ;;  %v669_v44 = vmul.f32 %v2935_v30, %v5498_v22  ;;  %v5500_v32 = vld [vmem:[#allocation56_spill] sm:$0xff] }
  0x8b   : > { %5494 = vst [vmem:[#allocation11_spill] sm:$0xff] %v3152_v10  ;;  %v3162_v27 = vpop.eup %1921  ;;  %v670_v16 = vmul.f32 %v2940_v62, %v5500_v32  ;;  %v5501_v13 = vld [vmem:[#allocation32_spill] sm:$0xff] }
  0x8c   : > { %5499 = vst [vmem:[#allocation12_spill] sm:$0xff] %v3162_v27  ;;  %v3167_v1 = vsub.f32 %v647_v6, %v5501_v13  ;;  %v3170_v10 = vsub.f32 %v648_v21, %v5501_v13  ;;  %v3173_v43 = vsub.f32 %v649_v60, %v5501_v13  ;;  %v3175_v8 = vpop.eup %1923  ;;  %v3178_v11 = vsub.f32 %v650_v46, %v5501_v13 }
  0x8d   : > { %v3181_v22 = vsub.f32 %v651_v18, %v5501_v13  ;;  %v3184_v27 = vsub.f32 %v652_v36, %v5501_v13  ;;  %v3187_v6 = vsub.f32 %v653_v54, %v5501_v13  ;;  %v3189_v32 = vpop.eup %1925  ;;  %v3192_v21 = vsub.f32 %v654_v35, %v5501_v13 }
  0x8e   : > { %5502 = vst [vmem:[#allocation13_spill] sm:$0xff] %v3167_v1  ;;  %5503 = vst [vmem:[#allocation17_spill] sm:$0xff] %v3170_v10  ;;  %v3195_v60 = vsub.f32 %v655_v23, %v5501_v13  ;;  %v3198_v46 = vsub.f32 %v656_v25, %v5501_v13  ;;  %v3201_v18 = vsub.f32 %v657_v48, %v5501_v13 }
  0x8f   : > { %5504 = vst [vmem:[#allocation18_spill] sm:$0xff] %v3173_v43  ;;  %5505 = vst [vmem:[#allocation23_spill] sm:$0xff] %v3178_v11  ;;  %v3206_v36 = vsub.f32 %v658_v34, %v5501_v13  ;;  %v3209_v54 = vsub.f32 %v659_v61, %v5501_v13  ;;  %v3212_v35 = vsub.f32 %v660_v28, %v5501_v13 }
  0x90   : > { %5506 = vst [vmem:[#allocation24_spill] sm:$0xff] %v3181_v22  ;;  %5507 = vst [vmem:[#allocation29_spill] sm:$0xff] %v3184_v27  ;;  %v3203_v22 = vpop.eup %1927  ;;  %v3215_v23 = vsub.f32 %v661_v7, %v5501_v13  ;;  %v3220_v25 = vsub.f32 %v662_v42, %v5501_v13  ;;  %v3223_v48 = vsub.f32 %v663_v26, %v5501_v13 }
  0x91   : > { %5508 = vst [vmem:[#allocation30_spill] sm:$0xff] %v3187_v6  ;;  %5509 = vst [vmem:[#allocation35_spill] sm:$0xff] %v3192_v21  ;;  %v3226_v34 = vsub.f32 %v664_v9, %v5501_v13  ;;  %v3229_v61 = vsub.f32 %v665_v29, %v5501_v13  ;;  %v3232_v28 = vsub.f32 %v666_v3, %v5501_v13  ;;  %v5526_v9 = vld [vmem:[#allocation19_spill] sm:$0xff]  ;;  %v5527_v29 = vld [vmem:[#allocation25_spill] sm:$0xff] }
  0x92   : > { %5510 = vst [vmem:[#allocation36_spill] sm:$0xff] %v3195_v60  ;;  %5511 = vst [vmem:[#allocation41_spill] sm:$0xff] %v3198_v46  ;;  %v3217_v60 = vpop.eup %1929  ;;  %v3235_v7 = vsub.f32 %v667_v14, %v5501_v13  ;;  %v3241_v42 = vsub.f32 %v669_v44, %v5501_v13  ;;  %v3244_v26 = vsub.f32 %v670_v16, %v5501_v13  ;;  %v5528_v3 = vld [vmem:[#allocation31_spill] sm:$0xff]  ;;  %v5529_v14 = vld [vmem:[#allocation37_spill] sm:$0xff] }
  0x93   : > { %5512 = vst [vmem:[#allocation42_spill] sm:$0xff] %v3201_v18  ;;  %5513 = vst [vmem:[#allocation147_spill] sm:$0xff] %v3206_v36  ;;  %v5531_v44 = vld [vmem:[#allocation48_spill] sm:$0xff]  ;;  %v5532_v16 = vld [vmem:[#allocation51_spill] sm:$0xff] }
  0x94   : > { %5514 = vst [vmem:[#allocation46_spill] sm:$0xff] %v3209_v54  ;;  %5515 = vst [vmem:[#allocation148_spill] sm:$0xff] %v3212_v35  ;;  %v5608_v54 = vld [vmem:[#allocation109_spill] sm:$0xff]  ;;  %v5609_v36 = vld [vmem:[#allocation110_spill] sm:$0xff] }
  0x95   : > { %5516 = vst [vmem:[#allocation47_spill] sm:$0xff] %v3215_v23  ;;  %5517 = vst [vmem:[#allocation49_spill] sm:$0xff] %v3220_v25  ;;  %v3238_v23 = vsub.f32 %v668_v31, %v5501_v13  ;;  %v5530_v31 = vld [vmem:[#allocation43_spill] sm:$0xff]  ;;  %v5606_v25 = vld [vmem:[#allocation106_spill] sm:$0xff] }
  0x96   : > { %5518 = vst [vmem:[#allocation50_spill] sm:$0xff] %v3223_v48  ;;  %5519 = vst [vmem:[#allocation52_spill] sm:$0xff] %v3226_v34  ;;  %v696_v34 = vmul.f32 %v2557_v63, %v5526_v9  ;;  %v5533_v48 = vld [vmem:[#allocation54_spill] sm:$0xff]  ;;  %v5534_v9 = vld [vmem:[#allocation57_spill] sm:$0xff] }
  0x97   : > { %5520 = vst [vmem:[#allocation53_spill] sm:$0xff] %v3229_v61  ;;  %5521 = vst [vmem:[#allocation56_spill] sm:$0xff] %v3232_v28  ;;  %v697_v61 = vmul.f32 %v2580_v47, %v5527_v29  ;;  %v698_v28 = vmul.f32 %v2603_v53, %v5528_v3  ;;  %v703_v63 = vmul.f32 %v2715_v40, %v5533_v48  ;;  %v5535_v29 = vld [vmem:[#allocation58_spill] sm:$0xff]  ;;  %v5536_v3 = vld [vmem:[#allocation59_spill] sm:$0xff] }
  0x98   : > { %5522 = vst [vmem:[#allocation32_spill] sm:$0xff] %v3235_v7  ;;  %5523 = vst [vmem:[#allocation162_spill] sm:$0xff] %v3238_v23  ;;  %v699_v7 = vmul.f32 %v2626_v2, %v5529_v14  ;;  %v700_v23 = vmul.f32 %v2649_v55, %v5530_v31  ;;  %v704_v47 = vmul.f32 %v5415_v51, %v5534_v9  ;;  %v5537_v14 = vld [vmem:[#allocation60_spill] sm:$0xff]  ;;  %v5538_v31 = vld [vmem:[#allocation61_spill] sm:$0xff] }
  0x99   : > { %5524 = vst [vmem:[#allocation163_spill] sm:$0xff] %v3241_v42  ;;  %5525 = vst [vmem:[#allocation164_spill] sm:$0xff] %v3244_v26  ;;  %v701_v42 = vmul.f32 %v2675_v37, %v5531_v44  ;;  %v702_v26 = vmul.f32 %v2695_v49, %v5532_v16  ;;  %v705_v53 = vmul.f32 %v5418_v39, %v5535_v29  ;;  %v5539_v44 = vld [vmem:[#allocation62_spill] sm:$0xff]  ;;  %v5540_v16 = vld [vmem:[#allocation63_spill] sm:$0xff] }
  0x9a   : > { %v706_v2 = vmul.f32 %v2766_v24, %v5536_v3  ;;  %v707_v55 = vmul.f32 %v2783_v38, %v5537_v14  ;;  %v708_v37 = vmul.f32 %v2802_v17, %v5538_v31  ;;  %v709_v49 = vmul.f32 %v2825_v50, %v5539_v44  ;;  %v5541_v48 = vld [vmem:[#allocation64_spill] sm:$0xff]  ;;  %v5542_v9 = vld [vmem:[#allocation65_spill] sm:$0xff]  ;;  %v5543_v29 = vld [vmem:[#allocation66_spill] sm:$0xff] }
  0x9b   : > { %v710_v40 = vmul.f32 %v2848_v33, %v5540_v16  ;;  %v711_v51 = vmul.f32 %v2871_v20, %v5541_v48  ;;  %v712_v39 = vmul.f32 %v5490_v59, %v5542_v9  ;;  %v713_v24 = vmul.f32 %v5492_v52, %v5543_v29  ;;  %v5544_v3 = vld [vmem:[#allocation67_spill] sm:$0xff]  ;;  %v5545_v14 = vld [vmem:[#allocation68_spill] sm:$0xff]  ;;  %v5546_v31 = vld [vmem:[#allocation69_spill] sm:$0xff] }
  0x9c   : > { %v714_v38 = vmul.f32 %v2910_v12, %v5544_v3  ;;  %v715_v17 = vmul.f32 %v2920_v56, %v5545_v14  ;;  %v716_v50 = vmul.f32 %v2925_v57, %v5546_v31  ;;  %v5547_v44 = vld [vmem:[#allocation70_spill] sm:$0xff]  ;;  %v5548_v16 = vld [vmem:[#allocation71_spill] sm:$0xff]  ;;  %v5549_v48 = vld [vmem:[#allocation72_spill] sm:$0xff] }
  0x9d   : > { %v717_v33 = vmul.f32 %v2930_v0, %v5547_v44  ;;  %v718_v20 = vmul.f32 %v2935_v30, %v5548_v16  ;;  %v719_v59 = vmul.f32 %v2940_v62, %v5549_v48  ;;  %v5550_v9 = vld [vmem:[#allocation38_spill] sm:$0xff]  ;;  %v5575_v29 = vld [vmem:[#allocation73_spill] sm:$0xff]  ;;  %v5578_v14 = vld [vmem:[#allocation123_spill] sm:$0xff] }
  0x9e   : > { %v3295_v52 = vsub.f32 %v696_v34, %v5550_v9  ;;  %v3298_v12 = vsub.f32 %v697_v61, %v5550_v9  ;;  %v3301_v56 = vsub.f32 %v698_v28, %v5550_v9  ;;  %v3304_v57 = vsub.f32 %v699_v7, %v5550_v9  ;;  %v5580_v44 = vld [vmem:[#allocation14_spill] sm:$0xff]  ;;  %v5582_v48 = vld [vmem:[#allocation127_spill] sm:$0xff] }
  0x9f   : > { %v3307_v0 = vsub.f32 %v700_v23, %v5550_v9  ;;  %v3310_v30 = vsub.f32 %v701_v42, %v5550_v9  ;;  %v3313_v62 = vsub.f32 %v702_v26, %v5550_v9  ;;  %v3316_v34 = vsub.f32 %v703_v63, %v5550_v9  ;;  %v5610_v18 = vld [vmem:[#allocation111_spill] sm:$0xff]  ;;  %v5611_v46 = vld [vmem:[#allocation114_spill] sm:$0xff] }
  0xa0   : > { %5551 = vst [vmem:[#allocation19_spill] sm:$0xff] %v3295_v52  ;;  %5552 = vst [vmem:[#allocation25_spill] sm:$0xff] %v3298_v12  ;;  %v3319_v61 = vsub.f32 %v704_v47, %v5550_v9  ;;  %v3322_v28 = vsub.f32 %v705_v53, %v5550_v9  ;;  %v3325_v7 = vsub.f32 %v706_v2, %v5550_v9  ;;  %v5604_v12 = vld [vmem:[#allocation105_spill] sm:$0xff]  ;;  %v5612_v21 = vld [vmem:[#allocation26_spill] sm:$0xff] }
  0xa1   : > { %5553 = vst [vmem:[#allocation31_spill] sm:$0xff] %v3301_v56  ;;  %5554 = vst [vmem:[#allocation37_spill] sm:$0xff] %v3304_v57  ;;  %v3328_v23 = vsub.f32 %v707_v55, %v5550_v9  ;;  %v3331_v42 = vsub.f32 %v708_v37, %v5550_v9  ;;  %v3334_v26 = vsub.f32 %v709_v49, %v5550_v9  ;;  %v5602_v57 = vld [vmem:[#allocation102_spill] sm:$0xff] }
  0xa2   : > { %5555 = vst [vmem:[#allocation43_spill] sm:$0xff] %v3307_v0  ;;  %5556 = vst [vmem:[#allocation48_spill] sm:$0xff] %v3310_v30  ;;  %v3337_v63 = vsub.f32 %v710_v40, %v5550_v9  ;;  %v3340_v47 = vsub.f32 %v711_v51, %v5550_v9  ;;  %v3343_v53 = vsub.f32 %v712_v39, %v5550_v9  ;;  %v5600_v30 = vld [vmem:[#allocation101_spill] sm:$0xff] }
  0xa3   : > { %5557 = vst [vmem:[#allocation51_spill] sm:$0xff] %v3313_v62  ;;  %5558 = vst [vmem:[#allocation54_spill] sm:$0xff] %v3316_v34  ;;  %v3346_v2 = vsub.f32 %v713_v24, %v5550_v9  ;;  %v3349_v55 = vsub.f32 %v714_v38, %v5550_v9  ;;  %v3352_v37 = vsub.f32 %v715_v17, %v5550_v9  ;;  %v5576_v24 = vld [vmem:[#allocation10_spill] sm:$0xff]  ;;  %v5579_v17 = vld [vmem:[#allocation75_spill] sm:$0xff] }
  0xa4   : > { %5559 = vst [vmem:[#allocation57_spill] sm:$0xff] %v3319_v61  ;;  %5560 = vst [vmem:[#allocation58_spill] sm:$0xff] %v3322_v28  ;;  %v3355_v49 = vsub.f32 %v716_v50, %v5550_v9  ;;  %v3358_v40 = vsub.f32 %v717_v33, %v5550_v9  ;;  %v3361_v51 = vsub.f32 %v718_v20, %v5550_v9  ;;  %v5577_v38 = vld [vmem:[#allocation74_spill] sm:$0xff]  ;;  %v5581_v50 = vld [vmem:[#allocation76_spill] sm:$0xff] }
  0xa5   : > { %5561 = vst [vmem:[#allocation59_spill] sm:$0xff] %v3325_v7  ;;  %5562 = vst [vmem:[#allocation60_spill] sm:$0xff] %v3328_v23  ;;  %v3364_v39 = vsub.f32 %v719_v59, %v5550_v9  ;;  %v745_v3 = vmul.f32 %v5576_v24, %v5575_v29  ;;  %v746_v31 = vmul.f32 %v5578_v14, %v5577_v38  ;;  %v5583_v33 = vld [vmem:[#allocation77_spill] sm:$0xff]  ;;  %v5584_v20 = vld [vmem:[#allocation78_spill] sm:$0xff] }
  0xa6   : > { %5563 = vst [vmem:[#allocation61_spill] sm:$0xff] %v3331_v42  ;;  %5564 = vst [vmem:[#allocation62_spill] sm:$0xff] %v3334_v26  ;;  %v747_v16 = vmul.f32 %v5580_v44, %v5579_v17  ;;  %v5585_v59 = vld [vmem:[#allocation81_spill] sm:$0xff]  ;;  %v5594_v23 = vld [vmem:[#allocation94_spill] sm:$0xff] }
  0xa7   : > { %5565 = vst [vmem:[#allocation63_spill] sm:$0xff] %v3337_v63  ;;  %5566 = vst [vmem:[#allocation64_spill] sm:$0xff] %v3340_v47  ;;  %v5590_v47 = vld [vmem:[#allocation90_spill] sm:$0xff]  ;;  %v5592_v26 = vld [vmem:[#allocation93_spill] sm:$0xff] }
  0xa8   : > { %5567 = vst [vmem:[#allocation65_spill] sm:$0xff] %v3343_v53  ;;  %5568 = vst [vmem:[#allocation66_spill] sm:$0xff] %v3346_v2  ;;  %v5588_v2 = vld [vmem:[#allocation86_spill] sm:$0xff]  ;;  %v5589_v53 = vld [vmem:[#allocation89_spill] sm:$0xff] }
  0xa9   : > { %5569 = vst [vmem:[#allocation67_spill] sm:$0xff] %v3349_v55  ;;  %5570 = vst [vmem:[#allocation68_spill] sm:$0xff] %v3352_v37  ;;  %v5586_v37 = vld [vmem:[#allocation82_spill] sm:$0xff]  ;;  %v5587_v55 = vld [vmem:[#allocation85_spill] sm:$0xff]  ;;  %v754_v17 = vmul.f32 %v3050_v19, %v5588_v2 }
  0xaa   : > { %5571 = vst [vmem:[#allocation69_spill] sm:$0xff] %v3355_v49  ;;  %5572 = vst [vmem:[#allocation70_spill] sm:$0xff] %v3358_v40  ;;  %v748_v49 = vmul.f32 %v5582_v48, %v5581_v50  ;;  %v749_v40 = vmul.f32 %v2997_v58, %v5583_v33  ;;  %v752_v29 = vmul.f32 %v3028_v15, %v5586_v37  ;;  %v5591_v33 = vld [vmem:[#allocation153_spill] sm:$0xff]  ;;  %v5597_v37 = vld [vmem:[#allocation6_spill] sm:$0xff] }
  0xab   : > { %5573 = vst [vmem:[#allocation71_spill] sm:$0xff] %v3361_v51  ;;  %5574 = vst [vmem:[#allocation72_spill] sm:$0xff] %v3364_v39  ;;  %v750_v51 = vmul.f32 %v3005_v41, %v5584_v20  ;;  %v751_v39 = vmul.f32 %v3017_v4, %v5585_v59  ;;  %v753_v38 = vmul.f32 %v3039_v45, %v5587_v55  ;;  %v5593_v20 = vld [vmem:[#allocation157_spill] sm:$0xff]  ;;  %v5598_v34 = vld [vmem:[#allocation98_spill] sm:$0xff] }
  0xac   : > { %v755_v50 = vmul.f32 %v3063_v5, %v5589_v53  ;;  %v756_v63 = vmul.f32 %v5591_v33, %v5590_v47  ;;  %v757_v42 = vmul.f32 %v5593_v20, %v5592_v26  ;;  %v5595_v59 = vld [vmem:[#allocation161_spill] sm:$0xff]  ;;  %v5599_v55 = vld [vmem:[#allocation7_spill] sm:$0xff]  ;;  %v5601_v2 = vld [vmem:[#allocation8_spill] sm:$0xff] }
  0xad   : > { %v758_v7 = vmul.f32 %v5595_v59, %v5594_v23  ;;  %v5596_v28 = vld [vmem:[#allocation97_spill] sm:$0xff]  ;;  %v760_v62 = vmul.f32 %v5599_v55, %v5598_v34  ;;  %v761_v0 = vmul.f32 %v5601_v2, %v5600_v30  ;;  %v5605_v47 = vld [vmem:[#allocation11_spill] sm:$0xff]  ;;  %v5607_v26 = vld [vmem:[#allocation12_spill] sm:$0xff]  ;;  %v765_v23 = vmul.f32 %v3175_v8, %v5608_v54 }
  0xae   : > { %v759_v61 = vmul.f32 %v5597_v37, %v5596_v28  ;;  %v5603_v53 = vld [vmem:[#allocation9_spill] sm:$0xff]  ;;  %v763_v52 = vmul.f32 %v5605_v47, %v5604_v12  ;;  %v764_v35 = vmul.f32 %v5607_v26, %v5606_v25  ;;  %v766_v28 = vmul.f32 %v3189_v32, %v5609_v36 }
  0xaf   : > { %v762_v56 = vmul.f32 %v5603_v53, %v5602_v57  ;;  %v767_v34 = vmul.f32 %v3203_v22, %v5610_v18  ;;  %v768_v30 = vmul.f32 %v3217_v60, %v5611_v46  ;;  %v3415_v57 = vsub.f32 %v745_v3, %v5612_v21 }
  0xb0   : > { %v3418_v12 = vsub.f32 %v746_v31, %v5612_v21  ;;  %v3421_v25 = vsub.f32 %v747_v16, %v5612_v21  ;;  %v3424_v54 = vsub.f32 %v748_v49, %v5612_v21  ;;  %v3427_v36 = vsub.f32 %v749_v40, %v5612_v21 }
  0xb1   : > { %5613 = vst [vmem:[#allocation38_spill] sm:$0xff] %v3415_v57  ;;  %v3430_v18 = vsub.f32 %v750_v51, %v5612_v21  ;;  %v3433_v46 = vsub.f32 %v751_v39, %v5612_v21  ;;  %v3436_v3 = vsub.f32 %v752_v29, %v5612_v21  ;;  %v3439_v31 = vsub.f32 %v753_v38, %v5612_v21 }
  0xb2   : > { %5614 = vst [vmem:[#allocation73_spill] sm:$0xff] %v3418_v12  ;;  %5615 = vst [vmem:[#allocation10_spill] sm:$0xff] %v3421_v25  ;;  %v3442_v16 = vsub.f32 %v754_v17, %v5612_v21  ;;  %v3445_v49 = vsub.f32 %v755_v50, %v5612_v21  ;;  %v3448_v40 = vsub.f32 %v756_v63, %v5612_v21  ;;  %v5659_v25 = vld [vmem:[#allocation119_spill] sm:$0xff]  ;;  %v5660_v12 = vld [vmem:[#allocation120_spill] sm:$0xff] }
  0xb3   : > { %5616 = vst [vmem:[#allocation74_spill] sm:$0xff] %v3424_v54  ;;  %5617 = vst [vmem:[#allocation123_spill] sm:$0xff] %v3427_v36  ;;  %v3451_v51 = vsub.f32 %v757_v42, %v5612_v21  ;;  %v3454_v39 = vsub.f32 %v758_v7, %v5612_v21  ;;  %v3457_v29 = vsub.f32 %v759_v61, %v5612_v21  ;;  %v5657_v36 = vld [vmem:[#allocation117_spill] sm:$0xff]  ;;  %v5658_v54 = vld [vmem:[#allocation118_spill] sm:$0xff] }
  0xb4   : > { %5618 = vst [vmem:[#allocation75_spill] sm:$0xff] %v3430_v18  ;;  %5619 = vst [vmem:[#allocation14_spill] sm:$0xff] %v3433_v46  ;;  %v3460_v38 = vsub.f32 %v760_v62, %v5612_v21  ;;  %v3463_v17 = vsub.f32 %v761_v0, %v5612_v21  ;;  %v3466_v50 = vsub.f32 %v762_v56, %v5612_v21  ;;  %v5637_v56 = vld [vmem:[#allocation79_spill] sm:$0xff]  ;;  %v5656_v18 = vld [vmem:[#allocation116_spill] sm:$0xff] }
  0xb5   : > { %5620 = vst [vmem:[#allocation76_spill] sm:$0xff] %v3436_v3  ;;  %5621 = vst [vmem:[#allocation127_spill] sm:$0xff] %v3439_v31  ;;  %v3469_v63 = vsub.f32 %v763_v52, %v5612_v21  ;;  %v3472_v42 = vsub.f32 %v764_v35, %v5612_v21  ;;  %v3475_v7 = vsub.f32 %v765_v23, %v5612_v21  ;;  %v5638_v52 = vld [vmem:[#allocation80_spill] sm:$0xff]  ;;  %v5639_v35 = vld [vmem:[#allocation83_spill] sm:$0xff] }
  0xb6   : > { %5622 = vst [vmem:[#allocation77_spill] sm:$0xff] %v3442_v16  ;;  %5623 = vst [vmem:[#allocation78_spill] sm:$0xff] %v3445_v49  ;;  %v3478_v61 = vsub.f32 %v766_v28, %v5612_v21  ;;  %v3481_v62 = vsub.f32 %v767_v34, %v5612_v21  ;;  %v3484_v0 = vsub.f32 %v768_v30, %v5612_v21  ;;  %v5640_v23 = vld [vmem:[#allocation84_spill] sm:$0xff]  ;;  %v5641_v28 = vld [vmem:[#allocation87_spill] sm:$0xff] }
  0xb7   : > { %5624 = vst [vmem:[#allocation81_spill] sm:$0xff] %v3448_v40  ;;  %5625 = vst [vmem:[#allocation82_spill] sm:$0xff] %v3451_v51  ;;  %v5642_v34 = vld [vmem:[#allocation88_spill] sm:$0xff]  ;;  %v5643_v21 = vld [vmem:[#allocation91_spill] sm:$0xff] }
  0xb8   : > { %5626 = vst [vmem:[#allocation85_spill] sm:$0xff] %v3454_v39  ;;  %5627 = vst [vmem:[#allocation86_spill] sm:$0xff] %v3457_v29  ;;  %v799_v30 = vmul.f32 %v3017_v4, %v5643_v21  ;;  %v5647_v29 = vld [vmem:[#allocation99_spill] sm:$0xff]  ;;  %v5648_v39 = vld [vmem:[#allocation100_spill] sm:$0xff] }
  0xb9   : > { %5628 = vst [vmem:[#allocation89_spill] sm:$0xff] %v3460_v38  ;;  %5629 = vst [vmem:[#allocation90_spill] sm:$0xff] %v3463_v17  ;;  %v5645_v17 = vld [vmem:[#allocation95_spill] sm:$0xff]  ;;  %v5646_v38 = vld [vmem:[#allocation96_spill] sm:$0xff] }
  0xba   : > { %5630 = vst [vmem:[#allocation153_spill] sm:$0xff] %v3466_v50  ;;  %5631 = vst [vmem:[#allocation93_spill] sm:$0xff] %v3469_v63  ;;  %v793_v50 = vmul.f32 %v5576_v24, %v5637_v56  ;;  %v794_v63 = vmul.f32 %v5578_v14, %v5638_v52  ;;  %v801_v52 = vmul.f32 %v3039_v45, %v5645_v17  ;;  %v5649_v51 = vld [vmem:[#allocation103_spill] sm:$0xff]  ;;  %v5650_v40 = vld [vmem:[#allocation104_spill] sm:$0xff] }
  0xbb   : > { %5632 = vst [vmem:[#allocation157_spill] sm:$0xff] %v3472_v42  ;;  %5633 = vst [vmem:[#allocation94_spill] sm:$0xff] %v3475_v7  ;;  %v795_v42 = vmul.f32 %v5580_v44, %v5639_v35  ;;  %v796_v7 = vmul.f32 %v5582_v48, %v5640_v23  ;;  %v802_v35 = vmul.f32 %v3050_v19, %v5646_v38  ;;  %v5651_v49 = vld [vmem:[#allocation107_spill] sm:$0xff]  ;;  %v5652_v16 = vld [vmem:[#allocation108_spill] sm:$0xff] }
  0xbc   : > { %5634 = vst [vmem:[#allocation161_spill] sm:$0xff] %v3478_v61  ;;  %5635 = vst [vmem:[#allocation97_spill] sm:$0xff] %v3481_v62  ;;  %v797_v61 = vmul.f32 %v2997_v58, %v5641_v28  ;;  %v798_v62 = vmul.f32 %v3005_v41, %v5642_v34  ;;  %v803_v23 = vmul.f32 %v3063_v5, %v5647_v29  ;;  %v5653_v31 = vld [vmem:[#allocation112_spill] sm:$0xff]  ;;  %v5654_v3 = vld [vmem:[#allocation113_spill] sm:$0xff] }
  0xbd   : > { %5636 = vst [vmem:[#allocation6_spill] sm:$0xff] %v3484_v0  ;;  %v5644_v0 = vld [vmem:[#allocation92_spill] sm:$0xff]  ;;  %v804_v28 = vmul.f32 %v5591_v33, %v5648_v39  ;;  %v805_v34 = vmul.f32 %v5593_v20, %v5649_v51  ;;  %v806_v21 = vmul.f32 %v5595_v59, %v5650_v40  ;;  %v808_v17 = vmul.f32 %v5599_v55, %v5652_v16  ;;  %v5655_v46 = vld [vmem:[#allocation115_spill] sm:$0xff] }
  0xbe   : > { %v800_v56 = vmul.f32 %v3028_v15, %v5644_v0  ;;  %v807_v0 = vmul.f32 %v5597_v37, %v5651_v49  ;;  %v809_v38 = vmul.f32 %v5601_v2, %v5653_v31  ;;  %v810_v29 = vmul.f32 %v5603_v53, %v5654_v3 }
  0xbf   : > { %v811_v39 = vmul.f32 %v5605_v47, %v5655_v46  ;;  %v812_v51 = vmul.f32 %v5607_v26, %v5656_v18  ;;  %v813_v40 = vmul.f32 %v3175_v8, %v5657_v36  ;;  %v814_v49 = vmul.f32 %v3189_v32, %v5658_v54 }
  0xc0   : > { %v815_v16 = vmul.f32 %v3203_v22, %v5659_v25  ;;  %v816_v31 = vmul.f32 %v3217_v60, %v5660_v12  ;;  %v3535_v3 = vsub.f32 %v793_v50, %v5501_v13  ;;  %v3538_v46 = vsub.f32 %v794_v63, %v5501_v13 }
  0xc1   : > { %v3541_v18 = vsub.f32 %v795_v42, %v5501_v13  ;;  %v3544_v36 = vsub.f32 %v796_v7, %v5501_v13  ;;  %v3547_v54 = vsub.f32 %v797_v61, %v5501_v13  ;;  %v3550_v25 = vsub.f32 %v798_v62, %v5501_v13 }
  0xc2   : > { %5661 = vst [vmem:[#allocation98_spill] sm:$0xff] %v3535_v3  ;;  %5662 = vst [vmem:[#allocation7_spill] sm:$0xff] %v3538_v46  ;;  %v3553_v12 = vsub.f32 %v799_v30, %v5501_v13  ;;  %v3556_v50 = vsub.f32 %v800_v56, %v5501_v13  ;;  %v3559_v63 = vsub.f32 %v801_v52, %v5501_v13 }
  0xc3   : > { %5663 = vst [vmem:[#allocation101_spill] sm:$0xff] %v3541_v18  ;;  %5664 = vst [vmem:[#allocation8_spill] sm:$0xff] %v3544_v36  ;;  %v3562_v42 = vsub.f32 %v802_v35, %v5501_v13  ;;  %v3565_v7 = vsub.f32 %v803_v23, %v5501_v13  ;;  %v3568_v61 = vsub.f32 %v804_v28, %v5501_v13 }
  0xc4   : > { %5665 = vst [vmem:[#allocation102_spill] sm:$0xff] %v3547_v54  ;;  %5666 = vst [vmem:[#allocation9_spill] sm:$0xff] %v3550_v25  ;;  %v3571_v62 = vsub.f32 %v805_v34, %v5501_v13  ;;  %v3574_v30 = vsub.f32 %v806_v21, %v5501_v13  ;;  %v3577_v56 = vsub.f32 %v807_v0, %v5501_v13 }
  0xc5   : > { %5667 = vst [vmem:[#allocation105_spill] sm:$0xff] %v3553_v12  ;;  %5668 = vst [vmem:[#allocation11_spill] sm:$0xff] %v3556_v50  ;;  %v3580_v52 = vsub.f32 %v808_v17, %v5501_v13  ;;  %v3583_v35 = vsub.f32 %v809_v38, %v5501_v13  ;;  %v3586_v23 = vsub.f32 %v810_v29, %v5501_v13  ;;  %v5685_v29 = vld [vmem:[#allocation121_spill] sm:$0xff] }
  0xc6   : > { %5669 = vst [vmem:[#allocation106_spill] sm:$0xff] %v3559_v63  ;;  %5670 = vst [vmem:[#allocation12_spill] sm:$0xff] %v3562_v42  ;;  %v3589_v28 = vsub.f32 %v811_v39, %v5501_v13  ;;  %v3592_v34 = vsub.f32 %v812_v51, %v5501_v13  ;;  %v3595_v21 = vsub.f32 %v813_v40, %v5501_v13  ;;  %v5686_v39 = vld [vmem:[#allocation122_spill] sm:$0xff]  ;;  %v5687_v51 = vld [vmem:[#allocation124_spill] sm:$0xff] }
  0xc7   : > { %5671 = vst [vmem:[#allocation109_spill] sm:$0xff] %v3565_v7  ;;  %5672 = vst [vmem:[#allocation110_spill] sm:$0xff] %v3568_v61  ;;  %v3598_v0 = vsub.f32 %v814_v49, %v5501_v13  ;;  %v3601_v17 = vsub.f32 %v815_v16, %v5501_v13  ;;  %v3604_v38 = vsub.f32 %v816_v31, %v5501_v13  ;;  %v5688_v40 = vld [vmem:[#allocation125_spill] sm:$0xff]  ;;  %v5689_v49 = vld [vmem:[#allocation126_spill] sm:$0xff] }
  0xc8   : > { %5673 = vst [vmem:[#allocation111_spill] sm:$0xff] %v3571_v62  ;;  %5674 = vst [vmem:[#allocation114_spill] sm:$0xff] %v3574_v30  ;;  %v5690_v16 = vld [vmem:[#allocation128_spill] sm:$0xff]  ;;  %v5691_v13 = vld [vmem:[#allocation129_spill] sm:$0xff] }
  0xc9   : > { %5675 = vst [vmem:[#allocation26_spill] sm:$0xff] %v3577_v56  ;;  %5676 = vst [vmem:[#allocation79_spill] sm:$0xff] %v3580_v52  ;;  %v847_v31 = vmul.f32 %v3017_v4, %v5691_v13  ;;  %v5699_v13 = vld [vmem:[#allocation137_spill] sm:$0xff]  ;;  %v5767_v52 = vld [vmem:[#allocation50_spill] sm:$0xff] }
  0xca   : > { %5677 = vst [vmem:[#allocation80_spill] sm:$0xff] %v3583_v35  ;;  %5678 = vst [vmem:[#allocation83_spill] sm:$0xff] %v3586_v23  ;;  %v841_v23 = vmul.f32 %v5576_v24, %v5685_v29  ;;  %v5693_v29 = vld [vmem:[#allocation131_spill] sm:$0xff]  ;;  %v5766_v35 = vld [vmem:[#allocation49_spill] sm:$0xff] }
  0xcb   : > { %5679 = vst [vmem:[#allocation84_spill] sm:$0xff] %v3589_v28  ;;  %5680 = vst [vmem:[#allocation87_spill] sm:$0xff] %v3592_v34  ;;  %v842_v28 = vmul.f32 %v5578_v14, %v5686_v39  ;;  %v843_v34 = vmul.f32 %v5580_v44, %v5687_v51  ;;  %v849_v14 = vmul.f32 %v3039_v45, %v5693_v29  ;;  %v5694_v39 = vld [vmem:[#allocation132_spill] sm:$0xff]  ;;  %v5695_v51 = vld [vmem:[#allocation133_spill] sm:$0xff] }
  0xcc   : > { %5681 = vst [vmem:[#allocation88_spill] sm:$0xff] %v3595_v21  ;;  %5682 = vst [vmem:[#allocation91_spill] sm:$0xff] %v3598_v0  ;;  %v844_v21 = vmul.f32 %v5582_v48, %v5688_v40  ;;  %v845_v0 = vmul.f32 %v2997_v58, %v5689_v49  ;;  %v850_v44 = vmul.f32 %v3050_v19, %v5694_v39  ;;  %v5696_v40 = vld [vmem:[#allocation134_spill] sm:$0xff]  ;;  %v5697_v49 = vld [vmem:[#allocation135_spill] sm:$0xff] }
  0xcd   : > { %5683 = vst [vmem:[#allocation92_spill] sm:$0xff] %v3601_v17  ;;  %5684 = vst [vmem:[#allocation95_spill] sm:$0xff] %v3604_v38  ;;  %v846_v17 = vmul.f32 %v3005_v41, %v5690_v16  ;;  %v5692_v38 = vld [vmem:[#allocation130_spill] sm:$0xff]  ;;  %v851_v48 = vmul.f32 %v3063_v5, %v5695_v51  ;;  %v852_v58 = vmul.f32 %v5591_v33, %v5696_v40  ;;  %v5698_v16 = vld [vmem:[#allocation136_spill] sm:$0xff] }
  0xce   : > { %v848_v24 = vmul.f32 %v3028_v15, %v5692_v38  ;;  %v853_v41 = vmul.f32 %v5593_v20, %v5697_v49  ;;  %v854_v4 = vmul.f32 %v5595_v59, %v5698_v16  ;;  %v855_v15 = vmul.f32 %v5597_v37, %v5699_v13  ;;  %v5700_v38 = vld [vmem:[#allocation138_spill] sm:$0xff]  ;;  %v5701_v29 = vld [vmem:[#allocation139_spill] sm:$0xff]  ;;  %v5702_v39 = vld [vmem:[#allocation140_spill] sm:$0xff] }
  0xcf   : > { %v856_v45 = vmul.f32 %v5599_v55, %v5700_v38  ;;  %v857_v19 = vmul.f32 %v5601_v2, %v5701_v29  ;;  %v858_v5 = vmul.f32 %v5603_v53, %v5702_v39  ;;  %v5703_v51 = vld [vmem:[#allocation141_spill] sm:$0xff]  ;;  %v5704_v40 = vld [vmem:[#allocation142_spill] sm:$0xff]  ;;  %v5705_v49 = vld [vmem:[#allocation143_spill] sm:$0xff]  ;;  %v3655_v53 = vsub.f32 %v841_v23, %v5550_v9 }
  0xd0   : > { %v859_v33 = vmul.f32 %v5605_v47, %v5703_v51  ;;  %v860_v20 = vmul.f32 %v5607_v26, %v5704_v40  ;;  %v861_v59 = vmul.f32 %v3175_v8, %v5705_v49  ;;  %v5706_v16 = vld [vmem:[#allocation144_spill] sm:$0xff]  ;;  %v5707_v13 = vld [vmem:[#allocation145_spill] sm:$0xff]  ;;  %v5708_v38 = vld [vmem:[#allocation146_spill] sm:$0xff]  ;;  %v3658_v47 = vsub.f32 %v842_v28, %v5550_v9 }
  0xd1   : > { %v862_v37 = vmul.f32 %v3189_v32, %v5706_v16  ;;  %v863_v55 = vmul.f32 %v3203_v22, %v5707_v13  ;;  %v864_v2 = vmul.f32 %v3217_v60, %v5708_v38  ;;  %5709 = vst [vmem:[#allocation96_spill] sm:$0xff] %v3655_v53  ;;  %v3661_v26 = vsub.f32 %v843_v34, %v5550_v9  ;;  %v5740_v38 = vld [vmem:[#allocation33_spill] sm:$0xff]  ;;  %v5765_v53 = vld [vmem:[#allocation47_spill] sm:$0xff]  ;;  %v5768_v56 = vld [vmem:[#allocation52_spill] sm:$0xff] }
  0xd2   : > { %5710 = vst [vmem:[#allocation99_spill] sm:$0xff] %v3658_v47  ;;  %v3664_v8 = vsub.f32 %v844_v21, %v5550_v9  ;;  %v3667_v32 = vsub.f32 %v845_v0, %v5550_v9  ;;  %v3670_v22 = vsub.f32 %v846_v17, %v5550_v9  ;;  %v3673_v60 = vsub.f32 %v847_v31, %v5550_v9  ;;  %v5764_v47 = vld [vmem:[#allocation148_spill] sm:$0xff]  ;;  %v5769_v30 = vld [vmem:[#allocation53_spill] sm:$0xff]  ;;  %v5772_v7 = vld [vmem:[#allocation162_spill] sm:$0xff] }
  0xd3   : > { %5711 = vst [vmem:[#allocation100_spill] sm:$0xff] %v3661_v26  ;;  %v3676_v23 = vsub.f32 %v848_v24, %v5550_v9  ;;  %v3679_v28 = vsub.f32 %v849_v14, %v5550_v9  ;;  %v3682_v34 = vsub.f32 %v850_v44, %v5550_v9  ;;  %v3685_v21 = vsub.f32 %v851_v48, %v5550_v9  ;;  %v5763_v26 = vld [vmem:[#allocation46_spill] sm:$0xff]  ;;  %v5770_v62 = vld [vmem:[#allocation56_spill] sm:$0xff]  ;;  %v5773_v42 = vld [vmem:[#allocation163_spill] sm:$0xff] }
  0xd4   : > { %5712 = vst [vmem:[#allocation103_spill] sm:$0xff] %v3664_v8  ;;  %5713 = vst [vmem:[#allocation104_spill] sm:$0xff] %v3667_v32  ;;  %v3688_v0 = vsub.f32 %v852_v58, %v5550_v9  ;;  %v3691_v17 = vsub.f32 %v853_v41, %v5550_v9  ;;  %v3694_v31 = vsub.f32 %v854_v4, %v5550_v9  ;;  %v5761_v32 = vld [vmem:[#allocation42_spill] sm:$0xff]  ;;  %v5762_v8 = vld [vmem:[#allocation147_spill] sm:$0xff] }
  0xd5   : > { %5714 = vst [vmem:[#allocation107_spill] sm:$0xff] %v3670_v22  ;;  %5715 = vst [vmem:[#allocation108_spill] sm:$0xff] %v3673_v60  ;;  %v3697_v24 = vsub.f32 %v855_v15, %v5550_v9  ;;  %v3700_v14 = vsub.f32 %v856_v45, %v5550_v9  ;;  %v3703_v44 = vsub.f32 %v857_v19, %v5550_v9  ;;  %v5733_v19 = vld [vmem:[#allocation15_spill] sm:$0xff]  ;;  %v5759_v60 = vld [vmem:[#allocation36_spill] sm:$0xff] }
  0xd6   : > { %5716 = vst [vmem:[#allocation112_spill] sm:$0xff] %v3676_v23  ;;  %5717 = vst [vmem:[#allocation113_spill] sm:$0xff] %v3679_v28  ;;  %v3706_v48 = vsub.f32 %v858_v5, %v5550_v9  ;;  %v3709_v58 = vsub.f32 %v859_v33, %v5550_v9  ;;  %v3712_v41 = vsub.f32 %v860_v20, %v5550_v9  ;;  %v5734_v5 = vld [vmem:[#allocation16_spill] sm:$0xff]  ;;  %v5736_v20 = vld [vmem:[#allocation21_spill] sm:$0xff] }
  0xd7   : > { %5718 = vst [vmem:[#allocation115_spill] sm:$0xff] %v3682_v34  ;;  %5719 = vst [vmem:[#allocation116_spill] sm:$0xff] %v3685_v21  ;;  %v3715_v4 = vsub.f32 %v861_v59, %v5550_v9  ;;  %v3718_v15 = vsub.f32 %v862_v37, %v5550_v9  ;;  %v3721_v45 = vsub.f32 %v863_v55, %v5550_v9  ;;  %v5735_v33 = vld [vmem:[#allocation20_spill] sm:$0xff]  ;;  %v5737_v59 = vld [vmem:[#allocation22_spill] sm:$0xff] }
  0xd8   : > { %5720 = vst [vmem:[#allocation117_spill] sm:$0xff] %v3688_v0  ;;  %5721 = vst [vmem:[#allocation118_spill] sm:$0xff] %v3691_v17  ;;  %v3724_v29 = vsub.f32 %v864_v2, %v5550_v9  ;;  %v889_v39 = vmul.f32 %v5733_v19, %v5733_v19  ;;  %v890_v51 = vmul.f32 %v5734_v5, %v5734_v5  ;;  %v5738_v37 = vld [vmem:[#allocation27_spill] sm:$0xff]  ;;  %v5739_v9 = vld [vmem:[#allocation28_spill] sm:$0xff] }
  0xd9   : > { %5722 = vst [vmem:[#allocation119_spill] sm:$0xff] %v3694_v31  ;;  %5723 = vst [vmem:[#allocation120_spill] sm:$0xff] %v3697_v24  ;;  %v891_v40 = vmul.f32 %v5735_v33, %v5735_v33  ;;  %v892_v49 = vmul.f32 %v5736_v20, %v5736_v20  ;;  %v893_v16 = vmul.f32 %v5737_v59, %v5737_v59  ;;  %v5741_v19 = vld [vmem:[#allocation34_spill] sm:$0xff]  ;;  %v5752_v31 = vld [vmem:[#allocation155_spill] sm:$0xff] }
  0xda   : > { %5724 = vst [vmem:[#allocation121_spill] sm:$0xff] %v3700_v14  ;;  %5725 = vst [vmem:[#allocation122_spill] sm:$0xff] %v3703_v44  ;;  %v894_v13 = vmul.f32 %v5738_v37, %v5738_v37  ;;  %v895_v55 = vmul.f32 %v5739_v9, %v5739_v9  ;;  %v896_v2 = vmul.f32 %v5740_v38, %v5740_v38  ;;  %v5749_v44 = vld [vmem:[#allocation151_spill] sm:$0xff]  ;;  %v5750_v14 = vld [vmem:[#allocation152_spill] sm:$0xff] }
  0xdb   : > { %5726 = vst [vmem:[#allocation124_spill] sm:$0xff] %v3706_v48  ;;  %5727 = vst [vmem:[#allocation125_spill] sm:$0xff] %v3709_v58  ;;  %v897_v5 = vmul.f32 %v5741_v19, %v5741_v19  ;;  %v5747_v58 = vld [vmem:[#allocation149_spill] sm:$0xff]  ;;  %v5748_v48 = vld [vmem:[#allocation150_spill] sm:$0xff] }
  0xdc   : > { %5728 = vst [vmem:[#allocation126_spill] sm:$0xff] %v3712_v41  ;;  %5729 = vst [vmem:[#allocation128_spill] sm:$0xff] %v3715_v4  ;;  %v5745_v4 = vld [vmem:[#allocation45_spill] sm:$0xff]  ;;  %v5746_v41 = vld [vmem:[#allocation55_spill] sm:$0xff]  ;;  %v903_v38 = vmul.f32 %v5747_v58, %v5747_v58  ;;  %v904_v19 = vmul.f32 %v5748_v48, %v5748_v48 }
  0xdd   : > { %5730 = vst [vmem:[#allocation129_spill] sm:$0xff] %v3718_v15  ;;  %5731 = vst [vmem:[#allocation130_spill] sm:$0xff] %v3721_v45  ;;  %v5743_v45 = vld [vmem:[#allocation40_spill] sm:$0xff]  ;;  %v901_v37 = vmul.f32 %v5745_v4, %v5745_v4  ;;  %v902_v9 = vmul.f32 %v5746_v41, %v5746_v41  ;;  %v5751_v24 = vld [vmem:[#allocation154_spill] sm:$0xff]  ;;  %v908_v4 = vmul.f32 %v5752_v31, %v5752_v31 }
  0xde   : > { %5732 = vst [vmem:[#allocation131_spill] sm:$0xff] %v3724_v29  ;;  %v5742_v29 = vld [vmem:[#allocation39_spill] sm:$0xff]  ;;  %v899_v20 = vmul.f32 %v5743_v45, %v5743_v45  ;;  %v5744_v15 = vld [vmem:[#allocation44_spill] sm:$0xff]  ;;  %v906_v45 = vmul.f32 %v5750_v14, %v5750_v14  ;;  %v5754_v0 = vld [vmem:[#allocation158_spill] sm:$0xff]  ;;  %v913_v14 = vmul.f32 %v3167_v1, %v3167_v1  ;;  %v915_v31 = vmul.f32 %v3173_v43, %v3173_v43 }
  0xdf   : > { %v898_v33 = vmul.f32 %v5742_v29, %v5742_v29  ;;  %v900_v59 = vmul.f32 %v5744_v15, %v5744_v15  ;;  %v905_v29 = vmul.f32 %v5749_v44, %v5749_v44  ;;  %v907_v15 = vmul.f32 %v5751_v24, %v5751_v24  ;;  %v5753_v17 = vld [vmem:[#allocation156_spill] sm:$0xff]  ;;  %v5755_v21 = vld [vmem:[#allocation159_spill] sm:$0xff]  ;;  %v5760_v22 = vld [vmem:[#allocation41_spill] sm:$0xff] }
  0xe0   : > { %v909_v41 = vmul.f32 %v5753_v17, %v5753_v17  ;;  %v910_v58 = vmul.f32 %v5754_v0, %v5754_v0  ;;  %v911_v48 = vmul.f32 %v5755_v21, %v5755_v21  ;;  %v5756_v34 = vld [vmem:[#allocation160_spill] sm:$0xff]  ;;  %v914_v24 = vmul.f32 %v3170_v10, %v3170_v10  ;;  %v5758_v23 = vld [vmem:[#allocation35_spill] sm:$0xff] }
  0xe1   : > { %v912_v44 = vmul.f32 %v5756_v34, %v5756_v34  ;;  %v916_v17 = vmul.f32 %v3178_v11, %v3178_v11  ;;  %v5757_v28 = vld [vmem:[#allocation24_spill] sm:$0xff]  ;;  %v918_v21 = vmul.f32 %v3184_v27, %v3184_v27  ;;  %v919_v34 = vmul.f32 %v3187_v6, %v3187_v6 }
  0xe2   : > { %v917_v0 = vmul.f32 %v5757_v28, %v5757_v28  ;;  %v920_v1 = vmul.f32 %v5758_v23, %v5758_v23  ;;  %v921_v10 = vmul.f32 %v5759_v60, %v5759_v60  ;;  %v922_v43 = vmul.f32 %v5760_v22, %v5760_v22  ;;  %v5771_v61 = vld [vmem:[#allocation32_spill] sm:$0xff] }
  0xe3   : > { %v923_v11 = vmul.f32 %v5761_v32, %v5761_v32  ;;  %v924_v28 = vmul.f32 %v5762_v8, %v5762_v8  ;;  %v925_v27 = vmul.f32 %v5763_v26, %v5763_v26  ;;  %v926_v6 = vmul.f32 %v5764_v47, %v5764_v47  ;;  %v5774_v63 = vld [vmem:[#allocation164_spill] sm:$0xff] }
  0xe4   : > { %v927_v23 = vmul.f32 %v5765_v53, %v5765_v53  ;;  %v928_v60 = vmul.f32 %v5766_v35, %v5766_v35  ;;  %v929_v22 = vmul.f32 %v5767_v52, %v5767_v52  ;;  %v930_v32 = vmul.f32 %v5768_v56, %v5768_v56 }
  0xe5   : > { %v931_v8 = vmul.f32 %v5769_v30, %v5769_v30  ;;  %v932_v26 = vmul.f32 %v5770_v62, %v5770_v62  ;;  %v933_v47 = vmul.f32 %v5771_v61, %v5771_v61  ;;  %v934_v53 = vmul.f32 %v5772_v7, %v5772_v7 }
  0xe6   : > { %v935_v35 = vmul.f32 %v5773_v42, %v5773_v42  ;;  %v936_v52 = vmul.f32 %v5774_v63, %v5774_v63  ;;  %v937_v50 = vadd.f32 %v913_v14, %v889_v39  ;;  %v938_v56 = vadd.f32 %v914_v24, %v890_v51 }
  0xe7   : > { %v939_v12 = vadd.f32 %v915_v31, %v891_v40  ;;  %v940_v25 = vadd.f32 %v916_v17, %v892_v49  ;;  %v941_v30 = vadd.f32 %v917_v0, %v893_v16  ;;  %v942_v54 = vadd.f32 %v918_v21, %v894_v13  ;;  %v5775_v0 = vld [vmem:[#allocation19_spill] sm:$0xff] }
  0xe8   : > { %v943_v36 = vadd.f32 %v919_v34, %v895_v55  ;;  %v944_v62 = vadd.f32 %v920_v1, %v896_v2  ;;  %v945_v18 = vadd.f32 %v921_v10, %v897_v5  ;;  %v946_v46 = vadd.f32 %v922_v43, %v898_v33  ;;  %v5776_v1 = vld [vmem:[#allocation25_spill] sm:$0xff]  ;;  %v5777_v43 = vld [vmem:[#allocation31_spill] sm:$0xff]  ;;  %v5790_v33 = vld [vmem:[#allocation64_spill] sm:$0xff] }
  0xe9   : > { %v947_v61 = vadd.f32 %v923_v11, %v899_v20  ;;  %v948_v3 = vadd.f32 %v924_v28, %v900_v59  ;;  %v949_v57 = vadd.f32 %v925_v27, %v901_v37  ;;  %v950_v7 = vadd.f32 %v926_v6, %v902_v9  ;;  %v5778_v11 = vld [vmem:[#allocation37_spill] sm:$0xff]  ;;  %v5784_v28 = vld [vmem:[#allocation58_spill] sm:$0xff]  ;;  %v5793_v9 = vld [vmem:[#allocation67_spill] sm:$0xff] }
  0xea   : > { %v951_v42 = vadd.f32 %v927_v23, %v903_v38  ;;  %v952_v63 = vadd.f32 %v928_v60, %v904_v19  ;;  %v953_v14 = vadd.f32 %v929_v22, %v905_v29  ;;  %v954_v39 = vadd.f32 %v930_v32, %v906_v45  ;;  %v5779_v22 = vld [vmem:[#allocation43_spill] sm:$0xff]  ;;  %v5783_v60 = vld [vmem:[#allocation57_spill] sm:$0xff]  ;;  %v5788_v45 = vld [vmem:[#allocation62_spill] sm:$0xff] }
  0xeb   : > { %v955_v24 = vadd.f32 %v931_v8, %v907_v15  ;;  %v956_v51 = vadd.f32 %v932_v26, %v908_v4  ;;  %v957_v31 = vadd.f32 %v933_v47, %v909_v41  ;;  %v958_v40 = vadd.f32 %v934_v53, %v910_v58  ;;  %v5780_v26 = vld [vmem:[#allocation48_spill] sm:$0xff]  ;;  %v5782_v47 = vld [vmem:[#allocation54_spill] sm:$0xff]  ;;  %v5787_v4 = vld [vmem:[#allocation61_spill] sm:$0xff] }
  0xec   : > { %v959_v17 = vadd.f32 %v935_v35, %v911_v48  ;;  %v960_v49 = vadd.f32 %v936_v52, %v912_v44  ;;  %v961_v34 = vmul.f32 %v5775_v0, %v5775_v0  ;;  %v962_v10 = vmul.f32 %v5776_v1, %v5776_v1  ;;  %v5781_v35 = vld [vmem:[#allocation51_spill] sm:$0xff]  ;;  %v5786_v58 = vld [vmem:[#allocation60_spill] sm:$0xff]  ;;  %v5791_v59 = vld [vmem:[#allocation65_spill] sm:$0xff] }
  0xed   : > { %v963_v27 = vmul.f32 %v5777_v43, %v5777_v43  ;;  %v964_v6 = vmul.f32 %v5778_v11, %v5778_v11  ;;  %v965_v8 = vmul.f32 %v5779_v22, %v5779_v22  ;;  %v966_v53 = vmul.f32 %v5780_v26, %v5780_v26  ;;  %v5785_v44 = vld [vmem:[#allocation59_spill] sm:$0xff]  ;;  %v5792_v37 = vld [vmem:[#allocation66_spill] sm:$0xff]  ;;  %v5794_v38 = vld [vmem:[#allocation68_spill] sm:$0xff] }
  0xee   : > { %v967_v52 = vmul.f32 %v5781_v35, %v5781_v35  ;;  %v968_v32 = vmul.f32 %v5782_v47, %v5782_v47  ;;  %v969_v23 = vmul.f32 %v5783_v60, %v5783_v60  ;;  %v970_v21 = vmul.f32 %v5784_v28, %v5784_v28  ;;  %v5789_v19 = vld [vmem:[#allocation63_spill] sm:$0xff] }
  0xef   : > { %v971_v48 = vmul.f32 %v5785_v44, %v5785_v44  ;;  %v972_v41 = vmul.f32 %v5786_v58, %v5786_v58  ;;  %v973_v15 = vmul.f32 %v5787_v4, %v5787_v4  ;;  %v974_v29 = vmul.f32 %v5788_v45, %v5788_v45  ;;  %v5795_v4 = vld [vmem:[#allocation69_spill] sm:$0xff]  ;;  %v5796_v58 = vld [vmem:[#allocation70_spill] sm:$0xff] }
  0xf0   : > { %v975_v5 = vmul.f32 %v5789_v19, %v5789_v19  ;;  %v976_v20 = vmul.f32 %v5790_v33, %v5790_v33  ;;  %v977_v16 = vmul.f32 %v5791_v59, %v5791_v59  ;;  %v978_v13 = vmul.f32 %v5792_v37, %v5792_v37  ;;  %v5797_v33 = vld [vmem:[#allocation71_spill] sm:$0xff]  ;;  %v5798_v59 = vld [vmem:[#allocation72_spill] sm:$0xff] }
  0xf1   : > { %v979_v55 = vmul.f32 %v5793_v9, %v5793_v9  ;;  %v980_v2 = vmul.f32 %v5794_v38, %v5794_v38  ;;  %v981_v45 = vmul.f32 %v5795_v4, %v5795_v4  ;;  %v982_v19 = vmul.f32 %v5796_v58, %v5796_v58 }
  0xf2   : > { %v985_v44 = vadd.f32 %v961_v34, %v937_v50  ;;  %v983_v28 = vmul.f32 %v5797_v33, %v5797_v33  ;;  %v984_v60 = vmul.f32 %v5798_v59, %v5798_v59  ;;  %v986_v37 = vadd.f32 %v962_v10, %v938_v56  ;;  %v5803_v56 = vld [vmem:[#allocation123_spill] sm:$0xff] }
  0xf3   : > { %v987_v47 = vadd.f32 %v963_v27, %v939_v12  ;;  %v988_v35 = vadd.f32 %v964_v6, %v940_v25  ;;  %v989_v9 = vadd.f32 %v965_v8, %v941_v30  ;;  %v990_v26 = vadd.f32 %v966_v53, %v942_v54  ;;  %v5808_v27 = vld [vmem:[#allocation77_spill] sm:$0xff] }
  0xf4   : > { %v991_v22 = vadd.f32 %v967_v52, %v943_v36  ;;  %v992_v38 = vadd.f32 %v968_v32, %v944_v62  ;;  %v993_v11 = vadd.f32 %v969_v23, %v945_v18  ;;  %v994_v43 = vadd.f32 %v970_v21, %v946_v46  ;;  %v5799_v18 = vld [vmem:[#allocation38_spill] sm:$0xff] }
  0xf5   : > { %v995_v4 = vadd.f32 %v971_v48, %v947_v61  ;;  %v996_v1 = vadd.f32 %v972_v41, %v948_v3  ;;  %v997_v0 = vadd.f32 %v973_v15, %v949_v57  ;;  %v998_v58 = vadd.f32 %v974_v29, %v950_v7  ;;  %v5801_v7 = vld [vmem:[#allocation10_spill] sm:$0xff]  ;;  %v5816_v41 = vld [vmem:[#allocation153_spill] sm:$0xff] }
  0xf6   : > { %1931 = vrsqrt.f32 %v985_v44  ;;  %v999_v50 = vadd.f32 %v975_v5, %v951_v42  ;;  %v1000_v34 = vadd.f32 %v976_v20, %v952_v63  ;;  %v3870_v33 = vadd.f32 %v977_v16, %v953_v14  ;;  %v5800_v63 = vld [vmem:[#allocation73_spill] sm:$0xff]  ;;  %v5802_v62 = vld [vmem:[#allocation74_spill] sm:$0xff] }
  0xf7   : > { %1933 = vrsqrt.f32 %v986_v37  ;;  %v3872_v59 = vadd.f32 %v978_v13, %v954_v39  ;;  %v3874_v12 = vadd.f32 %v979_v55, %v955_v24  ;;  %v3876_v25 = vadd.f32 %v980_v2, %v956_v51  ;;  %v5804_v39 = vld [vmem:[#allocation75_spill] sm:$0xff]  ;;  %v5805_v51 = vld [vmem:[#allocation14_spill] sm:$0xff]  ;;  %v5818_v29 = vld [vmem:[#allocation157_spill] sm:$0xff] }
  0xf8   : > { %1935 = vrsqrt.f32 %v987_v47  ;;  %v3878_v36 = vadd.f32 %v981_v45, %v957_v31  ;;  %v3880_v46 = vadd.f32 %v982_v19, %v958_v40  ;;  %v3882_v3 = vadd.f32 %v983_v28, %v959_v17  ;;  %v5806_v40 = vld [vmem:[#allocation76_spill] sm:$0xff]  ;;  %v5812_v47 = vld [vmem:[#allocation85_spill] sm:$0xff]  ;;  %v5815_v21 = vld [vmem:[#allocation90_spill] sm:$0xff] }
  0xf9   : > { %1937 = vrsqrt.f32 %v988_v35  ;;  %v3884_v57 = vadd.f32 %v984_v60, %v960_v49  ;;  %v3888_v54 = vmul.f32 %v5799_v18, %v5799_v18  ;;  %v3892_v42 = vmul.f32 %v5800_v63, %v5800_v63  ;;  %v5807_v49 = vld [vmem:[#allocation127_spill] sm:$0xff]  ;;  %v5811_v35 = vld [vmem:[#allocation82_spill] sm:$0xff]  ;;  %v5814_v28 = vld [vmem:[#allocation89_spill] sm:$0xff] }
  0xfa   : > { %1939 = vrsqrt.f32 %v989_v9  ;;  %v3896_v61 = vmul.f32 %v5801_v7, %v5801_v7  ;;  %v3900_v30 = vmul.f32 %v5802_v62, %v5802_v62  ;;  %v3904_v14 = vmul.f32 %v5803_v56, %v5803_v56  ;;  %v5813_v60 = vld [vmem:[#allocation86_spill] sm:$0xff]  ;;  %v5817_v45 = vld [vmem:[#allocation93_spill] sm:$0xff] }
  0xfb   : > { %1941 = vrsqrt.f32 %v990_v26  ;;  %v3908_v24 = vmul.f32 %v5804_v39, %v5804_v39  ;;  %v3912_v31 = vmul.f32 %v5805_v51, %v5805_v51  ;;  %v3916_v17 = vmul.f32 %v5806_v40, %v5806_v40  ;;  %v5810_v26 = vld [vmem:[#allocation81_spill] sm:$0xff]  ;;  %v5819_v20 = vld [vmem:[#allocation94_spill] sm:$0xff] }
  0xfc   : > { %1943 = vrsqrt.f32 %v991_v22  ;;  %v3920_v10 = vmul.f32 %v5807_v49, %v5807_v49  ;;  %v3924_v6 = vmul.f32 %v5808_v27, %v5808_v27  ;;  %v5809_v22 = vld [vmem:[#allocation78_spill] sm:$0xff]  ;;  %v3932_v53 = vmul.f32 %v5810_v26, %v5810_v26  ;;  %v5820_v37 = vld [vmem:[#allocation161_spill] sm:$0xff] }
  0xfd   : > { %1945 = vrsqrt.f32 %v992_v38  ;;  %v3928_v8 = vmul.f32 %v5809_v22, %v5809_v22  ;;  %v3936_v52 = vmul.f32 %v5811_v35, %v5811_v35  ;;  %v3940_v32 = vmul.f32 %v5812_v47, %v5812_v47  ;;  %v5821_v13 = vld [vmem:[#allocation97_spill] sm:$0xff]  ;;  %v5822_v38 = vld [vmem:[#allocation6_spill] sm:$0xff] }
  0xfe   : > { %1947 = vrsqrt.f32 %v993_v11  ;;  %v3944_v23 = vmul.f32 %v5813_v60, %v5813_v60  ;;  %v3948_v11 = vmul.f32 %v5814_v28, %v5814_v28  ;;  %v3952_v44 = vmul.f32 %v5815_v21, %v5815_v21  ;;  %v5826_v28 = vld [vmem:[#allocation8_spill] sm:$0xff]  ;;  %v5827_v60 = vld [vmem:[#allocation102_spill] sm:$0xff]  ;;  %v5829_v35 = vld [vmem:[#allocation9_spill] sm:$0xff] }
  0xff   : > { %1949 = vrsqrt.f32 %v994_v43  ;;  %v3956_v15 = vmul.f32 %v5816_v41, %v5816_v41  ;;  %v3960_v43 = vmul.f32 %v5817_v45, %v5817_v45  ;;  %v3964_v19 = vmul.f32 %v5818_v29, %v5818_v29  ;;  %v5823_v29 = vld [vmem:[#allocation98_spill] sm:$0xff]  ;;  %v5824_v45 = vld [vmem:[#allocation7_spill] sm:$0xff]  ;;  %v5830_v22 = vld [vmem:[#allocation105_spill] sm:$0xff] }
 0x100   : > { %v1932_v48 = vpop.eup %1931  ;;  %1951 = vrsqrt.f32 %v995_v4  ;;  %v3968_v16 = vmul.f32 %v5819_v20, %v5819_v20  ;;  %v3972_v4 = vmul.f32 %v5820_v37, %v5820_v37  ;;  %v3976_v9 = vmul.f32 %v5821_v13, %v5821_v13  ;;  %v5825_v37 = vld [vmem:[#allocation101_spill] sm:$0xff]  ;;  %v5833_v49 = vld [vmem:[#allocation106_spill] sm:$0xff] }
 0x101   : > { %v1934_v5 = vpop.eup %1933  ;;  %1953 = vrsqrt.f32 %v996_v1  ;;  %v3980_v2 = vmul.f32 %v5822_v38, %v5822_v38  ;;  %v1081_v1 = vmul.f32 %v5823_v29, %v5823_v29  ;;  %v1082_v20 = vmul.f32 %v5824_v45, %v5824_v45  ;;  %v5836_v29 = vld [vmem:[#allocation109_spill] sm:$0xff] }
 0x102   : > { %v1936_v55 = vpop.eup %1935  ;;  %1955 = vrsqrt.f32 %v997_v0  ;;  %v1083_v21 = vmul.f32 %v5825_v37, %v5825_v37  ;;  %v1084_v13 = vmul.f32 %v5826_v28, %v5826_v28  ;;  %v1085_v0 = vmul.f32 %v5827_v60, %v5827_v60  ;;  %v5832_v37 = vld [vmem:[#allocation11_spill] sm:$0xff] }
 0x103   : > { %v1938_v41 = vpop.eup %1937  ;;  %1957 = vrsqrt.f32 %v998_v58  ;;  %v3992_v38 = vmin.f32 %v1932_v48, 1e+12  ;;  %v1086_v26 = vmul.f32 %v5829_v35, %v5829_v35  ;;  %v1087_v45 = vmul.f32 %v5830_v22, %v5830_v22  ;;  %v5835_v48 = vld [vmem:[#allocation12_spill] sm:$0xff] }
 0x104   : > { %v1940_v47 = vpop.eup %1939  ;;  %1959 = vrsqrt.f32 %v999_v50  ;;  %v3998_v27 = vmin.f32 %v1934_v5, 1e+12  ;;  %v1088_v28 = vmul.f32 %v5832_v37, %v5832_v37  ;;  %v1089_v60 = vmul.f32 %v5833_v49, %v5833_v49  ;;  %v5838_v37 = vld [vmem:[#allocation110_spill] sm:$0xff]  ;;  %v5839_v49 = vld [vmem:[#allocation111_spill] sm:$0xff] }
 0x105   : > { %5828 = vst [vmem:[#allocation132_spill] sm:$0xff] %v3992_v38  ;;  %v1942_v58 = vpop.eup %1941  ;;  %1961 = vrsqrt.f32 %v1000_v34  ;;  %v4005_v50 = vmin.f32 %v1936_v55, 1e+12  ;;  %v1090_v35 = vmul.f32 %v5835_v48, %v5835_v48  ;;  %v1091_v22 = vmul.f32 %v5836_v29, %v5836_v29  ;;  %v5841_v48 = vld [vmem:[#allocation114_spill] sm:$0xff] }
 0x106   : > { %5831 = vst [vmem:[#allocation133_spill] sm:$0xff] %v3998_v27  ;;  %v1944_v40 = vpop.eup %1943  ;;  %1963 = vrsqrt.f32 %v3870_v33  ;;  %v4012_v5 = vmin.f32 %v1938_v41, 1e+12  ;;  %v1092_v51 = vmul.f32 %v5838_v37, %v5838_v37  ;;  %v1093_v39 = vmul.f32 %v5839_v49, %v5839_v49  ;;  %v5842_v29 = vld [vmem:[#allocation26_spill] sm:$0xff]  ;;  %v5844_v37 = vld [vmem:[#allocation79_spill] sm:$0xff]  ;;  %v5845_v49 = vld [vmem:[#allocation80_spill] sm:$0xff] }
 0x107   : > { %5834 = vst [vmem:[#allocation134_spill] sm:$0xff] %v4005_v50  ;;  %v1946_v34 = vpop.eup %1945  ;;  %1965 = vrsqrt.f32 %v3872_v59  ;;  %v4019_v55 = vmin.f32 %v1940_v47, 1e+12  ;;  %v1094_v56 = vmul.f32 %v5841_v48, %v5841_v48  ;;  %v1095_v62 = vmul.f32 %v5842_v29, %v5842_v29  ;;  %v5847_v48 = vld [vmem:[#allocation83_spill] sm:$0xff]  ;;  %v5848_v29 = vld [vmem:[#allocation84_spill] sm:$0xff] }
 0x108   : > { %5837 = vst [vmem:[#allocation135_spill] sm:$0xff] %v4012_v5  ;;  %v1948_v33 = vpop.eup %1947  ;;  %1967 = vrsqrt.f32 %v3874_v12  ;;  %v4026_v41 = vmin.f32 %v1942_v58, 1e+12  ;;  %v1096_v7 = vmul.f32 %v5844_v37, %v5844_v37  ;;  %v1097_v63 = vmul.f32 %v5845_v49, %v5845_v49  ;;  %v5851_v5 = vld [vmem:[#allocation88_spill] sm:$0xff]  ;;  %v5852_v50 = vld [vmem:[#allocation91_spill] sm:$0xff] }
 0x109   : > { %5840 = vst [vmem:[#allocation136_spill] sm:$0xff] %v4019_v55  ;;  %v1950_v59 = vpop.eup %1949  ;;  %1969 = vrsqrt.f32 %v3876_v25  ;;  %v4033_v47 = vmin.f32 %v1944_v40, 1e+12  ;;  %v1098_v18 = vmul.f32 %v5847_v48, %v5847_v48  ;;  %v1099_v55 = vmul.f32 %v5848_v29, %v5848_v29  ;;  %v5854_v48 = vld [vmem:[#allocation92_spill] sm:$0xff]  ;;  %v5855_v27 = vld [vmem:[#allocation95_spill] sm:$0xff] }
 0x10a   : > { %5843 = vst [vmem:[#allocation137_spill] sm:$0xff] %v4026_v41  ;;  %v1952_v12 = vpop.eup %1951  ;;  %1971 = vrsqrt.f32 %v3878_v36  ;;  %v4039_v58 = vmin.f32 %v1946_v34, 1e+12  ;;  %v5850_v41 = vld [vmem:[#allocation87_spill] sm:$0xff]  ;;  %v1101_v49 = vmul.f32 %v5851_v5, %v5851_v5  ;;  %v1102_v36 = vmul.f32 %v5852_v50, %v5852_v50 }
 0x10b   : > { %5846 = vst [vmem:[#allocation138_spill] sm:$0xff] %v4033_v47  ;;  %v1954_v25 = vpop.eup %1953  ;;  %v1100_v37 = vmul.f32 %v5850_v41, %v5850_v41  ;;  %1973 = vrsqrt.f32 %v3880_v46  ;;  %v4048_v47 = vmin.f32 %v1948_v33, 1e+12  ;;  %v1103_v29 = vmul.f32 %v5854_v48, %v5854_v48 }
 0x10c   : > { %5849 = vst [vmem:[#allocation139_spill] sm:$0xff] %v4039_v58  ;;  %v1956_v40 = vpop.eup %1955  ;;  %v1104_v34 = vmul.f32 %v5855_v27, %v5855_v27  ;;  %1975 = vrsqrt.f32 %v3882_v3  ;;  %v4055_v41 = vmin.f32 %v1950_v59, 1e+12  ;;  %v1105_v5 = vadd.f32 %v1081_v1, %v3888_v54  ;;  %v5873_v1 = vld [vmem:[#allocation107_spill] sm:$0xff] }
 0x10d   : > { %5853 = vst [vmem:[#allocation140_spill] sm:$0xff] %v4048_v47  ;;  %v1958_v58 = vpop.eup %1957  ;;  %v1106_v50 = vadd.f32 %v1082_v20, %v3892_v42  ;;  %1977 = vrsqrt.f32 %v3884_v57  ;;  %v4060_v46 = vmin.f32 %v1952_v12, 1e+12  ;;  %v1107_v33 = vadd.f32 %v1083_v21, %v3896_v61  ;;  %v5874_v12 = vld [vmem:[#allocation108_spill] sm:$0xff] }
 0x10e   : > { %5856 = vst [vmem:[#allocation141_spill] sm:$0xff] %v4055_v41  ;;  %v1960_v38 = vpop.eup %1959  ;;  %v1108_v48 = vadd.f32 %v1084_v13, %v3900_v30  ;;  %v4064_v27 = vmin.f32 %v1954_v25, 1e+12  ;;  %v1109_v3 = vadd.f32 %v1085_v0, %v3904_v14  ;;  %v4068_v59 = vadd.f32 %v1086_v26, %v3908_v24 }
 0x10f   : > { %5857 = vst [vmem:[#allocation142_spill] sm:$0xff] %v4060_v46  ;;  %v1962_v47 = vpop.eup %1961  ;;  %v4071_v54 = vadd.f32 %v1087_v45, %v3912_v31  ;;  %v4073_v20 = vmin.f32 %v1956_v40, 1e+12  ;;  %v4075_v57 = vmin.f32 %v1958_v58, 1e+12  ;;  %v4078_v61 = vadd.f32 %v1088_v28, %v3916_v17  ;;  %v5876_v58 = vld [vmem:[#allocation113_spill] sm:$0xff] }
 0x110   : > { %5858 = vst [vmem:[#allocation143_spill] sm:$0xff] %v4064_v27  ;;  %v1964_v42 = vpop.eup %1963  ;;  %v4081_v30 = vadd.f32 %v1089_v60, %v3920_v10  ;;  %v4083_v13 = vmin.f32 %v1960_v38, 1e+12  ;;  %v4086_v14 = vadd.f32 %v1090_v35, %v3924_v6  ;;  %v4089_v24 = vadd.f32 %v1091_v22, %v3928_v8 }
 0x111   : > { %5859 = vst [vmem:[#allocation144_spill] sm:$0xff] %v4073_v20  ;;  %5860 = vst [vmem:[#allocation145_spill] sm:$0xff] %v4075_v57  ;;  %v1966_v21 = vpop.eup %1965  ;;  %v4092_v31 = vadd.f32 %v1092_v51, %v3932_v53  ;;  %v4094_v45 = vmin.f32 %v1962_v47, 1e+12  ;;  %v4097_v17 = vadd.f32 %v1093_v39, %v3936_v52  ;;  %v4100_v10 = vadd.f32 %v1094_v56, %v3940_v32  ;;  %v5864_v52 = vld [vmem:[#allocation96_spill] sm:$0xff] }
 0x112   : > { %5861 = vst [vmem:[#allocation146_spill] sm:$0xff] %v4083_v13  ;;  %v1968_v26 = vpop.eup %1967  ;;  %v4103_v60 = vadd.f32 %v1095_v62, %v3944_v23  ;;  %v4105_v35 = vmin.f32 %v1964_v42, 1e+12  ;;  %v4108_v22 = vadd.f32 %v1096_v7, %v3948_v11  ;;  %v4111_v51 = vadd.f32 %v1097_v63, %v3952_v44  ;;  %v5866_v23 = vld [vmem:[#allocation99_spill] sm:$0xff] }
 0x113   : > { %5862 = vst [vmem:[#allocation165_spill] sm:$0xff] %v4094_v45  ;;  %v1970_v6 = vpop.eup %1969  ;;  %v4114_v8 = vadd.f32 %v1098_v18, %v3956_v15  ;;  %v4117_v53 = vadd.f32 %v1099_v55, %v3960_v43  ;;  %v4120_v56 = vadd.f32 %v1100_v37, %v3964_v19  ;;  %v4123_v62 = vadd.f32 %v1101_v49, %v3968_v16  ;;  %v5869_v43 = vld [vmem:[#allocation100_spill] sm:$0xff]  ;;  %v5878_v42 = vld [vmem:[#allocation115_spill] sm:$0xff] }
 0x114   : > { %5863 = vst [vmem:[#allocation166_spill] sm:$0xff] %v4105_v35  ;;  %v1972_v39 = vpop.eup %1971  ;;  %v1129_v7 = vmul.f32 %v5864_v52, %v5864_v52  ;;  %v4127_v32 = vmin.f32 %v1966_v21, 1e+12  ;;  %v4130_v63 = vadd.f32 %v1102_v36, %v3972_v4  ;;  %v4133_v18 = vadd.f32 %v1103_v29, %v3976_v9  ;;  %v5871_v4 = vld [vmem:[#allocation103_spill] sm:$0xff]  ;;  %v5872_v9 = vld [vmem:[#allocation104_spill] sm:$0xff] }
 0x115   : > { %v1130_v28 = vmul.f32 %v5866_v23, %v5866_v23  ;;  %v1974_v11 = vpop.eup %1973  ;;  %v4137_v44 = vmin.f32 %v1968_v26, 1e+12  ;;  %v4139_v15 = vmin.f32 %v1970_v6, 1e+12  ;;  %v1128_v49 = vadd.f32 %v1104_v34, %v3980_v2  ;;  %v5875_v2 = vld [vmem:[#allocation112_spill] sm:$0xff] }
 0x116   : > { %5865 = vst [vmem:[#allocation167_spill] sm:$0xff] %v4127_v32  ;;  %v1131_v19 = vmul.f32 %v5869_v43, %v5869_v43  ;;  %v1976_v16 = vpop.eup %1975  ;;  %v4144_v37 = vmin.f32 %v1972_v39, 1e+12  ;;  %v1132_v29 = vmul.f32 %v5871_v4, %v5871_v4  ;;  %v1133_v38 = vmul.f32 %v5872_v9, %v5872_v9  ;;  %v5879_v26 = vld [vmem:[#allocation116_spill] sm:$0xff]  ;;  %v5881_v9 = vld [vmem:[#allocation117_spill] sm:$0xff]  ;;  %v5882_v4 = vld [vmem:[#allocation118_spill] sm:$0xff] }
 0x117   : > { %5867 = vst [vmem:[#allocation168_spill] sm:$0xff] %v4137_v44  ;;  %5868 = vst [vmem:[#allocation169_spill] sm:$0xff] %v4139_v15  ;;  %v1134_v0 = vmul.f32 %v5873_v1, %v5873_v1  ;;  %v1978_v55 = vpop.eup %1977  ;;  %v1135_v47 = vmul.f32 %v5874_v12, %v5874_v12  ;;  %v1136_v25 = vmul.f32 %v5875_v2, %v5875_v2  ;;  %v4158_v34 = vmin.f32 %v1974_v11, 1e+12  ;;  %v5885_v11 = vld [vmem:[#allocation120_spill] sm:$0xff] }
 0x118   : > { %5870 = vst [vmem:[#allocation170_spill] sm:$0xff] %v4144_v37  ;;  %v1137_v36 = vmul.f32 %v5876_v58, %v5876_v58  ;;  %v1153_v40 = vadd.f32 %v1129_v7, %v1105_v5  ;;  %v1138_v21 = vmul.f32 %v5878_v42, %v5878_v42  ;;  %v1139_v6 = vmul.f32 %v5879_v26, %v5879_v26  ;;  %v5884_v5 = vld [vmem:[#allocation119_spill] sm:$0xff]  ;;  %v5886_v26 = vld [vmem:[#allocation121_spill] sm:$0xff]  ;;  %v5888_v52 = vld [vmem:[#allocation124_spill] sm:$0xff] }
 0x119   : > { %5877 = vst [vmem:[#allocation171_spill] sm:$0xff] %v4158_v34  ;;  %v1154_v39 = vadd.f32 %v1130_v28, %v1106_v50  ;;  %v4164_v1 = vmin.f32 %v1976_v16, 1e+12  ;;  %v1140_v12 = vmul.f32 %v5881_v9, %v5881_v9  ;;  %v1141_v2 = vmul.f32 %v5882_v4, %v5882_v4  ;;  %v5887_v28 = vld [vmem:[#allocation122_spill] sm:$0xff] }
 0x11a   : > { %v1155_v43 = vadd.f32 %v1131_v19, %v1107_v33  ;;  %v4170_v58 = vmin.f32 %v1978_v55, 1e+12  ;;  %v1142_v7 = vmul.f32 %v5884_v5, %v5884_v5  ;;  %v1143_v42 = vmul.f32 %v5885_v11, %v5885_v11  ;;  %v5889_v19 = vld [vmem:[#allocation125_spill] sm:$0xff]  ;;  %v5890_v4 = vld [vmem:[#allocation126_spill] sm:$0xff] }
 0x11b   : > { %5880 = vst [vmem:[#allocation172_spill] sm:$0xff] %v4164_v1  ;;  %v1156_v23 = vadd.f32 %v1132_v29, %v1108_v48  ;;  %v1144_v50 = vmul.f32 %v5886_v26, %v5886_v26  ;;  %v1145_v16 = vmul.f32 %v5887_v28, %v5887_v28  ;;  %v1157_v9 = vadd.f32 %v1133_v38, %v1109_v3  ;;  %v5891_v29 = vld [vmem:[#allocation128_spill] sm:$0xff]  ;;  %v5892_v3 = vld [vmem:[#allocation129_spill] sm:$0xff]  ;;  %v5923_v28 = vld [vmem:[#allocation155_spill] sm:$0xff] }
 0x11c   : > { %5883 = vst [vmem:[#allocation173_spill] sm:$0xff] %v4170_v58  ;;  %1979 = vrsqrt.f32 %v1153_v40  ;;  %v1146_v33 = vmul.f32 %v5888_v52, %v5888_v52  ;;  %v1147_v55 = vmul.f32 %v5889_v19, %v5889_v19  ;;  %v1158_v5 = vadd.f32 %v1134_v0, %v4068_v59  ;;  %v5893_v40 = vld [vmem:[#allocation130_spill] sm:$0xff]  ;;  %v5894_v59 = vld [vmem:[#allocation131_spill] sm:$0xff] }
 0x11d   : > { %1981 = vrsqrt.f32 %v1154_v39  ;;  %v1148_v48 = vmul.f32 %v5890_v4, %v5890_v4  ;;  %v1149_v26 = vmul.f32 %v5891_v29, %v5891_v29  ;;  %v1159_v11 = vadd.f32 %v1135_v47, %v4071_v54 }
 0x11e   : > { %1983 = vrsqrt.f32 %v1155_v43  ;;  %v1150_v38 = vmul.f32 %v5892_v3, %v5892_v3  ;;  %v1151_v52 = vmul.f32 %v5893_v40, %v5893_v40  ;;  %v1160_v19 = vadd.f32 %v1136_v25, %v4078_v61  ;;  %v5921_v3 = vld [vmem:[#allocation152_spill] sm:$0xff] }
 0x11f   : > { %1985 = vrsqrt.f32 %v1156_v23  ;;  %v1152_v0 = vmul.f32 %v5894_v59, %v5894_v59  ;;  %v1161_v39 = vadd.f32 %v1137_v36, %v4081_v30  ;;  %v1162_v4 = vadd.f32 %v1138_v21, %v4086_v14  ;;  %v5901_v36 = vld [vmem:[#allocation21_spill] sm:$0xff]  ;;  %v5920_v59 = vld [vmem:[#allocation151_spill] sm:$0xff] }
 0x120   : > { %1987 = vrsqrt.f32 %v1157_v9  ;;  %v1163_v54 = vadd.f32 %v1139_v6, %v4089_v24  ;;  %v1164_v43 = vadd.f32 %v1140_v12, %v4092_v31  ;;  %v1165_v47 = vadd.f32 %v1141_v2, %v4097_v17  ;;  %v5898_v12 = vld [vmem:[#allocation133_spill] sm:$0xff]  ;;  %v5900_v2 = vld [vmem:[#allocation134_spill] sm:$0xff] }
 0x121   : > { %1989 = vrsqrt.f32 %v1158_v5  ;;  %v1166_v40 = vadd.f32 %v1142_v7, %v4100_v10  ;;  %v1167_v61 = vadd.f32 %v1143_v42, %v4103_v60  ;;  %v1168_v23 = vadd.f32 %v1144_v50, %v4108_v22  ;;  %v5895_v22 = vld [vmem:[#allocation15_spill] sm:$0xff]  ;;  %v5904_v42 = vld [vmem:[#allocation136_spill] sm:$0xff]  ;;  %v5906_v6 = vld [vmem:[#allocation137_spill] sm:$0xff] }
 0x122   : > { %1991 = vrsqrt.f32 %v1159_v11  ;;  %v1169_v25 = vadd.f32 %v1145_v16, %v4111_v51  ;;  %v1170_v30 = vadd.f32 %v1146_v33, %v4114_v8  ;;  %v1171_v14 = vadd.f32 %v1147_v55, %v4117_v53  ;;  %v5896_v51 = vld [vmem:[#allocation132_spill] sm:$0xff]  ;;  %v5908_v11 = vld [vmem:[#allocation138_spill] sm:$0xff]  ;;  %v5909_v33 = vld [vmem:[#allocation33_spill] sm:$0xff] }
 0x123   : > { %1993 = vrsqrt.f32 %v1160_v19  ;;  %v1172_v24 = vadd.f32 %v1148_v48, %v4120_v56  ;;  %v1173_v31 = vadd.f32 %v1149_v26, %v4123_v62  ;;  %v1174_v17 = vadd.f32 %v1150_v38, %v4130_v63  ;;  %v5897_v53 = vld [vmem:[#allocation16_spill] sm:$0xff]  ;;  %v5905_v26 = vld [vmem:[#allocation27_spill] sm:$0xff]  ;;  %v5911_v48 = vld [vmem:[#allocation34_spill] sm:$0xff] }
 0x124   : > { %1995 = vrsqrt.f32 %v1161_v39  ;;  %v4212_v10 = vadd.f32 %v1151_v52, %v4133_v18  ;;  %v4214_v60 = vadd.f32 %v1152_v0, %v1128_v49  ;;  %v4218_v9 = vmul.f32 %v5896_v51, %v5895_v22  ;;  %v5899_v62 = vld [vmem:[#allocation20_spill] sm:$0xff]  ;;  %v5902_v52 = vld [vmem:[#allocation135_spill] sm:$0xff] }
 0x125   : > { %1997 = vrsqrt.f32 %v1162_v4  ;;  %v4222_v56 = vmul.f32 %v5898_v12, %v5897_v53  ;;  %v4226_v63 = vmul.f32 %v5900_v2, %v5899_v62  ;;  %v4230_v18 = vmul.f32 %v5902_v52, %v5901_v36  ;;  %v5903_v4 = vld [vmem:[#allocation22_spill] sm:$0xff]  ;;  %v5907_v7 = vld [vmem:[#allocation28_spill] sm:$0xff]  ;;  %v5910_v19 = vld [vmem:[#allocation139_spill] sm:$0xff] }
 0x126   : > { %v1980_v8 = vpop.eup %1979  ;;  %1999 = vrsqrt.f32 %v1163_v54  ;;  %v4234_v21 = vmul.f32 %v5904_v42, %v5903_v4  ;;  %v4238_v5 = vmul.f32 %v5906_v6, %v5905_v26  ;;  %v4242_v50 = vmul.f32 %v5908_v11, %v5907_v7  ;;  %v5912_v38 = vld [vmem:[#allocation140_spill] sm:$0xff]  ;;  %v5913_v39 = vld [vmem:[#allocation39_spill] sm:$0xff]  ;;  %v5916_v36 = vld [vmem:[#allocation45_spill] sm:$0xff] }
 0x127   : > { %v1982_v49 = vpop.eup %1981  ;;  %2001 = vrsqrt.f32 %v1164_v43  ;;  %v4246_v55 = vmul.f32 %v5910_v19, %v5909_v33  ;;  %v4250_v0 = vmul.f32 %v5912_v38, %v5911_v48  ;;  %v4254_v54 = vmul.f32 %v4055_v41, %v5913_v39  ;;  %v5914_v22 = vld [vmem:[#allocation40_spill] sm:$0xff]  ;;  %v5917_v7 = vld [vmem:[#allocation55_spill] sm:$0xff]  ;;  %v5918_v48 = vld [vmem:[#allocation149_spill] sm:$0xff] }
 0x128   : > { %v1984_v16 = vpop.eup %1983  ;;  %2003 = vrsqrt.f32 %v1165_v47  ;;  %v4258_v53 = vmul.f32 %v4060_v46, %v5914_v22  ;;  %v5915_v62 = vld [vmem:[#allocation44_spill] sm:$0xff]  ;;  %v4266_v4 = vmul.f32 %v4073_v20, %v5916_v36  ;;  %v4270_v33 = vmul.f32 %v4075_v57, %v5917_v7  ;;  %v5919_v39 = vld [vmem:[#allocation150_spill] sm:$0xff] }
 0x129   : > { %v1986_v43 = vpop.eup %1985  ;;  %2005 = vrsqrt.f32 %v1166_v40  ;;  %v4262_v47 = vmul.f32 %v4064_v27, %v5915_v62  ;;  %v4274_v40 = vmul.f32 %v4083_v13, %v5918_v48  ;;  %v4278_v22 = vmul.f32 %v4094_v45, %v5919_v39  ;;  %v5922_v7 = vld [vmem:[#allocation154_spill] sm:$0xff]  ;;  %v5924_v45 = vld [vmem:[#allocation156_spill] sm:$0xff] }
 0x12a   : > { %v1988_v26 = vpop.eup %1987  ;;  %2007 = vrsqrt.f32 %v1167_v61  ;;  %v4282_v36 = vmul.f32 %v4105_v35, %v5920_v59  ;;  %v4286_v61 = vmul.f32 %v4127_v32, %v5921_v3  ;;  %v4290_v29 = vmul.f32 %v4137_v44, %v5922_v7  ;;  %v5925_v59 = vld [vmem:[#allocation158_spill] sm:$0xff]  ;;  %v5926_v32 = vld [vmem:[#allocation159_spill] sm:$0xff]  ;;  %v5927_v44 = vld [vmem:[#allocation160_spill] sm:$0xff] }
 0x12b   : > { %v1990_v62 = vpop.eup %1989  ;;  %2009 = vrsqrt.f32 %v1168_v23  ;;  %v4294_v39 = vmul.f32 %v4139_v15, %v5923_v28  ;;  %v4298_v23 = vmul.f32 %v4144_v37, %v5924_v45  ;;  %v4302_v35 = vmul.f32 %v4158_v34, %v5925_v59  ;;  %v5928_v28 = vld [vmem:[#allocation13_spill] sm:$0xff]  ;;  %v5932_v34 = vld [vmem:[#allocation18_spill] sm:$0xff] }
 0x12c   : > { %v1992_v48 = vpop.eup %1991  ;;  %2011 = vrsqrt.f32 %v1169_v25  ;;  %v4306_v7 = vmul.f32 %v4164_v1, %v5926_v32  ;;  %v4310_v25 = vmul.f32 %v4170_v58, %v5927_v44  ;;  %v4314_v15 = vmul.f32 %v5896_v51, %v5928_v28  ;;  %v5930_v37 = vld [vmem:[#allocation17_spill] sm:$0xff]  ;;  %v5934_v32 = vld [vmem:[#allocation23_spill] sm:$0xff]  ;;  %v5936_v58 = vld [vmem:[#allocation24_spill] sm:$0xff] }
 0x12d   : > { %v1994_v3 = vpop.eup %1993  ;;  %2013 = vrsqrt.f32 %v1170_v30  ;;  %v4318_v59 = vmul.f32 %v5898_v12, %v5930_v37  ;;  %v4322_v30 = vmul.f32 %v5900_v2, %v5932_v34  ;;  %v4326_v1 = vmul.f32 %v5902_v52, %v5934_v32  ;;  %v5938_v51 = vld [vmem:[#allocation29_spill] sm:$0xff]  ;;  %v5940_v37 = vld [vmem:[#allocation30_spill] sm:$0xff] }
 0x12e   : > { %5929 = vst [vmem:[#allocation15_spill] sm:$0xff] %v4314_v15  ;;  %v1996_v45 = vpop.eup %1995  ;;  %2015 = vrsqrt.f32 %v1171_v14  ;;  %v4330_v28 = vmul.f32 %v5904_v42, %v5936_v58  ;;  %v4334_v14 = vmul.f32 %v5906_v6, %v5938_v51  ;;  %v4338_v12 = vmul.f32 %v5908_v11, %v5940_v37  ;;  %v5943_v51 = vld [vmem:[#allocation35_spill] sm:$0xff]  ;;  %v5947_v11 = vld [vmem:[#allocation38_spill] sm:$0xff] }
 0x12f   : > { %5931 = vst [vmem:[#allocation16_spill] sm:$0xff] %v4318_v59  ;;  %5933 = vst [vmem:[#allocation20_spill] sm:$0xff] %v4322_v30  ;;  %v1998_v44 = vpop.eup %1997  ;;  %2017 = vrsqrt.f32 %v1172_v24  ;;  %v4340_v2 = vmin.f32 %v1980_v8, 1e+12  ;;  %v4342_v32 = vmin.f32 %v1982_v49, 1e+12  ;;  %v4352_v6 = vmul.f32 %v5910_v19, %v5943_v51 }
 0x130   : > { %5935 = vst [vmem:[#allocation21_spill] sm:$0xff] %v4326_v1  ;;  %5937 = vst [vmem:[#allocation22_spill] sm:$0xff] %v4330_v28  ;;  %v2000_v34 = vpop.eup %1999  ;;  %2019 = vrsqrt.f32 %v1173_v31  ;;  %v4344_v52 = vmin.f32 %v1984_v16, 1e+12  ;;  %v4346_v58 = vmin.f32 %v1986_v43, 1e+12 }
 0x131   : > { %5939 = vst [vmem:[#allocation27_spill] sm:$0xff] %v4334_v14  ;;  %5941 = vst [vmem:[#allocation28_spill] sm:$0xff] %v4338_v12  ;;  %v2002_v24 = vpop.eup %2001  ;;  %2021 = vrsqrt.f32 %v1174_v17  ;;  %v4348_v42 = vmin.f32 %v1988_v26, 1e+12  ;;  %v4355_v31 = vmin.f32 %v1990_v62, 1e+12 }
 0x132   : > { %5942 = vst [vmem:[#allocation33_spill] sm:$0xff] %v4340_v2  ;;  %5944 = vst [vmem:[#allocation34_spill] sm:$0xff] %v4352_v6  ;;  %v2004_v37 = vpop.eup %2003  ;;  %2023 = vrsqrt.f32 %v4212_v10  ;;  %v4357_v8 = vmin.f32 %v1992_v48, 1e+12  ;;  %v5945_v49 = vld [vmem:[#allocation36_spill] sm:$0xff]  ;;  %v1225_v10 = vmul.f32 %v4340_v2, %v5947_v11  ;;  %v5948_v62 = vld [vmem:[#allocation73_spill] sm:$0xff] }
 0x133   : > { %v4361_v16 = vmul.f32 %v5912_v38, %v5945_v49  ;;  %v2006_v17 = vpop.eup %2005  ;;  %2025 = vrsqrt.f32 %v4214_v60  ;;  %v4364_v43 = vmin.f32 %v1994_v3, 1e+12  ;;  %v4366_v26 = vmin.f32 %v1996_v45, 1e+12  ;;  %v5949_v6 = vld [vmem:[#allocation10_spill] sm:$0xff]  ;;  %v5950_v38 = vld [vmem:[#allocation41_spill] sm:$0xff] }
 0x134   : > { %v4368_v51 = vmin.f32 %v1998_v44, 1e+12  ;;  %v2008_v19 = vpop.eup %2007  ;;  %v1226_v48 = vmul.f32 %v4342_v32, %v5948_v62  ;;  %v1227_v49 = vmul.f32 %v4344_v52, %v5949_v6  ;;  %v4380_v3 = vmin.f32 %v2000_v34, 1e+12  ;;  %v5952_v45 = vld [vmem:[#allocation74_spill] sm:$0xff]  ;;  %v5953_v12 = vld [vmem:[#allocation123_spill] sm:$0xff] }
 0x135   : > { %5946 = vst [vmem:[#allocation39_spill] sm:$0xff] %v4361_v16  ;;  %v4378_v16 = vmul.f32 %v4055_v41, %v5950_v38  ;;  %v2010_v60 = vpop.eup %2009  ;;  %v1228_v44 = vmul.f32 %v4346_v58, %v5952_v45  ;;  %v1229_v14 = vmul.f32 %v4348_v42, %v5953_v12  ;;  %v5954_v11 = vld [vmem:[#allocation42_spill] sm:$0xff]  ;;  %v4390_v1 = vmin.f32 %v2002_v24, 1e+12  ;;  %v5956_v6 = vld [vmem:[#allocation75_spill] sm:$0xff]  ;;  %v5960_v59 = vld [vmem:[#allocation76_spill] sm:$0xff] }
 0x136   : > { %v4388_v28 = vmul.f32 %v4060_v46, %v5954_v11  ;;  %v2012_v62 = vpop.eup %2011  ;;  %v1230_v38 = vmul.f32 %v4355_v31, %v5956_v6  ;;  %v5957_v41 = vld [vmem:[#allocation14_spill] sm:$0xff]  ;;  %v1232_v12 = vmul.f32 %v4364_v43, %v5960_v59  ;;  %v5961_v15 = vld [vmem:[#allocation127_spill] sm:$0xff]  ;;  %v5962_v46 = vld [vmem:[#allocation77_spill] sm:$0xff]  ;;  %v4419_v59 = vsub.f32 %v1227_v49, %v4226_v63 }
 0x137   : > { %5951 = vst [vmem:[#allocation40_spill] sm:$0xff] %v4378_v16  ;;  %v1231_v34 = vmul.f32 %v4357_v8, %v5957_v41  ;;  %v5958_v16 = vld [vmem:[#allocation98_spill] sm:$0xff]  ;;  %v2014_v45 = vpop.eup %2013  ;;  %v1233_v11 = vmul.f32 %v4366_v26, %v5961_v15  ;;  %v1234_v24 = vmul.f32 %v4368_v51, %v5962_v46  ;;  %v4410_v41 = vmin.f32 %v2004_v37, 1e+12 }
 0x138   : > { %5955 = vst [vmem:[#allocation44_spill] sm:$0xff] %v4388_v28  ;;  %v4398_v30 = vmul.f32 %v4340_v2, %v5958_v16  ;;  %v5963_v28 = vld [vmem:[#allocation7_spill] sm:$0xff]  ;;  %v2016_v13 = vpop.eup %2015  ;;  %v4413_v16 = vsub.f32 %v1225_v10, %v4218_v9  ;;  %v4416_v2 = vsub.f32 %v1226_v48, %v4222_v56  ;;  %5967 = vst [vmem:[#allocation151_spill] sm:$0xff] %v4419_v59  ;;  %v5969_v46 = vld [vmem:[#allocation78_spill] sm:$0xff]  ;;  %v4431_v10 = vmin.f32 %v2008_v19, 1e+12 }
 0x139   : > { %v4408_v6 = vmul.f32 %v4342_v32, %v5963_v28  ;;  %5964 = vst [vmem:[#allocation55_spill] sm:$0xff] %v4410_v41  ;;  %v2018_v15 = vpop.eup %2017  ;;  %v1235_v57 = vmul.f32 %v4380_v3, %v5969_v46  ;;  %v4426_v28 = vsub.f32 %v1228_v44, %v4230_v18  ;;  %v4429_v37 = vsub.f32 %v1229_v14, %v4234_v21  ;;  %v5973_v56 = vld [vmem:[#allocation81_spill] sm:$0xff] }
 0x13a   : > { %5959 = vst [vmem:[#allocation45_spill] sm:$0xff] %v4398_v30  ;;  %5965 = vst [vmem:[#allocation149_spill] sm:$0xff] %v4413_v16  ;;  %v4421_v30 = vmin.f32 %v2006_v17, 1e+12  ;;  %v2020_v9 = vpop.eup %2019  ;;  %v1236_v48 = vmul.f32 %v4390_v1, %v5973_v56  ;;  %v4436_v63 = vsub.f32 %v1230_v38, %v4238_v5  ;;  %v4439_v17 = vsub.f32 %v1231_v34, %v4242_v50  ;;  %v5982_v38 = vld [vmem:[#allocation82_spill] sm:$0xff]  ;;  %v5983_v34 = vld [vmem:[#allocation101_spill] sm:$0xff] }
 0x13b   : > { %5966 = vst [vmem:[#allocation150_spill] sm:$0xff] %v4416_v2  ;;  %5970 = vst [vmem:[#allocation154_spill] sm:$0xff] %v4426_v28  ;;  %v2022_v49 = vpop.eup %2021  ;;  %v4441_v46 = vmin.f32 %v2010_v60, 1e+12  ;;  %v4444_v18 = vsub.f32 %v1232_v12, %v4246_v55  ;;  %v4447_v21 = vsub.f32 %v1233_v11, %v4250_v0  ;;  %v4450_v19 = vsub.f32 %v1234_v24, %v4254_v54  ;;  %v5986_v11 = vld [vmem:[#allocation85_spill] sm:$0xff]  ;;  %v5989_v24 = vld [vmem:[#allocation86_spill] sm:$0xff] }
 0x13c   : > { %5968 = vst [vmem:[#allocation152_spill] sm:$0xff] %v4421_v30  ;;  %5971 = vst [vmem:[#allocation155_spill] sm:$0xff] %v4429_v37  ;;  %v2024_v14 = vpop.eup %2023  ;;  %v4452_v44 = vmin.f32 %v2012_v62, 1e+12  ;;  %v4454_v5 = vmin.f32 %v2014_v45, 1e+12  ;;  %v1237_v50 = vmul.f32 %v4410_v41, %v5982_v38  ;;  %v4460_v60 = vmul.f32 %v4344_v52, %v5983_v34 }
 0x13d   : > { %5972 = vst [vmem:[#allocation156_spill] sm:$0xff] %v4431_v10  ;;  %5974 = vst [vmem:[#allocation158_spill] sm:$0xff] %v4436_v63  ;;  %v2026_v55 = vpop.eup %2025  ;;  %v4462_v12 = vmin.f32 %v2016_v13, 1e+12  ;;  %v4464_v0 = vmin.f32 %v2018_v15, 1e+12  ;;  %v1238_v54 = vmul.f32 %v4421_v30, %v5986_v11  ;;  %v4469_v62 = vsub.f32 %v1235_v57, %v4258_v53 }
 0x13e   : > { %5975 = vst [vmem:[#allocation159_spill] sm:$0xff] %v4439_v17  ;;  %5976 = vst [vmem:[#allocation160_spill] sm:$0xff] %v4441_v46  ;;  %v4471_v45 = vmin.f32 %v2020_v9, 1e+12  ;;  %v1239_v56 = vmul.f32 %v4431_v10, %v5989_v24  ;;  %v4476_v38 = vsub.f32 %v1236_v48, %v4262_v47  ;;  %v5991_v34 = vld [vmem:[#allocation8_spill] sm:$0xff]  ;;  %v5995_v57 = vld [vmem:[#allocation102_spill] sm:$0xff] }
 0x13f   : > { %5977 = vst [vmem:[#allocation13_spill] sm:$0xff] %v4444_v18  ;;  %5978 = vst [vmem:[#allocation17_spill] sm:$0xff] %v4447_v21  ;;  %v1300_v13 = vmul.f32 %v4346_v58, %v5991_v34  ;;  %v4482_v15 = vmin.f32 %v2024_v14, 1e+12  ;;  %v5994_v21 = vld [vmem:[#allocation89_spill] sm:$0xff]  ;;  %v1301_v53 = vmul.f32 %v4348_v42, %v5995_v57  ;;  %v4495_v34 = vsub.f32 %v1237_v50, %v4266_v4  ;;  %v6004_v17 = vld [vmem:[#allocation94_spill] sm:$0xff] }
 0x140   : > { %5979 = vst [vmem:[#allocation18_spill] sm:$0xff] %v4450_v19  ;;  %5980 = vst [vmem:[#allocation23_spill] sm:$0xff] %v4452_v44  ;;  %v4480_v19 = vmin.f32 %v2022_v49, 1e+12  ;;  %v1240_v11 = vmul.f32 %v4441_v46, %v5994_v21  ;;  %v4488_v9 = vmin.f32 %v2026_v55, 1e+12  ;;  %v4502_v18 = vsub.f32 %v1238_v54, %v4270_v33 }
 0x141   : > { %5981 = vst [vmem:[#allocation24_spill] sm:$0xff] %v4454_v5  ;;  %5984 = vst [vmem:[#allocation29_spill] sm:$0xff] %v4462_v12  ;;  %v5998_v47 = vld [vmem:[#allocation153_spill] sm:$0xff]  ;;  %v6040_v37 = vld [vmem:[#allocation47_spill] sm:$0xff] }
 0x142   : > { %5985 = vst [vmem:[#allocation30_spill] sm:$0xff] %v4464_v0  ;;  %5987 = vst [vmem:[#allocation35_spill] sm:$0xff] %v4469_v62  ;;  %v5997_v62 = vld [vmem:[#allocation90_spill] sm:$0xff]  ;;  %v1242_v48 = vmul.f32 %v4454_v5, %v5998_v47  ;;  %v6000_v49 = vld [vmem:[#allocation93_spill] sm:$0xff]  ;;  %v4509_v47 = vsub.f32 %v1239_v56, %v4274_v40 }
 0x143   : > { %5988 = vst [vmem:[#allocation36_spill] sm:$0xff] %v4471_v45  ;;  %5990 = vst [vmem:[#allocation38_spill] sm:$0xff] %v4476_v38  ;;  %v1241_v24 = vmul.f32 %v4452_v44, %v5997_v62  ;;  %v1243_v14 = vmul.f32 %v4462_v12, %v6000_v49  ;;  %v6001_v38 = vld [vmem:[#allocation157_spill] sm:$0xff]  ;;  %v1245_v62 = vmul.f32 %v4471_v45, %v6004_v17  ;;  %v6012_v40 = vld [vmem:[#allocation6_spill] sm:$0xff] }
 0x144   : > { %5992 = vst [vmem:[#allocation73_spill] sm:$0xff] %v4480_v19  ;;  %5993 = vst [vmem:[#allocation10_spill] sm:$0xff] %v4482_v15  ;;  %v1244_v21 = vmul.f32 %v4464_v0, %v6001_v38  ;;  %v6003_v55 = vld [vmem:[#allocation9_spill] sm:$0xff]  ;;  %v1248_v56 = vmul.f32 %v4488_v9, %v6012_v40  ;;  %v6052_v2 = vld [vmem:[#allocation32_spill] sm:$0xff] }
 0x145   : > { %5996 = vst [vmem:[#allocation41_spill] sm:$0xff] %v4488_v9  ;;  %5999 = vst [vmem:[#allocation74_spill] sm:$0xff] %v4495_v34  ;;  %v1302_v57 = vmul.f32 %v4355_v31, %v6003_v55  ;;  %v6006_v4 = vld [vmem:[#allocation105_spill] sm:$0xff]  ;;  %v6007_v34 = vld [vmem:[#allocation11_spill] sm:$0xff]  ;;  %v4520_v55 = vsub.f32 %v1240_v11, %v4278_v22 }
 0x146   : > { %6002 = vst [vmem:[#allocation123_spill] sm:$0xff] %v4502_v18  ;;  %6005 = vst [vmem:[#allocation42_spill] sm:$0xff] %v4509_v47  ;;  %v1303_v50 = vmul.f32 %v4357_v8, %v6006_v4  ;;  %v1304_v49 = vmul.f32 %v4364_v43, %v6007_v34  ;;  %v6008_v63 = vld [vmem:[#allocation161_spill] sm:$0xff]  ;;  %v6011_v18 = vld [vmem:[#allocation106_spill] sm:$0xff]  ;;  %v4527_v4 = vsub.f32 %v1241_v24, %v4282_v36 }
 0x147   : > { %v1246_v38 = vmul.f32 %v4480_v19, %v6008_v63  ;;  %v6009_v33 = vld [vmem:[#allocation97_spill] sm:$0xff]  ;;  %6010 = vst [vmem:[#allocation75_spill] sm:$0xff] %v4520_v55  ;;  %v1305_v17 = vmul.f32 %v4366_v26, %v6011_v18  ;;  %v4530_v34 = vsub.f32 %v1242_v48, %v4286_v61  ;;  %v6015_v47 = vld [vmem:[#allocation12_spill] sm:$0xff]  ;;  %v4538_v22 = vsub.f32 %v1244_v21, %v4294_v39  ;;  %v6019_v55 = vld [vmem:[#allocation110_spill] sm:$0xff] }
 0x148   : > { %v1247_v54 = vmul.f32 %v4482_v15, %v6009_v33  ;;  %6013 = vst [vmem:[#allocation14_spill] sm:$0xff] %v4527_v4  ;;  %v1306_v63 = vmul.f32 %v4368_v51, %v6015_v47  ;;  %v4535_v33 = vsub.f32 %v1243_v14, %v4290_v29  ;;  %v6018_v11 = vld [vmem:[#allocation109_spill] sm:$0xff]  ;;  %v1308_v40 = vmul.f32 %v4390_v1, %v6019_v55  ;;  %v6021_v61 = vld [vmem:[#allocation111_spill] sm:$0xff]  ;;  %v6022_v48 = vld [vmem:[#allocation114_spill] sm:$0xff] }
 0x149   : > { %6014 = vst [vmem:[#allocation98_spill] sm:$0xff] %v4530_v34  ;;  %6017 = vst [vmem:[#allocation127_spill] sm:$0xff] %v4538_v22  ;;  %v1307_v18 = vmul.f32 %v4380_v3, %v6018_v11  ;;  %v4545_v36 = vsub.f32 %v1245_v62, %v4298_v23  ;;  %v1309_v24 = vmul.f32 %v4410_v41, %v6021_v61  ;;  %v6023_v29 = vld [vmem:[#allocation26_spill] sm:$0xff]  ;;  %v6026_v11 = vld [vmem:[#allocation79_spill] sm:$0xff] }
 0x14a   : > { %6016 = vst [vmem:[#allocation76_spill] sm:$0xff] %v4535_v33  ;;  %v1310_v47 = vmul.f32 %v4421_v30, %v6022_v48  ;;  %v1311_v14 = vmul.f32 %v4431_v10, %v6023_v29  ;;  %v4554_v39 = vsub.f32 %v1246_v38, %v4302_v35  ;;  %v4557_v21 = vsub.f32 %v1247_v54, %v4306_v7  ;;  %v6027_v23 = vld [vmem:[#allocation80_spill] sm:$0xff]  ;;  %v6031_v35 = vld [vmem:[#allocation87_spill] sm:$0xff]  ;;  %v6037_v33 = vld [vmem:[#allocation46_spill] sm:$0xff] }
 0x14b   : > { %6020 = vst [vmem:[#allocation77_spill] sm:$0xff] %v4545_v36  ;;  %v1312_v55 = vmul.f32 %v4441_v46, %v6026_v11  ;;  %v1313_v62 = vmul.f32 %v4452_v44, %v6027_v23  ;;  %v4564_v61 = vsub.f32 %v1248_v56, %v4310_v25  ;;  %v6029_v36 = vld [vmem:[#allocation83_spill] sm:$0xff]  ;;  %v6030_v22 = vld [vmem:[#allocation84_spill] sm:$0xff]  ;;  %v1316_v38 = vmul.f32 %v4464_v0, %v6031_v35  ;;  %v6039_v35 = vld [vmem:[#allocation145_spill] sm:$0xff] }
 0x14c   : > { %6024 = vst [vmem:[#allocation7_spill] sm:$0xff] %v4554_v39  ;;  %6025 = vst [vmem:[#allocation78_spill] sm:$0xff] %v4557_v21  ;;  %v1314_v48 = vmul.f32 %v4454_v5, %v6029_v36  ;;  %v1315_v29 = vmul.f32 %v4462_v12, %v6030_v22  ;;  %v6032_v7 = vld [vmem:[#allocation88_spill] sm:$0xff]  ;;  %v6033_v21 = vld [vmem:[#allocation91_spill] sm:$0xff]  ;;  %v1333_v22 = vmul.f32 %v4073_v20, %v6037_v33 }
 0x14d   : > { %6028 = vst [vmem:[#allocation81_spill] sm:$0xff] %v4564_v61  ;;  %v1317_v54 = vmul.f32 %v4471_v45, %v6032_v7  ;;  %v1318_v11 = vmul.f32 %v4480_v19, %v6033_v21  ;;  %v6034_v39 = vld [vmem:[#allocation92_spill] sm:$0xff]  ;;  %v6035_v25 = vld [vmem:[#allocation95_spill] sm:$0xff]  ;;  %v6041_v7 = vld [vmem:[#allocation146_spill] sm:$0xff] }
 0x14e   : > { %v1319_v23 = vmul.f32 %v4482_v15, %v6034_v39  ;;  %v1320_v56 = vmul.f32 %v4488_v9, %v6035_v25  ;;  %v6036_v61 = vld [vmem:[#allocation147_spill] sm:$0xff]  ;;  %v6038_v34 = vld [vmem:[#allocation148_spill] sm:$0xff]  ;;  %v1335_v28 = vmul.f32 %v6041_v7, %v6040_v37  ;;  %v6042_v59 = vld [vmem:[#allocation49_spill] sm:$0xff] }
 0x14f   : > { %v1332_v36 = vmul.f32 %v4064_v27, %v6036_v61  ;;  %v1334_v4 = vmul.f32 %v6039_v35, %v6038_v34  ;;  %v6043_v21 = vld [vmem:[#allocation165_spill] sm:$0xff]  ;;  %v6044_v45 = vld [vmem:[#allocation50_spill] sm:$0xff]  ;;  %v6046_v0 = vld [vmem:[#allocation52_spill] sm:$0xff] }
 0x150   : > { %v1336_v19 = vmul.f32 %v6043_v21, %v6042_v59  ;;  %v6045_v39 = vld [vmem:[#allocation166_spill] sm:$0xff]  ;;  %v6047_v25 = vld [vmem:[#allocation167_spill] sm:$0xff]  ;;  %v6048_v12 = vld [vmem:[#allocation53_spill] sm:$0xff] }
 0x151   : > { %v1337_v15 = vmul.f32 %v6045_v39, %v6044_v45  ;;  %v1338_v9 = vmul.f32 %v6047_v25, %v6046_v0  ;;  %v6049_v61 = vld [vmem:[#allocation168_spill] sm:$0xff]  ;;  %v6051_v33 = vld [vmem:[#allocation169_spill] sm:$0xff]  ;;  %v6053_v34 = vld [vmem:[#allocation170_spill] sm:$0xff] }
 0x152   : > { %v1339_v27 = vmul.f32 %v6049_v61, %v6048_v12  ;;  %v6050_v5 = vld [vmem:[#allocation56_spill] sm:$0xff]  ;;  %v1341_v35 = vmul.f32 %v6053_v34, %v6052_v2  ;;  %v6054_v16 = vld [vmem:[#allocation162_spill] sm:$0xff]  ;;  %v6055_v37 = vld [vmem:[#allocation171_spill] sm:$0xff] }
 0x153   : > { %v1340_v20 = vmul.f32 %v6051_v33, %v6050_v5  ;;  %v1342_v7 = vmul.f32 %v6055_v37, %v6054_v16  ;;  %v6056_v44 = vld [vmem:[#allocation163_spill] sm:$0xff]  ;;  %v6057_v59 = vld [vmem:[#allocation172_spill] sm:$0xff]  ;;  %v6059_v45 = vld [vmem:[#allocation173_spill] sm:$0xff] }
 0x154   : > { %v1343_v21 = vmul.f32 %v6057_v59, %v6056_v44  ;;  %v6058_v46 = vld [vmem:[#allocation164_spill] sm:$0xff]  ;;  %v6060_v10 = vld [vmem:[#allocation15_spill] sm:$0xff]  ;;  %v6061_v0 = vld [vmem:[#allocation45_spill] sm:$0xff] }
 0x155   : > { %v1344_v39 = vmul.f32 %v6059_v45, %v6058_v46  ;;  %v1345_v25 = vsub.f32 %v6061_v0, %v6060_v10  ;;  %v6062_v30 = vld [vmem:[#allocation16_spill] sm:$0xff]  ;;  %v6064_v33 = vld [vmem:[#allocation21_spill] sm:$0xff]  ;;  %v6065_v34 = vld [vmem:[#allocation22_spill] sm:$0xff] }
 0x156   : > { %v1346_v12 = vsub.f32 %v4408_v6, %v6062_v30  ;;  %v6063_v61 = vld [vmem:[#allocation20_spill] sm:$0xff]  ;;  %v1348_v2 = vsub.f32 %v1300_v13, %v6064_v33  ;;  %v4614_v41 = vsub.f32 %v1301_v53, %v6065_v34  ;;  %v6066_v16 = vld [vmem:[#allocation27_spill] sm:$0xff]  ;;  %v6068_v46 = vld [vmem:[#allocation34_spill] sm:$0xff]  ;;  %v4634_v53 = vsub.f32 %v1308_v40, %v1332_v36 }
 0x157   : > { %v1347_v5 = vsub.f32 %v4460_v60, %v6063_v61  ;;  %v4617_v37 = vsub.f32 %v1302_v57, %v6066_v16  ;;  %v6067_v44 = vld [vmem:[#allocation28_spill] sm:$0xff]  ;;  %v4623_v45 = vsub.f32 %v1304_v49, %v6068_v46  ;;  %v6069_v10 = vld [vmem:[#allocation39_spill] sm:$0xff]  ;;  %v4636_v61 = vsub.f32 %v1309_v24, %v1333_v22  ;;  %v6092_v46 = vld [vmem:[#allocation117_spill] sm:$0xff] }
 0x158   : > { %v4620_v59 = vsub.f32 %v1303_v50, %v6067_v44  ;;  %v4626_v0 = vsub.f32 %v1305_v17, %v6069_v10  ;;  %v6070_v30 = vld [vmem:[#allocation40_spill] sm:$0xff]  ;;  %v4638_v57 = vsub.f32 %v1310_v47, %v1334_v4  ;;  %v4640_v50 = vsub.f32 %v1311_v14, %v1335_v28  ;;  %v6077_v47 = vld [vmem:[#allocation33_spill] sm:$0xff]  ;;  %v6078_v14 = vld [vmem:[#allocation99_spill] sm:$0xff] }
 0x159   : > { %v4629_v6 = vsub.f32 %v1306_v63, %v6070_v30  ;;  %v6071_v60 = vld [vmem:[#allocation44_spill] sm:$0xff]  ;;  %v4642_v33 = vsub.f32 %v1312_v55, %v1336_v19  ;;  %v4644_v49 = vsub.f32 %v1313_v62, %v1337_v15  ;;  %v4646_v17 = vsub.f32 %v1314_v48, %v1338_v9  ;;  %v6080_v55 = vld [vmem:[#allocation103_spill] sm:$0xff] }
 0x15a   : > { %v4632_v13 = vsub.f32 %v1307_v18, %v6071_v60  ;;  %v4648_v34 = vsub.f32 %v1315_v29, %v1339_v27  ;;  %v4650_v63 = vsub.f32 %v1316_v38, %v1340_v20  ;;  %v4652_v18 = vsub.f32 %v1317_v54, %v1341_v35  ;;  %v6076_v28 = vld [vmem:[#allocation96_spill] sm:$0xff]  ;;  %v6082_v29 = vld [vmem:[#allocation19_spill] sm:$0xff] }
 0x15b   : > { %v4654_v40 = vsub.f32 %v1318_v11, %v1342_v7  ;;  %v4656_v24 = vsub.f32 %v1319_v23, %v1343_v21  ;;  %v4658_v4 = vsub.f32 %v1320_v56, %v1344_v39  ;;  %v1369_v19 = vmul.f32 %v6077_v47, %v6076_v28  ;;  %v6079_v9 = vld [vmem:[#allocation100_spill] sm:$0xff]  ;;  %v6084_v11 = vld [vmem:[#allocation25_spill] sm:$0xff]  ;;  %v6086_v36 = vld [vmem:[#allocation107_spill] sm:$0xff] }
 0x15c   : > { %6072 = vst [vmem:[#allocation82_spill] sm:$0xff] %v4652_v18  ;;  %v1370_v15 = vmul.f32 %v4342_v32, %v6078_v14  ;;  %v1371_v27 = vmul.f32 %v4344_v52, %v6079_v9  ;;  %v1372_v20 = vmul.f32 %v4346_v58, %v6080_v55  ;;  %v6081_v62 = vld [vmem:[#allocation104_spill] sm:$0xff]  ;;  %v6085_v23 = vld [vmem:[#allocation133_spill] sm:$0xff]  ;;  %v1374_v22 = vmul.f32 %v4355_v31, %v6086_v36  ;;  %v6094_v10 = vld [vmem:[#allocation55_spill] sm:$0xff] }
 0x15d   : > { %6073 = vst [vmem:[#allocation101_spill] sm:$0xff] %v4654_v40  ;;  %6074 = vst [vmem:[#allocation85_spill] sm:$0xff] %v4656_v24  ;;  %v1373_v48 = vmul.f32 %v4348_v42, %v6081_v62  ;;  %v6083_v38 = vld [vmem:[#allocation132_spill] sm:$0xff]  ;;  %v1394_v56 = vmul.f32 %v6085_v23, %v6084_v11  ;;  %v6089_v21 = vld [vmem:[#allocation113_spill] sm:$0xff]  ;;  %v4694_v31 = vmul.f32 %v4390_v1, %v6092_v46 }
 0x15e   : > { %6075 = vst [vmem:[#allocation86_spill] sm:$0xff] %v4658_v4  ;;  %v1393_v54 = vmul.f32 %v6083_v38, %v6082_v29  ;;  %v6087_v35 = vld [vmem:[#allocation108_spill] sm:$0xff]  ;;  %v4682_v58 = vmul.f32 %v4366_v26, %v6089_v21  ;;  %v6090_v42 = vld [vmem:[#allocation115_spill] sm:$0xff]  ;;  %v6099_v14 = vld [vmem:[#allocation121_spill] sm:$0xff] }
 0x15f   : > { %v1375_v32 = vmul.f32 %v4357_v8, %v6087_v35  ;;  %v6088_v7 = vld [vmem:[#allocation112_spill] sm:$0xff]  ;;  %v4686_v39 = vmul.f32 %v4368_v51, %v6090_v42  ;;  %v6093_v8 = vld [vmem:[#allocation118_spill] sm:$0xff]  ;;  %v6101_v55 = vld [vmem:[#allocation31_spill] sm:$0xff]  ;;  %v1418_v21 = vsub.f32 %v1370_v15, %v1394_v56 }
 0x160   : > { %v1376_v52 = vmul.f32 %v4364_v43, %v6088_v7  ;;  %v6091_v16 = vld [vmem:[#allocation116_spill] sm:$0xff]  ;;  %v4698_v30 = vmul.f32 %v6094_v10, %v6093_v8  ;;  %v6095_v43 = vld [vmem:[#allocation119_spill] sm:$0xff]  ;;  %v6102_v62 = vld [vmem:[#allocation134_spill] sm:$0xff]  ;;  %v1417_v7 = vsub.f32 %v1369_v19, %v1393_v54  ;;  %v1465_v10 = vmul.f32 %v1345_v25, %v1345_v25 }
 0x161   : > { %v4690_v44 = vmul.f32 %v4380_v3, %v6091_v16  ;;  %v6096_v60 = vld [vmem:[#allocation152_spill] sm:$0xff]  ;;  %v1395_v1 = vmul.f32 %v6102_v62, %v6101_v55  ;;  %v6103_v29 = vld [vmem:[#allocation122_spill] sm:$0xff]  ;;  %v6104_v38 = vld [vmem:[#allocation23_spill] sm:$0xff] }
 0x162   : > { %v4702_v26 = vmul.f32 %v6096_v60, %v6095_v43  ;;  %v6097_v28 = vld [vmem:[#allocation120_spill] sm:$0xff]  ;;  %v4716_v11 = vmul.f32 %v6104_v38, %v6103_v29  ;;  %v6105_v23 = vld [vmem:[#allocation37_spill] sm:$0xff]  ;;  %v6106_v36 = vld [vmem:[#allocation135_spill] sm:$0xff]  ;;  %v1466_v43 = vmul.f32 %v1346_v12, %v1346_v12 }
 0x163   : > { %v6098_v47 = vld [vmem:[#allocation156_spill] sm:$0xff]  ;;  %v1396_v35 = vmul.f32 %v6106_v36, %v6105_v23  ;;  %v6107_v42 = vld [vmem:[#allocation149_spill] sm:$0xff]  ;;  %v6108_v46 = vld [vmem:[#allocation150_spill] sm:$0xff]  ;;  %v1419_v25 = vsub.f32 %v1371_v27, %v1395_v1 }
 0x164   : > { %v4706_v51 = vmul.f32 %v6098_v47, %v6097_v28  ;;  %v6100_v9 = vld [vmem:[#allocation160_spill] sm:$0xff]  ;;  %v1441_v16 = vmul.f32 %v6107_v42, %v6107_v42  ;;  %v1442_v8 = vmul.f32 %v6108_v46, %v6108_v46  ;;  %v6113_v62 = vld [vmem:[#allocation126_spill] sm:$0xff]  ;;  %v6115_v15 = vld [vmem:[#allocation43_spill] sm:$0xff]  ;;  %v1467_v46 = vmul.f32 %v1347_v5, %v1347_v5 }
 0x165   : > { %v4710_v3 = vmul.f32 %v6100_v9, %v6099_v14  ;;  %v6109_v60 = vld [vmem:[#allocation124_spill] sm:$0xff]  ;;  %v6111_v14 = vld [vmem:[#allocation125_spill] sm:$0xff]  ;;  %v6114_v29 = vld [vmem:[#allocation30_spill] sm:$0xff] }
 0x166   : > { %v6110_v28 = vld [vmem:[#allocation24_spill] sm:$0xff]  ;;  %v6112_v9 = vld [vmem:[#allocation29_spill] sm:$0xff]  ;;  %v4734_v19 = vmul.f32 %v6114_v29, %v6113_v62  ;;  %v6120_v12 = vld [vmem:[#allocation151_spill] sm:$0xff]  ;;  %v1468_v29 = vmul.f32 %v1348_v2, %v1348_v2  ;;  %v1489_v24 = vadd.f32 %v1465_v10, %v1441_v16  ;;  %v1490_v40 = vadd.f32 %v1466_v43, %v1442_v8 }
 0x167   : > { %v4726_v47 = vmul.f32 %v6110_v28, %v6109_v60  ;;  %v4730_v55 = vmul.f32 %v6112_v9, %v6111_v14  ;;  %v6116_v54 = vld [vmem:[#allocation136_spill] sm:$0xff]  ;;  %v1443_v42 = vmul.f32 %v6120_v12, %v6120_v12  ;;  %v6122_v28 = vld [vmem:[#allocation137_spill] sm:$0xff]  ;;  %v1420_v9 = vsub.f32 %v1372_v20, %v1396_v35  ;;  %v6123_v4 = vld [vmem:[#allocation154_spill] sm:$0xff] }
 0x168   : > { %v1397_v56 = vmul.f32 %v6116_v54, %v6115_v15  ;;  %v6117_v38 = vld [vmem:[#allocation128_spill] sm:$0xff]  ;;  %v1444_v62 = vmul.f32 %v6123_v4, %v6123_v4  ;;  %v1513_v15 = vmul.f32 %v1417_v7, %v1417_v7  ;;  %v1514_v54 = vmul.f32 %v1418_v21, %v1418_v21  ;;  %v6124_v18 = vld [vmem:[#allocation129_spill] sm:$0xff]  ;;  %v6126_v27 = vld [vmem:[#allocation130_spill] sm:$0xff] }
 0x169   : > { %v6118_v23 = vld [vmem:[#allocation36_spill] sm:$0xff]  ;;  %v6127_v1 = vld [vmem:[#allocation10_spill] sm:$0xff]  ;;  %v6128_v5 = vld [vmem:[#allocation51_spill] sm:$0xff]  ;;  %v1469_v2 = vmul.f32 %v4614_v41, %v4614_v41  ;;  %v1491_v7 = vadd.f32 %v1467_v46, %v1443_v42  ;;  %v1515_v21 = vmul.f32 %v1419_v25, %v1419_v25 }
 0x16a   : > { %v4740_v36 = vmul.f32 %v6118_v23, %v6117_v38  ;;  %v6121_v60 = vld [vmem:[#allocation48_spill] sm:$0xff]  ;;  %v6125_v38 = vld [vmem:[#allocation73_spill] sm:$0xff]  ;;  %v4754_v12 = vmul.f32 %v6127_v1, %v6126_v27  ;;  %v1421_v20 = vsub.f32 %v1373_v48, %v1397_v56  ;;  %v6130_v35 = vld [vmem:[#allocation155_spill] sm:$0xff]  ;;  %v1516_v48 = vmul.f32 %v1420_v9, %v1420_v9 }
 0x16b   : > { %v1398_v14 = vmul.f32 %v6122_v28, %v6121_v60  ;;  %v4750_v23 = vmul.f32 %v6125_v38, %v6124_v18  ;;  %v1445_v4 = vmul.f32 %v6130_v35, %v6130_v35  ;;  %v6131_v16 = vld [vmem:[#allocation54_spill] sm:$0xff]  ;;  %v6132_v8 = vld [vmem:[#allocation139_spill] sm:$0xff]  ;;  %v1470_v38 = vmul.f32 %v4617_v37, %v4617_v37  ;;  %v6136_v41 = vld [vmem:[#allocation57_spill] sm:$0xff] }
 0x16c   : > { %6119 = vst [vmem:[#allocation8_spill] sm:$0xff] %v4740_v36  ;;  %v6129_v36 = vld [vmem:[#allocation138_spill] sm:$0xff]  ;;  %v1400_v18 = vmul.f32 %v6132_v8, %v6131_v16  ;;  %v1537_v56 = vadd.f32 %v1513_v15, %v1489_v24  ;;  %v1538_v27 = vadd.f32 %v1514_v54, %v1490_v40  ;;  %v6134_v1 = vld [vmem:[#allocation131_spill] sm:$0xff]  ;;  %v6137_v25 = vld [vmem:[#allocation140_spill] sm:$0xff]  ;;  %v1517_v37 = vmul.f32 %v1421_v20, %v1421_v20 }
 0x16d   : > { %v1399_v60 = vmul.f32 %v6129_v36, %v6128_v5  ;;  %v1422_v10 = vsub.f32 %v1374_v22, %v1398_v14  ;;  %v6133_v43 = vld [vmem:[#allocation158_spill] sm:$0xff]  ;;  %v1492_v36 = vadd.f32 %v1468_v29, %v1444_v62  ;;  %v6135_v5 = vld [vmem:[#allocation41_spill] sm:$0xff]  ;;  %v1401_v42 = vmul.f32 %v6137_v25, %v6136_v41  ;;  %v6138_v16 = vld [vmem:[#allocation159_spill] sm:$0xff] }
 0x16e   : > { %v1446_v28 = vmul.f32 %v6133_v43, %v6133_v43  ;;  %v4770_v35 = vmul.f32 %v6135_v5, %v6134_v1  ;;  %v1447_v22 = vmul.f32 %v6138_v16, %v6138_v16  ;;  %v1471_v14 = vmul.f32 %v4620_v59, %v4620_v59  ;;  %v6139_v9 = vld [vmem:[#allocation58_spill] sm:$0xff]  ;;  %v6140_v24 = vld [vmem:[#allocation141_spill] sm:$0xff]  ;;  %v6142_v41 = vld [vmem:[#allocation59_spill] sm:$0xff] }
 0x16f   : > { %v1423_v46 = vsub.f32 %v1375_v32, %v1399_v60  ;;  %v1493_v8 = vadd.f32 %v1469_v2, %v1445_v4  ;;  %v1539_v62 = vadd.f32 %v1515_v21, %v1491_v7  ;;  %v1402_v40 = vmul.f32 %v6140_v24, %v6139_v9  ;;  %v6141_v15 = vld [vmem:[#allocation13_spill] sm:$0xff]  ;;  %v6143_v25 = vld [vmem:[#allocation142_spill] sm:$0xff] }
 0x170   : > { %v1424_v29 = vsub.f32 %v1376_v52, %v1400_v18  ;;  %v1448_v54 = vmul.f32 %v6141_v15, %v6141_v15  ;;  %v1472_v43 = vmul.f32 %v4623_v45, %v4623_v45  ;;  %v1494_v32 = vadd.f32 %v1470_v38, %v1446_v28  ;;  %v6144_v4 = vld [vmem:[#allocation17_spill] sm:$0xff]  ;;  %v6145_v45 = vld [vmem:[#allocation60_spill] sm:$0xff]  ;;  %v6146_v28 = vld [vmem:[#allocation143_spill] sm:$0xff] }
 0x171   : > { %v1518_v60 = vmul.f32 %v1422_v10, %v1422_v10  ;;  %v1540_v1 = vadd.f32 %v1516_v48, %v1492_v36  ;;  %v1562_v5 = vadd.f32 %v1538_v27, %v1537_v56  ;;  %v1403_v59 = vmul.f32 %v6143_v25, %v6142_v41  ;;  %v6147_v36 = vld [vmem:[#allocation18_spill] sm:$0xff] }
 0x172   : > { %v1425_v20 = vsub.f32 %v4682_v58, %v1401_v42  ;;  %v1449_v2 = vmul.f32 %v6144_v4, %v6144_v4  ;;  %v1473_v52 = vmul.f32 %v4626_v0, %v4626_v0  ;;  %v1495_v7 = vadd.f32 %v1471_v14, %v1447_v22  ;;  %v6148_v0 = vld [vmem:[#allocation61_spill] sm:$0xff]  ;;  %v6149_v22 = vld [vmem:[#allocation144_spill] sm:$0xff] }
 0x173   : > { %v1519_v21 = vmul.f32 %v1423_v46, %v1423_v46  ;;  %v1541_v18 = vadd.f32 %v1517_v37, %v1493_v8  ;;  %v1563_v16 = vadd.f32 %v1562_v5, %v1539_v62  ;;  %v1404_v10 = vmul.f32 %v6146_v28, %v6145_v45  ;;  %v6150_v8 = vld [vmem:[#allocation35_spill] sm:$0xff]  ;;  %v6158_v45 = vld [vmem:[#allocation165_spill] sm:$0xff] }
 0x174   : > { %v1426_v38 = vsub.f32 %v4686_v39, %v1402_v40  ;;  %v1450_v48 = vmul.f32 %v6147_v36, %v6147_v36  ;;  %v1474_v58 = vmul.f32 %v4629_v6, %v4629_v6  ;;  %v1496_v56 = vadd.f32 %v1472_v43, %v1448_v54  ;;  %v6151_v6 = vld [vmem:[#allocation62_spill] sm:$0xff]  ;;  %v6152_v54 = vld [vmem:[#allocation145_spill] sm:$0xff] }
 0x175   : > { %v1520_v27 = vmul.f32 %v1424_v29, %v1424_v29  ;;  %v1542_v42 = vadd.f32 %v1518_v60, %v1494_v32  ;;  %v1564_v9 = vadd.f32 %v1563_v16, %v1540_v1  ;;  %v1405_v46 = vmul.f32 %v6149_v22, %v6148_v0  ;;  %v6153_v32 = vld [vmem:[#allocation38_spill] sm:$0xff] }
 0x176   : > { %v1427_v14 = vsub.f32 %v4690_v44, %v1403_v59  ;;  %v1451_v37 = vmul.f32 %v6150_v8, %v6150_v8  ;;  %v1475_v39 = vmul.f32 %v4632_v13, %v4632_v13  ;;  %v1497_v62 = vadd.f32 %v1473_v52, %v1449_v2  ;;  %v6154_v13 = vld [vmem:[#allocation63_spill] sm:$0xff]  ;;  %v6155_v59 = vld [vmem:[#allocation146_spill] sm:$0xff] }
 0x177   : > { %v1521_v24 = vmul.f32 %v1425_v20, %v1425_v20  ;;  %v1543_v40 = vadd.f32 %v1519_v21, %v1495_v7  ;;  %v1565_v15 = vadd.f32 %v1564_v9, %v1541_v18  ;;  %v1406_v29 = vmul.f32 %v6152_v54, %v6151_v6  ;;  %v6156_v2 = vld [vmem:[#allocation74_spill] sm:$0xff] }
 0x178   : > { %v1428_v43 = vsub.f32 %v4694_v31, %v1404_v10  ;;  %v1452_v60 = vmul.f32 %v6153_v32, %v6153_v32  ;;  %v1476_v44 = vmul.f32 %v4634_v53, %v4634_v53  ;;  %v1498_v1 = vadd.f32 %v1474_v58, %v1450_v48  ;;  %v6157_v53 = vld [vmem:[#allocation64_spill] sm:$0xff]  ;;  %v6162_v22 = vld [vmem:[#allocation42_spill] sm:$0xff] }
 0x179   : > { %v1522_v5 = vmul.f32 %v1426_v38, %v1426_v38  ;;  %v1544_v41 = vadd.f32 %v1520_v27, %v1496_v56  ;;  %v1566_v25 = vadd.f32 %v1565_v15, %v1542_v42  ;;  %v1407_v20 = vmul.f32 %v6155_v59, %v6154_v13  ;;  %v6159_v38 = vld [vmem:[#allocation123_spill] sm:$0xff]  ;;  %v6161_v42 = vld [vmem:[#allocation166_spill] sm:$0xff] }
 0x17a   : > { %v1429_v4 = vsub.f32 %v4698_v30, %v1405_v46  ;;  %v1453_v52 = vmul.f32 %v6156_v2, %v6156_v2  ;;  %v1477_v31 = vmul.f32 %v4636_v61, %v4636_v61  ;;  %v1499_v7 = vadd.f32 %v1475_v39, %v1451_v37  ;;  %v6160_v61 = vld [vmem:[#allocation65_spill] sm:$0xff]  ;;  %v6165_v15 = vld [vmem:[#allocation75_spill] sm:$0xff] }
 0x17b   : > { %v1523_v21 = vmul.f32 %v1427_v14, %v1427_v14  ;;  %v1545_v18 = vadd.f32 %v1521_v24, %v1497_v62  ;;  %v1567_v16 = vadd.f32 %v1566_v25, %v1543_v40  ;;  %v1408_v28 = vmul.f32 %v6158_v45, %v6157_v53  ;;  %v6164_v62 = vld [vmem:[#allocation167_spill] sm:$0xff]  ;;  %v6173_v45 = vld [vmem:[#allocation170_spill] sm:$0xff] }
 0x17c   : > { %v1430_v10 = vsub.f32 %v4702_v26, %v1406_v29  ;;  %v1454_v36 = vmul.f32 %v6159_v38, %v6159_v38  ;;  %v1478_v30 = vmul.f32 %v4638_v57, %v4638_v57  ;;  %v1500_v48 = vadd.f32 %v1476_v44, %v1452_v60  ;;  %v6163_v57 = vld [vmem:[#allocation66_spill] sm:$0xff]  ;;  %v6167_v60 = vld [vmem:[#allocation168_spill] sm:$0xff] }
 0x17d   : > { %v1524_v58 = vmul.f32 %v1428_v43, %v1428_v43  ;;  %v1546_v56 = vadd.f32 %v1522_v5, %v1498_v1  ;;  %v1568_v27 = vadd.f32 %v1567_v16, %v1544_v41  ;;  %v1409_v9 = vmul.f32 %v6161_v42, %v6160_v61  ;;  %v6168_v5 = vld [vmem:[#allocation14_spill] sm:$0xff]  ;;  %v6174_v38 = vld [vmem:[#allocation76_spill] sm:$0xff] }
 0x17e   : > { %v1431_v0 = vsub.f32 %v4706_v51, %v1407_v20  ;;  %v1455_v46 = vmul.f32 %v6162_v22, %v6162_v22  ;;  %v1479_v26 = vmul.f32 %v4640_v50, %v4640_v50  ;;  %v1501_v14 = vadd.f32 %v1477_v31, %v1453_v52  ;;  %v6166_v50 = vld [vmem:[#allocation67_spill] sm:$0xff]  ;;  %v6171_v31 = vld [vmem:[#allocation98_spill] sm:$0xff] }
 0x17f   : > { %v1525_v8 = vmul.f32 %v1429_v4, %v1429_v4  ;;  %v1547_v37 = vadd.f32 %v1523_v21, %v1499_v7  ;;  %v1569_v39 = vadd.f32 %v1568_v27, %v1545_v18  ;;  %v1410_v24 = vmul.f32 %v6164_v62, %v6163_v57  ;;  %v6170_v4 = vld [vmem:[#allocation169_spill] sm:$0xff]  ;;  %v6176_v27 = vld [vmem:[#allocation171_spill] sm:$0xff] }
 0x180   : > { %v1432_v40 = vsub.f32 %v4710_v3, %v1408_v28  ;;  %v1456_v6 = vmul.f32 %v6165_v15, %v6165_v15  ;;  %v1480_v51 = vmul.f32 %v4642_v33, %v4642_v33  ;;  %v1502_v54 = vadd.f32 %v1478_v30, %v1454_v36  ;;  %v6169_v33 = vld [vmem:[#allocation68_spill] sm:$0xff]  ;;  %v6181_v62 = vld [vmem:[#allocation77_spill] sm:$0xff] }
 0x181   : > { %v1526_v29 = vmul.f32 %v1430_v10, %v1430_v10  ;;  %v1548_v43 = vadd.f32 %v1524_v58, %v1500_v48  ;;  %v1570_v32 = vadd.f32 %v1569_v39, %v1546_v56  ;;  %v1411_v44 = vmul.f32 %v6167_v60, %v6166_v50  ;;  %v6180_v39 = vld [vmem:[#allocation8_spill] sm:$0xff]  ;;  %v6185_v50 = vld [vmem:[#allocation7_spill] sm:$0xff] }
 0x182   : > { %v1433_v1 = vsub.f32 %v4716_v11, %v1409_v9  ;;  %v1457_v41 = vmul.f32 %v6168_v5, %v6168_v5  ;;  %v1481_v3 = vmul.f32 %v4644_v49, %v4644_v49  ;;  %v1503_v25 = vadd.f32 %v1479_v26, %v1455_v46  ;;  %v6172_v49 = vld [vmem:[#allocation69_spill] sm:$0xff]  ;;  %v6177_v9 = vld [vmem:[#allocation127_spill] sm:$0xff] }
 0x183   : > { %v1527_v13 = vmul.f32 %v1431_v0, %v1431_v0  ;;  %v1549_v59 = vadd.f32 %v1525_v8, %v1501_v14  ;;  %v1571_v20 = vadd.f32 %v1570_v32, %v1547_v37  ;;  %v1412_v2 = vmul.f32 %v6170_v4, %v6169_v33  ;;  %v6179_v8 = vld [vmem:[#allocation172_spill] sm:$0xff]  ;;  %v6188_v33 = vld [vmem:[#allocation85_spill] sm:$0xff] }
 0x184   : > { %v1434_v52 = vsub.f32 %v4726_v47, %v1410_v24  ;;  %v1458_v7 = vmul.f32 %v6171_v31, %v6171_v31  ;;  %v1482_v11 = vmul.f32 %v4646_v17, %v4646_v17  ;;  %v1504_v21 = vadd.f32 %v1480_v51, %v1456_v6  ;;  %v6175_v17 = vld [vmem:[#allocation70_spill] sm:$0xff] }
 0x185   : > { %v1528_v18 = vmul.f32 %v1432_v40, %v1432_v40  ;;  %v1550_v16 = vadd.f32 %v1526_v29, %v1502_v54  ;;  %v1572_v53 = vadd.f32 %v1571_v20, %v1548_v43  ;;  %v1413_v28 = vmul.f32 %v6173_v45, %v6172_v49  ;;  %v6182_v40 = vld [vmem:[#allocation82_spill] sm:$0xff]  ;;  %v6184_v29 = vld [vmem:[#allocation173_spill] sm:$0xff] }
 0x186   : > { %v1435_v10 = vsub.f32 %v4730_v55, %v1411_v44  ;;  %v1459_v36 = vmul.f32 %v6174_v38, %v6174_v38  ;;  %v1483_v47 = vmul.f32 %v4648_v34, %v4648_v34  ;;  %v1505_v30 = vadd.f32 %v1481_v3, %v1457_v41  ;;  %v6178_v34 = vld [vmem:[#allocation71_spill] sm:$0xff]  ;;  %v6186_v44 = vld [vmem:[#allocation101_spill] sm:$0xff] }
 0x187   : > { %v1529_v48 = vmul.f32 %v1433_v1, %v1433_v1  ;;  %v1551_v58 = vadd.f32 %v1527_v13, %v1503_v25  ;;  %v1573_v56 = vadd.f32 %v1572_v53, %v1549_v59  ;;  %v1414_v61 = vmul.f32 %v6176_v27, %v6175_v17  ;;  %v6187_v59 = vld [vmem:[#allocation78_spill] sm:$0xff] }
 0x188   : > { %v1436_v42 = vsub.f32 %v4734_v19, %v1412_v2  ;;  %v1460_v0 = vmul.f32 %v6177_v9, %v6177_v9  ;;  %v1484_v55 = vmul.f32 %v4650_v63, %v4650_v63  ;;  %v1506_v22 = vadd.f32 %v1482_v11, %v1458_v7  ;;  %v6183_v63 = vld [vmem:[#allocation72_spill] sm:$0xff]  ;;  %v6189_v11 = vld [vmem:[#allocation81_spill] sm:$0xff] }
 0x189   : > { %v1530_v46 = vmul.f32 %v1434_v52, %v1434_v52  ;;  %v1552_v26 = vadd.f32 %v1528_v18, %v1504_v21  ;;  %v1574_v14 = vadd.f32 %v1573_v56, %v1550_v16  ;;  %v1415_v37 = vmul.f32 %v6179_v8, %v6178_v34  ;;  %v6190_v18 = vld [vmem:[#allocation86_spill] sm:$0xff] }
 0x18a   : > { %v1437_v57 = vsub.f32 %v6180_v39, %v1413_v28  ;;  %v1461_v24 = vmul.f32 %v6181_v62, %v6181_v62  ;;  %v1485_v19 = vmul.f32 %v6182_v40, %v6182_v40  ;;  %v1507_v15 = vadd.f32 %v1483_v47, %v1459_v36 }
 0x18b   : > { %v1531_v6 = vmul.f32 %v1435_v10, %v1435_v10  ;;  %v1553_v51 = vadd.f32 %v1529_v48, %v1505_v30  ;;  %v1575_v54 = vadd.f32 %v1574_v14, %v1551_v58  ;;  %v1416_v43 = vmul.f32 %v6184_v29, %v6183_v63 }
 0x18c   : > { %v1438_v32 = vsub.f32 %v4750_v23, %v1414_v61  ;;  %v1462_v60 = vmul.f32 %v6185_v50, %v6185_v50  ;;  %v1486_v1 = vmul.f32 %v6186_v44, %v6186_v44  ;;  %v1508_v5 = vadd.f32 %v1484_v55, %v1460_v0 }
 0x18d   : > { %v1532_v41 = vmul.f32 %v1436_v42, %v1436_v42  ;;  %v1554_v3 = vadd.f32 %v1530_v46, %v1506_v22  ;;  %v1576_v25 = vadd.f32 %v1575_v54, %v1552_v26  ;;  %v1439_v13 = vsub.f32 %v4754_v12, %v1415_v37 }
 0x18e   : > { %v1463_v20 = vmul.f32 %v6187_v59, %v6187_v59  ;;  %v1487_v4 = vmul.f32 %v6188_v33, %v6188_v33  ;;  %v1509_v2 = vadd.f32 %v1485_v19, %v1461_v24  ;;  %v1533_v23 = vmul.f32 %v1437_v57, %v1437_v57 }
 0x18f   : > { %v1555_v52 = vadd.f32 %v1531_v6, %v1507_v15  ;;  %v1577_v31 = vadd.f32 %v1576_v25, %v1553_v51  ;;  %v1440_v7 = vsub.f32 %v4770_v35, %v1416_v43  ;;  %v1464_v21 = vmul.f32 %v6189_v11, %v6189_v11 }
 0x190   : > { %v1488_v16 = vmul.f32 %v6190_v18, %v6190_v18  ;;  %v1510_v12 = vadd.f32 %v1486_v1, %v1462_v60  ;;  %v1534_v53 = vmul.f32 %v1438_v32, %v1438_v32  ;;  %v1556_v49 = vadd.f32 %v1532_v41, %v1508_v5 }
 0x191   : > { %v1578_v45 = vadd.f32 %v1577_v31, %v1554_v3  ;;  %v1511_v28 = vadd.f32 %v1487_v4, %v1463_v20  ;;  %v1535_v10 = vmul.f32 %v1439_v13, %v1439_v13  ;;  %v1557_v38 = vadd.f32 %v1533_v23, %v1509_v2 }
 0x192   : > { %v1512_v47 = vadd.f32 %v1488_v16, %v1464_v21  ;;  %v1536_v30 = vmul.f32 %v1440_v7, %v1440_v7  ;;  %v1558_v48 = vadd.f32 %v1534_v53, %v1510_v12 }
 0x193   : > { %v1579_v36 = vadd.f32 %v1578_v45, %v1555_v52  ;;  %v1559_v35 = vadd.f32 %v1535_v10, %v1511_v28 }
 0x194   : > { %v1560_v17 = vadd.f32 %v1536_v30, %v1512_v47 }
 0x195   : > { %v1580_v58 = vadd.f32 %v1579_v36, %v1556_v49 }
 0x197   : > { %v1581_v56 = vadd.f32 %v1580_v58, %v1557_v38 }
 0x199   : > { %v1582_v27 = vadd.f32 %v1581_v56, %v1558_v48 }
 0x19b   : > { %v1583_v61 = vadd.f32 %v1582_v27, %v1559_v35 }
 0x19d   : > { %v1584_v42 = vadd.f32 %v1583_v61, %v1560_v17 }
 0x19f   : > { %1591 = vst [vmem:[%s246_s17] sm:$0xff] %v1584_v42 }
 0x1a0 PF: > { %s14_s14 = sadd.s32 1, %s2068_s14   ;;  %s6191_s12 = smov %s2064_s13 }
 0x1a1   : > { %p11_p2 = scmp.ge.s32.totalorder %s14_s14, 4   ;;  %s6192_s13 = smov %s6194_s16 }
 0x1a3   :  { %13 = sbr.rel (!%p11_p2) target bundleno = 2 (0x2), region = 82 }
 0x1aa   :  { %1611 = vsyncpa [#allocation4], 1 }
 0x1ab   :  { %1613 = vsyncpa [#allocation4 + $0x1], 1 }

</bundles_post_ra>
